<compile_context>
chip_gen: v7x
topology: tpu7x:2x2x1
jax: 0.10.0
libtpu: 0.0.40
codegen_flags: <defaults>
</compile_context>

<pallas_src>
import functools
import math

import jax
import jax.numpy as jnp
from jax import lax
from jax.experimental import pallas as pl
from jax.experimental.pallas import tpu as pltpu


# ----------------------------------------------------------------------------
# Pallas kernel: fused im2col + single matmul + (BN shift) + ReLU for one
# (batch, row-tile) grid step.
# ----------------------------------------------------------------------------
def _conv_bn_relu_kernel(x_ref, w_ref, shift_ref, o_ref, *,
                         k, stride, dilation, TMo, Wo, Cin):
    """
    x_ref:     (1, 1, TIH, Wp, Cin)  bf16  halo row-tile of the padded input
    w_ref:     (k*k*Cin, Np)         bf16  BN-scale-folded weights (Np = Cout pad 128)
    shift_ref: (1, Np)               f32   folded BN/bias shift
    o_ref:     (1, TMo*Wo, Np)       bf16
    """
    taps = []
    for i in range(k):
        hs0 = i * dilation
        for j in range(k):
            ws0 = j * dilation
            if stride == 1:
                # One contiguous 3-D window per tap (no per-row slicing/concat).
                tap = x_ref[0, 0, hs0:hs0 + TMo, ws0:ws0 + Wo, :]   # (TMo, Wo, Cin)
                tap = tap.reshape(TMo * Wo, Cin)
            else:
                # Strided load reads exactly Wo elements per output row.
                rows = []
                for r in range(TMo):
                    hs = r * stride + hs0
                    rows.append(x_ref[0, 0, hs, pl.ds(ws0, Wo, stride=stride), :])
                tap = rows[0] if TMo == 1 else jnp.concatenate(rows, axis=0)
            taps.append(tap)

    # im2col LHS: taps stacked along the lane axis -> (TMo*Wo, k*k*Cin); never in HBM.
    lhs = taps[0] if len(taps) == 1 else jnp.concatenate(taps, axis=-1)

    # Single MXU contraction with K = k*k*Cin, native f32 accumulation.
    acc = jnp.dot(lhs, w_ref[...], preferred_element_type=jnp.float32)

    # Folded-BN shift + ReLU epilogue; store bf16.
    y = jnp.maximum(acc + shift_ref[...], 0.0)
    o_ref[0] = y.astype(o_ref.dtype)


# ----------------------------------------------------------------------------
# Host-side wrapper
# ----------------------------------------------------------------------------
def basic_conv_forward(x_nchw, folded, *, k, stride, padding, dilation=1,
                       row_tile=None, vmem_block_budget=8 * 2**20):
    """Basic_Conv.forward: relu(bn(conv(x))).  x is NCHW, returns NCHW (f32)."""
    w_p, shift_p, cout = folded["w"], folded["shift"], folded["cout"]
    Np = w_p.shape[-1]
    B, Cin, H, W = x_nchw.shape

    Hp = H + 2 * padding
    Wp = W + 2 * padding
    Ho = (Hp - dilation * (k - 1) - 1) // stride + 1
    Wo = (Wp - dilation * (k - 1) - 1) // stride + 1

    # ---- row-tile selection (bounded VMEM; re-derives itself for v7x's 64 MiB) ----
    m = 16 // math.gcd(Wo, 16)                  # keep TMo*Wo sublane-pack aligned (bf16)
    ho_cap = ((Ho + m - 1) // m) * m

    def vmem_cost(tmo):                          # rough per-step VMEM footprint
        tih = (tmo - 1) * stride + (k - 1) * dilation + 1
        x_blk = tih * Wp * Cin * 2               # bf16 input halo block
        o_blk = tmo * Wo * Np * 2                # bf16 output block
        lhs = tmo * Wo * k * k * Cin * 2         # im2col temp
        acc = tmo * Wo * Np * 4                  # f32 accumulator
        return 2 * (x_blk + o_blk) + lhs + acc   # x2: pipeline double buffers

    if row_tile is None:
        TMo = m
        while TMo + m <= ho_cap and vmem_cost(TMo + m) <= vmem_block_budget:
            TMo += m
    else:
        TMo = max(m, (int(row_tile) // m) * m)
    TMo = min(TMo, ho_cap)
    R = -(-Ho // TMo)
    Ho_pad = R * TMo
    TIH = (TMo - 1) * stride + (k - 1) * dilation + 1

    # ---- input prep: NCHW -> NHWC, bf16 cast fused into the single pad pass ----
    x = jnp.transpose(x_nchw, (0, 2, 3, 1)).astype(jnp.bfloat16)
    Hp_need = (Ho_pad - 1) * stride + dilation * (k - 1) + 1
    pad_bot = padding + max(0, Hp_need - Hp)     # extra rows so padded row tiles stay in-bounds
    xp = jnp.pad(x, ((0, 0), (padding, pad_bot), (padding, padding), (0, 0)))
    # Pre-tile rows with their halos -> (B, R, TIH, Wp, Cin) so non-overlapping
    # BlockSpecs can auto-pipeline them.  (Only (k-1)*dil rows per tile are duplicated.)
    xt = jnp.stack([xp[:, r * TMo * stride: r * TMo * stride + TIH] for r in range(R)],
                   axis=1)

    w_bytes = w_p.size * 2
    est = vmem_cost(TMo) + 2 * w_bytes + 2 * Np * 4 + (2 << 20)
    vmem_limit = int(min(max(est, 32 * 2**20), 64 * 2**20))

    kern = functools.partial(_conv_bn_relu_kernel, k=k, stride=stride,
                             dilation=dilation, TMo=TMo, Wo=Wo, Cin=Cin)

    out = pl.pallas_call(
        kern,
        out_shape=jax.ShapeDtypeStruct((B, Ho_pad * Wo, Np), jnp.bfloat16),
        grid=(B, R),
        in_specs=[
            pl.BlockSpec((1, 1, TIH, Wp, Cin), lambda b, r: (b, r, 0, 0, 0)),
            pl.BlockSpec((k * k * Cin, Np), lambda b, r: (0, 0)),
            pl.BlockSpec((1, Np), lambda b, r: (0, 0)),
        ],
        out_specs=pl.BlockSpec((1, TMo * Wo, Np), lambda b, r: (b, r, 0)),
        compiler_params=pltpu.CompilerParams(
            dimension_semantics=("parallel", "parallel"),
            vmem_limit_bytes=vmem_limit),
    )(xt, w_p, shift_p)

    out = out.reshape(B, Ho_pad, Wo, Np)[:, :Ho, :, :cout].astype(jnp.float32)
    return jnp.transpose(out, (0, 3, 1, 2))       # NHWC -> NCHW


# ----------------------------------------------------------------------------
# Parameters: raw (PyTorch-style) + BN-folded / lane-padded kernel form
# ----------------------------------------------------------------------------
def init_params(key, cin, cout, k):
    ks = jax.random.split(key, 6)
    return {
        "weight": 0.1 * jax.random.normal(ks[0], (cout, cin, k, k), jnp.float32),
        "bias":   0.1 * jax.random.normal(ks[1], (cout,), jnp.float32),
        "gamma":  1.0 + 0.1 * jax.random.normal(ks[2], (cout,), jnp.float32),
        "beta":   0.1 * jax.random.normal(ks[3], (cout,), jnp.float32),
        "mean":   0.1 * jax.random.normal(ks[4], (cout,), jnp.float32),
        "var":    1.0 + jnp.abs(0.1 * jax.random.normal(ks[5], (cout,), jnp.float32)),
    }


def fold_params(raw, k, eps=1e-5):
    """Fold eval-mode BN (and conv bias) into the weight matrix + one shift vector.

    NOTE: BN scale is folded into bf16 weights; if tighter accuracy is needed, keep
    the per-channel scale as an f32 multiply in the kernel epilogue instead.
    """
    cout, cin = raw["weight"].shape[:2]
    s = raw["gamma"] * lax.rsqrt(raw["var"] + eps)
    # PyTorch (Cout, Cin, KH, KW) -> (KH*KW*Cin, Cout): tap-major, channel-minor rows,
    # matching the lane-axis concatenation order of the tap slabs in the kernel.
    w = jnp.transpose(raw["weight"], (2, 3, 1, 0)).reshape(k * k * cin, cout)
    w = w * s[None, :]
    shift = s * (raw["bias"] - raw["mean"]) + raw["beta"]
    npad = ((cout + 127) // 128) * 128            # lane-dense output channels
    w_p = jnp.pad(w, ((0, 0), (0, npad - cout))).astype(jnp.bfloat16)
    shift_p = jnp.pad(shift, (0, npad - cout)).reshape(1, npad).astype(jnp.float32)
    return {"w": w_p, "shift": shift_p, "cout": cout}


# ----------------------------------------------------------------------------
# Pure-JAX reference (f32) for correctness checking
# ----------------------------------------------------------------------------
def reference_forward(x_nchw, raw, *, stride, padding, eps=1e-5):
    y = lax.conv_general_dilated(
        x_nchw, raw["weight"], window_strides=(stride, stride),
        padding=[(padding, padding), (padding, padding)],
        dimension_numbers=("NCHW", "OIHW", "NCHW"))
    y = y + raw["bias"][None, :, None, None]
    s = raw["gamma"] / jnp.sqrt(raw["var"] + eps)
    y = s[None, :, None, None] * (y - raw["mean"][None, :, None, None]) \
        + raw["beta"][None, :, None, None]
    return jnp.maximum(y, 0.0)


# ----------------------------------------------------------------------------
if __name__ == "__main__":
    key = jax.random.PRNGKey(0)
    B, Cin, H, W = 2, 4, 16, 16
    Cout, K, STRIDE, PAD = 8, 3, 1, 1

    raw = init_params(jax.random.fold_in(key, 1), Cin, Cout, K)
    folded = fold_params(raw, K)
    x = jax.random.normal(jax.random.fold_in(key, 2), (B, Cin, H, W), jnp.float32)

    ref = reference_forward(x, raw, stride=STRIDE, padding=PAD)

    # (a) auto row tile (whole image fits one tile at this size)
    y = jax.block_until_ready(
        basic_conv_forward(x, folded, k=K, stride=STRIDE, padding=PAD))
    # (b) forced multi-tile path: exercises the halo row-tiling (R = 4 tiles)
    y_tiled = jax.block_until_ready(
        basic_conv_forward(x, folded, k=K, stride=STRIDE, padding=PAD, row_tile=4))

    for out in (y, y_tiled):
        assert out.shape == ref.shape == (B, Cout, H, W), (out.shape, ref.shape)
        assert bool(jnp.all(jnp.isfinite(out)))
        max_err = float(jnp.max(jnp.abs(out - ref)))
        assert bool(jnp.allclose(out, ref, atol=3e-2, rtol=3e-2)), max_err
    print("KERNEL_OK")
</pallas_src>

<mosaic_0001>
module attributes {stable_mosaic.version = 11 : i64} {
  func.func @_conv_bn_relu_kernel(%arg0: i32, %arg1: i32, %arg2: memref<1x1x18x18x4xbf16, #tpu.memory_space<vmem>>, %arg3: memref<36x128xbf16, #tpu.memory_space<vmem>>, %arg4: memref<1x128xf32, #tpu.memory_space<vmem>>, %arg5: memref<1x256x128xbf16, #tpu.memory_space<vmem>>) attributes {dimension_semantics = [#tpu.dimension_semantics<parallel>, #tpu.dimension_semantics<parallel>], iteration_bounds = array<i64: 2, 1>, scalar_prefetch = 0 : i64, scratch_operands = 0 : i64, tpu.core_type = #tpu.core_type<tc>, window_params = [{transform_indices = @transform_0, window_bounds = array<i64: 1, 1, 18, 18, 4>}, {pipeline_mode = #tpu.pipeline_mode<synchronous>, transform_indices = @transform_1, window_bounds = array<i64: 36, 128>}, {pipeline_mode = #tpu.pipeline_mode<synchronous>, transform_indices = @transform_2, window_bounds = array<i64: 1, 128>}, {transform_indices = @transform_3, window_bounds = array<i64: 1, 256, 128>}]} {
    %c0 = arith.constant 0 : index
    %c0_0 = arith.constant 0 : index
    %c0_1 = arith.constant 0 : index
    %c0_2 = arith.constant 0 : index
    %c0_3 = arith.constant 0 : index
    %0 = vector.load %arg2[%c0, %c0_0, %c0_1, %c0_2, %c0_3] : memref<1x1x18x18x4xbf16, #tpu.memory_space<vmem>>, vector<1x1x16x16x4xbf16>
    %1 = vector.shape_cast %0 : vector<1x1x16x16x4xbf16> to vector<16x16x4xbf16>
    %2 = vector.shape_cast %1 : vector<16x16x4xbf16> to vector<256x4xbf16>
    %c0_4 = arith.constant 0 : index
    %c0_5 = arith.constant 0 : index
    %c0_6 = arith.constant 0 : index
    %c1 = arith.constant 1 : index
    %c0_7 = arith.constant 0 : index
    %3 = vector.load %arg2[%c0_4, %c0_5, %c0_6, %c1, %c0_7] : memref<1x1x18x18x4xbf16, #tpu.memory_space<vmem>>, vector<1x1x16x16x4xbf16>
    %4 = vector.shape_cast %3 : vector<1x1x16x16x4xbf16> to vector<16x16x4xbf16>
    %5 = vector.shape_cast %4 : vector<16x16x4xbf16> to vector<256x4xbf16>
    %c0_8 = arith.constant 0 : index
    %c0_9 = arith.constant 0 : index
    %c0_10 = arith.constant 0 : index
    %c2 = arith.constant 2 : index
    %c0_11 = arith.constant 0 : index
    %6 = vector.load %arg2[%c0_8, %c0_9, %c0_10, %c2, %c0_11] : memref<1x1x18x18x4xbf16, #tpu.memory_space<vmem>>, vector<1x1x16x16x4xbf16>
    %7 = vector.shape_cast %6 : vector<1x1x16x16x4xbf16> to vector<16x16x4xbf16>
    %8 = vector.shape_cast %7 : vector<16x16x4xbf16> to vector<256x4xbf16>
    %c0_12 = arith.constant 0 : index
    %c0_13 = arith.constant 0 : index
    %c1_14 = arith.constant 1 : index
    %c0_15 = arith.constant 0 : index
    %c0_16 = arith.constant 0 : index
    %9 = vector.load %arg2[%c0_12, %c0_13, %c1_14, %c0_15, %c0_16] : memref<1x1x18x18x4xbf16, #tpu.memory_space<vmem>>, vector<1x1x16x16x4xbf16>
    %10 = vector.shape_cast %9 : vector<1x1x16x16x4xbf16> to vector<16x16x4xbf16>
    %11 = vector.shape_cast %10 : vector<16x16x4xbf16> to vector<256x4xbf16>
    %c0_17 = arith.constant 0 : index
    %c0_18 = arith.constant 0 : index
    %c1_19 = arith.constant 1 : index
    %c1_20 = arith.constant 1 : index
    %c0_21 = arith.constant 0 : index
    %12 = vector.load %arg2[%c0_17, %c0_18, %c1_19, %c1_20, %c0_21] : memref<1x1x18x18x4xbf16, #tpu.memory_space<vmem>>, vector<1x1x16x16x4xbf16>
    %13 = vector.shape_cast %12 : vector<1x1x16x16x4xbf16> to vector<16x16x4xbf16>
    %14 = vector.shape_cast %13 : vector<16x16x4xbf16> to vector<256x4xbf16>
    %c0_22 = arith.constant 0 : index
    %c0_23 = arith.constant 0 : index
    %c1_24 = arith.constant 1 : index
    %c2_25 = arith.constant 2 : index
    %c0_26 = arith.constant 0 : index
    %15 = vector.load %arg2[%c0_22, %c0_23, %c1_24, %c2_25, %c0_26] : memref<1x1x18x18x4xbf16, #tpu.memory_space<vmem>>, vector<1x1x16x16x4xbf16>
    %16 = vector.shape_cast %15 : vector<1x1x16x16x4xbf16> to vector<16x16x4xbf16>
    %17 = vector.shape_cast %16 : vector<16x16x4xbf16> to vector<256x4xbf16>
    %c0_27 = arith.constant 0 : index
    %c0_28 = arith.constant 0 : index
    %c2_29 = arith.constant 2 : index
    %c0_30 = arith.constant 0 : index
    %c0_31 = arith.constant 0 : index
    %18 = vector.load %arg2[%c0_27, %c0_28, %c2_29, %c0_30, %c0_31] : memref<1x1x18x18x4xbf16, #tpu.memory_space<vmem>>, vector<1x1x16x16x4xbf16>
    %19 = vector.shape_cast %18 : vector<1x1x16x16x4xbf16> to vector<16x16x4xbf16>
    %20 = vector.shape_cast %19 : vector<16x16x4xbf16> to vector<256x4xbf16>
    %c0_32 = arith.constant 0 : index
    %c0_33 = arith.constant 0 : index
    %c2_34 = arith.constant 2 : index
    %c1_35 = arith.constant 1 : index
    %c0_36 = arith.constant 0 : index
    %21 = vector.load %arg2[%c0_32, %c0_33, %c2_34, %c1_35, %c0_36] : memref<1x1x18x18x4xbf16, #tpu.memory_space<vmem>>, vector<1x1x16x16x4xbf16>
    %22 = vector.shape_cast %21 : vector<1x1x16x16x4xbf16> to vector<16x16x4xbf16>
    %23 = vector.shape_cast %22 : vector<16x16x4xbf16> to vector<256x4xbf16>
    %c0_37 = arith.constant 0 : index
    %c0_38 = arith.constant 0 : index
    %c2_39 = arith.constant 2 : index
    %c2_40 = arith.constant 2 : index
    %c0_41 = arith.constant 0 : index
    %24 = vector.load %arg2[%c0_37, %c0_38, %c2_39, %c2_40, %c0_41] : memref<1x1x18x18x4xbf16, #tpu.memory_space<vmem>>, vector<1x1x16x16x4xbf16>
    %25 = vector.shape_cast %24 : vector<1x1x16x16x4xbf16> to vector<16x16x4xbf16>
    %26 = vector.shape_cast %25 : vector<16x16x4xbf16> to vector<256x4xbf16>
    %27 = tpu.concatenate %2, %5, %8, %11, %14, %17, %20, %23, %26 in 1 : vector<256x4xbf16>, vector<256x4xbf16>, vector<256x4xbf16>, vector<256x4xbf16>, vector<256x4xbf16>, vector<256x4xbf16>, vector<256x4xbf16>, vector<256x4xbf16>, vector<256x4xbf16> -> vector<256x36xbf16>
    %c0_42 = arith.constant 0 : index
    %c0_43 = arith.constant 0 : index
    %28 = vector.load %arg3[%c0_42, %c0_43] : memref<36x128xbf16, #tpu.memory_space<vmem>>, vector<36x128xbf16>
    %cst = arith.constant dense<0.000000e+00> : vector<256x128xf32>
    %29 = tpu.matmul %27, %28, %cst {dimension_numbers = #tpu.dot_dimension_numbers<[1], [0], [0], [1], [0, 0, 1, 1], [], []>} : vector<256x36xbf16>, vector<36x128xbf16>, vector<256x128xf32> -> vector<256x128xf32>
    %c0_44 = arith.constant 0 : index
    %c0_45 = arith.constant 0 : index
    %30 = vector.load %arg4[%c0_44, %c0_45] : memref<1x128xf32, #tpu.memory_space<vmem>>, vector<1x128xf32>
    %31 = vector.broadcast %30 : vector<1x128xf32> to vector<256x128xf32>
    %32 = arith.addf %29, %31 : vector<256x128xf32>
    %cst_46 = arith.constant 0.000000e+00 : f32
    %33 = vector.broadcast %cst_46 : f32 to vector<256x128xf32>
    %34 = arith.maximumf %32, %33 : vector<256x128xf32>
    %35 = arith.truncf %34 : vector<256x128xf32> to vector<256x128xbf16>
    %c0_47 = arith.constant 0 : index
    %c0_48 = arith.constant 0 : index
    %c0_49 = arith.constant 0 : index
    %36 = vector.load %arg5[%c0_47, %c0_48, %c0_49] : memref<1x256x128xbf16, #tpu.memory_space<vmem>>, vector<1x256x128xbf16>
    %37 = vector.shape_cast %36 : vector<1x256x128xbf16> to vector<256x128xbf16>
    %38 = vector.shape_cast %35 : vector<256x128xbf16> to vector<1x256x128xbf16>
    tpu.vector_store %arg5[%c0_47, %c0_48, %c0_49], %38 {strides = array<i32>} : memref<1x256x128xbf16, #tpu.memory_space<vmem>>, vector<1x256x128xbf16>,
    return
  }
  func.func @transform_0(%arg0: i32, %arg1: i32) -> (i32, i32, i32, i32, i32) {
    %c0_i32 = arith.constant 0 : i32
    %c0_i32_0 = arith.constant 0 : i32
    %c0_i32_1 = arith.constant 0 : i32
    %c0_i32_2 = arith.constant 0 : i32
    return %arg0, %arg1, %c0_i32, %c0_i32_0, %c0_i32_1 : i32, i32, i32, i32, i32
  }
  func.func @transform_1(%arg0: i32, %arg1: i32) -> (i32, i32) {
    %c0_i32 = arith.constant 0 : i32
    %c0_i32_0 = arith.constant 0 : i32
    %c0_i32_1 = arith.constant 0 : i32
    return %c0_i32, %c0_i32_0 : i32, i32
  }
  func.func @transform_2(%arg0: i32, %arg1: i32) -> (i32, i32) {
    %c0_i32 = arith.constant 0 : i32
    %c0_i32_0 = arith.constant 0 : i32
    %c0_i32_1 = arith.constant 0 : i32
    return %c0_i32, %c0_i32_0 : i32, i32
  }
  func.func @transform_3(%arg0: i32, %arg1: i32) -> (i32, i32, i32) {
    %c0_i32 = arith.constant 0 : i32
    %c0_i32_0 = arith.constant 0 : i32
    return %arg0, %arg1, %c0_i32 : i32, i32, i32
  }
}

</mosaic_0001>

<bundles_post_ra>
// kernel: tpu_custom_call.1
= control target key start
LH: loop header
LB: loop body
LE: loop exit
PB: predicated region body
PF: predicated region fallthrough
CT: control target
= control target key end

     0   :  { %8 = vsyncpa [#allocation3], 0  ;;  %s6374_s0 = inlined_call_operand.vmem [shape: bf16[2,1,18,18,4], index: 0, kind: input, shape index: {}]   ;;  %s6375_s1 = inlined_call_operand.vmem [shape: bf16[36,128], index: 1, kind: input, shape index: {}]   ;;  %s6376_s2 = inlined_call_operand.vmem [shape: f32[1,128], index: 2, kind: input, shape index: {}]   ;;  %s6377_s3 = inlined_call_operand.hbm [shape: bf16[2,256,128], index: 3, kind: output, shape index: {}]  }
   0x1   :  { %10 = vsyncpa [#allocation3 + $0x1], 0  ;;  %s4393_s12 = smov 0   ;;  %s4395_s13 = smov 0  }
   0x2   :  { %s4397_s14 = smov 0   ;;  %s4399_s15 = smov 0  }
   0x3   :  { %s4401_s16 = smov 0   ;;  %s4403_s17 = smov 0  }
   0x4 LB: > { %s3562_s18 = sadd.s32 4294967295, %s4361_s17   ;;  %s3563_s19 = sadd.s32 4294967294, %s4361_s17   ;;  %s4361_s17 = sphi %s4403_s17, %s16_s17   ;;  %s4357_s16 = sphi %s4401_s16, %s6388_s16   ;;  %s4353_s15 = sphi %s4399_s15, %s6387_s15   ;;  %s4349_s14 = sphi %s4397_s14, %s6386_s14   ;;  %s4345_s13 = sphi %s4395_s13, %s6385_s13   ;;  %s4341_s12 = sphi %s4393_s12, %s6384_s12  }
   0x5   : > { %s28_s20 = sadd.s32 1, %s4357_s16  ;;  %s107_s21 = sadd.s32 1, %s4349_s14 }
   0x6   : > { %p30_p0 = scmp.ge.s32.totalorder %s28_s20, 2  ;;  %p117_p1 = scmp.ne.s32.totalorder %s4349_s14, %s4345_s13 }
   0x7   : > { %p118_p2 = scmp.eq.s32.totalorder %s3562_s18, 1  ;;  %p123_p3 = scmp.ne.s32.totalorder %s4345_s13, %s4341_s12 }
   0x8   : > { %s6390_s20 = smov (%p30_p0, %s28_s20), 0  ;;  %p124_p5 = scmp.eq.s32.totalorder %s3563_s19, 1 }
   0x9   : > { %p4433_p4 = por %p118_p2, %p117_p1  ;;  %s102_s23 = ssub.s32 %s4357_s16, %s6390_s20 }
   0xa   : > { %p3566_p6 = scmp.ge.s32.totalorder %s4361_s17, 1  ;;  %p105_p7 = scmp.eq.s32.totalorder %s102_s23, 0 }
   0xb   : > { %p4440_p8 = por %p124_p5, %p123_p3  ;;  %p160_p9 = scmp.lt.s32.totalorder %s4361_s17, 3 }
   0xc   : > { %s4446_s25 = scalar_select %p105_p7, %s4349_s14, %s107_s21  }
   0xd   : > { %p161_p10 = pnand %p3566_p6, %p160_p9 }
   0xe   : > { %p188_p11 = scmp.lt.s32.totalorder (!%p161_p10), %s4353_s15, 1  ;;  %vm698_vm0 = vcmask (!%p161_p10), 1042432   ;;  %vm699_vm1 = vcmask (!%p161_p10), 1046532   ;;  %s4363_s4 = smov (!%p161_p10), 12   ;;  %vm247_vm3 = vsmask.f32 (!%p161_p10), 3328 }
   0xf   : > { %164 = sbr.rel (%p161_p10) target bundleno = 702 (0x2be), region = 32  ;;  %vm4484_vm2 = vmor (!%p161_p10), %vm698_vm0, %vm699_vm1  ;;  %vm248_vm4 = vsmask.f32 (!%p161_p10), 7440  ;;  %s4364_s5 = smov (!%p161_p10), 8   ;;  %vm2767_vm6 = vcmask (!%p161_p10), 31744   ;;  %vm2816_vm7 = vcmask (!%p161_p10), 64512  }
  0x10   : > { %vm4542_vm5 = vmor (!%p161_p10), %vm247_vm3, %vm248_vm4  ;;  %s4365_s6 = smov (!%p161_p10), 4   ;;  %s4366_s7 = smov (!%p161_p10), 16   ;;  %vm2849_vm8 = vcmask (!%p161_p10), 97280   ;;  %vm2882_vm9 = vcmask (!%p161_p10), 130048   ;;  %vm2915_vm10 = vcmask (!%p161_p10), 162816   ;;  %vm2948_vm11 = vcmask (!%p161_p10), 195584  }
  0x11   : > { %s4367_s8 = smov (!%p161_p10), 20   ;;  %s4368_s9 = smov (!%p161_p10), 24   ;;  %vm2981_vm12 = vcmask (!%p161_p10), 228352   ;;  %vm3014_vm13 = vcmask (!%p161_p10), 261120   ;;  %vm3074_vm14 = vcmask (!%p161_p10), 293888   ;;  %vm3107_vm15 = vcmask (!%p161_p10), 1041408  }
  0x12   : > { %s4369_s10 = smov (!%p161_p10), 28   ;;  %s4370_s11 = smov (!%p161_p10), 32  }
  0x13   : > { %s4371_s19 = smov (!%p161_p10), [#allocation2]  }
  0x14   : > { %s4287_s21 = sshll.u32 (!%p161_p10), %s4371_s19, 4  ;;  %s4288_s21 = int_to_ptr.vmem [resolvable:$false] %s4287_s21 }
  0x15   : > { %s4289_s23 = scalar_lea.vmem (!%p161_p10), %s4288_s21, 4096 }
  0x16   : > { %s189_s26 = scalar_select %p188_p11, %s4353_s15, 1 }
  0x18   : > { %s4139_s27 = smul.u32 216, %s189_s26 }
  0x1a   : > { %s4453_s30 = scalar_lea.vmem %s6374_s0, %s4139_s27 }
  0x1b   : > { %v3601_v0 = vld [vmem:[%s4453_s30 + $0x6c] sm:$0xf]  ;;  %v4457_v1 = vld [vmem:[%s4453_s30 + $0x70] sm:$0xf]  ;;  %v4470_v12 = vld [vmem:[%s4453_s30 + $0x64] sm:$0xf] }
  0x1c   : > { %v3585_v2 = vld [vmem:[%s4453_s30 + $0xc] sm:$0xf]  ;;  %v1064_v3 = vshll.u32 %v4457_v1, 16  ;;  %v1068_v4 = vshrl.u32 %v4457_v1, 16  ;;  %v3801_v5 = vcombine.low %v3601_v0, %v4457_v1  ;;  %v1055_v6 = vshrl.u32 %v3601_v0, 16 }
  0x1d   : > { %v4464_v7 = vld [vmem:[%s4453_s30 + $0x10] sm:$0xf]  ;;  %v1058_v8 = vshll.u32 %v3601_v0, 16  ;;  %v863_v15 = vshrl.u32 %v3585_v2, 16  ;;  %v866_v16 = vshll.u32 %v3585_v2, 16  ;;  %v759_v22 = vrot.slane %v4470_v12, 5 }
  0x1e   : > { %v872_v9 = vshll.u32 %v4464_v7, 16  ;;  %v876_v10 = vshrl.u32 %v4464_v7, 16  ;;  %v3793_v11 = vcombine.low %v3585_v2, %v4464_v7  ;;  %v4472_v13 = vrot.slane %v1068_v4, 4  ;;  %2335 = vrot.lane.b32.xlu1 %v3801_v5, %s4363_s4  ;;  %v4476_v17 = vld [vmem:[%s4453_s30 + $0x68] sm:$0x1] }
  0x1f   : > { %v1057_v14 = vrot.slane %v1055_v6, 4  ;;  %v1060_v18 = vrot.slane %v1058_v8, 5  ;;  %v642_v20 = vld [vmem:[%s4453_s30 + $0x60] sm:$0xe]  ;;  %v762_v23 = vrot.slane %v4476_v17, 5  ;;  %v865_v24 = vrot.slane %v863_v15, 4 }
  0x20   : > { %v4478_v19 = vrot.slane %v876_v10, 4  ;;  %2319 = vrot.lane.b32.xlu0 %v3793_v11, %s4363_s4  ;;  %v868_v25 = vrot.slane %v866_v16, 5  ;;  %v3577_v26 = vrot.slane %v642_v20, 9  ;;  %v4491_v27 = vld [vmem:[%s4453_s30 + $0x4] sm:$0xf]  ;;  %v452_v28 = vshll.u32 %v4470_v12, 16 }
  0x21   : > { %v1061_v29 = vor.u32 %v1060_v18, %v1057_v14  ;;  %v761_v30 = vrot.slane %v759_v22, 4  ;;  %v4495_v31 = vld [vmem:[%s4453_s30 + $0x8] sm:$0x1]  ;;  %v634_v32 = vld [vmem:[%s4453_s30] sm:$0xe]  ;;  %v703_v33 = vrot.slane %v4491_v27, 5 }
  0x22   : > { %v869_v34 = vor.u32 %v868_v25, %v865_v24  ;;  %v760_v35 = vsel %vm4484_vm2, %v3577_v26, %v759_v22  ;;  %v3569_v36 = vrot.slane %v634_v32, 9  ;;  %v706_v37 = vrot.slane %v4495_v31, 5  ;;  %v4503_v38 = vld [vmem:[%s4453_s30 + $0x70] sm:$0xf]  ;;  %v4506_v39 = vld [vmem:[%s4453_s30 + $0x74] sm:$0x1] }
  0x23   : > { %v4508_v40 = vrot.slane %v1061_v29, 4  ;;  %v763_v41 = vsel %vm4484_vm2, %v761_v30, %v762_v23  ;;  %v705_v42 = vrot.slane %v703_v33, 4  ;;  %v643_v43 = vld [vmem:[%s4453_s30 + $0x6c] sm:$0xe]  ;;  %v766_v44 = vrot.slane %v4503_v38, 5 }
  0x24   : > { %v4514_v45 = vrot.slane %v869_v34, 4  ;;  %v3785_v46 = vcombine.low %v760_v35, %v763_v41  ;;  %v704_v47 = vsel %vm4484_vm2, %v3569_v36, %v703_v33  ;;  %v3578_v48 = vrot.slane %v643_v43, 9  ;;  %v202_v49 = vld [vmem:[%s4453_s30 + $0x10] sm:$0xf]  ;;  %v232_v50 = vld [vmem:[%s4453_s30 + $0x14] sm:$0x1] }
  0x25   : > { %v707_v51 = vsel %vm4484_vm2, %v705_v42, %v706_v37  ;;  %v768_v52 = vrot.slane %v766_v44, 4  ;;  %v769_v53 = vrot.slane %v4506_v39, 5  ;;  %v635_v54 = vld [vmem:[%s4453_s30 + $0xc] sm:$0xe]  ;;  %v710_v55 = vrot.slane %v202_v49, 5 }
  0x26   : > { %2239 = vrot.lane.b32.xlu1 %v3785_v46, %s4364_s5  ;;  %v3777_v56 = vcombine.low %v704_v47, %v707_v51  ;;  %v767_v57 = vsel %vm4484_vm2, %v3578_v48, %v766_v44  ;;  %v3570_v58 = vrot.slane %v635_v54, 9  ;;  %v713_v59 = vrot.slane %v232_v50, 5  ;;  %v201_v60 = vld [vmem:[%s4453_s30 + $0xc] sm:$0xf]  ;;  %v199_v2 = vld [vmem:[%s4453_s30] sm:$0xf] }
  0x27   : > { %v770_v61 = vsel %vm4484_vm2, %v768_v52, %v769_v53  ;;  %v712_v62 = vrot.slane %v710_v55, 4  ;;  %v275_v63 = vshrl.u32 %v201_v60, 16  ;;  %v278_v0 = vshll.u32 %v201_v60, 16  ;;  %v217_v23 = vld [vmem:[%s4453_s30 + $0x6c] sm:$0xf] }
  0x28   : > { %2223 = vrot.lane.b32.xlu0 %v3777_v56, %s4364_s5  ;;  %v3786_v4 = vcombine.low %v767_v57, %v770_v61  ;;  %v711_v5 = vsel %vm4484_vm2, %v3570_v58, %v710_v55  ;;  %v284_v6 = vshll.u32 %v202_v49, 16  ;;  %v288_v8 = vshrl.u32 %v202_v49, 16  ;;  %v215_v52 = vld [vmem:[%s4453_s30 + $0x60] sm:$0xf] }
  0x29   : > { %v714_v10 = vsel %vm4484_vm2, %v712_v62, %v713_v59  ;;  %v277_v11 = vrot.slane %v275_v63, 4  ;;  %v280_v14 = vrot.slane %v278_v0, 5  ;;  %v294_v15 = vshll.u32 %v232_v50, 16 }
  0x2a   : > { %2241 = vrot.lane.b32.xlu1 %v3786_v4, %s4364_s5  ;;  %v3778_v16 = vcombine.low %v711_v5, %v714_v10  ;;  %v286_v18 = vrot.slane %v284_v6, 5  ;;  %v290_v20 = vrot.slane %v288_v8, 4  ;;  %v251_v22 = vshrl.u32 %v199_v2, 16  ;;  %v3603_v4 = vld [vmem:[%s4453_s30 + $0x78] sm:$0xf] }
  0x2b   : > { %v281_v24 = vor.u32 %v280_v14, %v277_v11  ;;  %v296_v25 = vrot.slane %v294_v15, 5  ;;  %v254_v26 = vshll.u32 %v199_v2, 16  ;;  %v260_v29 = vshll.u32 %v4491_v27, 16  ;;  %v4565_v10 = vld [vmem:[%s4453_s30 + $0x7c] sm:$0xf] }
  0x2c   : > { %2225 = vrot.lane.b32.xlu0 %v3778_v16, %s4364_s5  ;;  %v291_v32 = vor.u32 %v290_v20, %v286_v18  ;;  %v253_v33 = vrot.slane %v251_v22, 4  ;;  %v264_v34 = vshrl.u32 %v4491_v27, 16  ;;  %v270_v35 = vshll.u32 %v4495_v31, 16 }
  0x2d   : > { %v282_v36 = vrot.slane %v281_v24, 4  ;;  %v256_v37 = vrot.slane %v254_v26, 5  ;;  %v262_v41 = vrot.slane %v260_v29, 5  ;;  %v467_v42 = vshrl.u32 %v217_v23, 16 }
  0x2e   : > { %v292_v43 = vrot.slane %v291_v32, 4  ;;  %v266_v44 = vrot.slane %v264_v34, 4  ;;  %v272_v46 = vrot.slane %v270_v35, 5  ;;  %v470_v47 = vshll.u32 %v217_v23, 16  ;;  %v4572_v23 = vld [vmem:[%s4453_s30 + $0x18] sm:$0xf] }
  0x2f   : > { %v287_v48 = vsel %vm4542_vm5, %v282_v36, %v286_v18  ;;  %v257_v49 = vor.u32 %v256_v37, %v253_v33  ;;  %v469_v50 = vrot.slane %v467_v42, 4  ;;  %v476_v51 = vshll.u32 %v4503_v38, 16  ;;  %v4583_v35 = vld [vmem:[%s4453_s30 + $0x74] sm:$0x1] }
  0x30   : > { %v297_v27 = vsel %vm4542_vm5, %v292_v43, %v296_v25  ;;  %v267_v31 = vor.u32 %v266_v44, %v262_v41  ;;  %v472_v53 = vrot.slane %v470_v47, 5  ;;  %v480_v54 = vshrl.u32 %v4503_v38, 16 }
  0x31   : > { %v3762_v55 = vcombine.low %v287_v48, %v297_v27  ;;  %v258_v56 = vrot.slane %v257_v49, 4  ;;  %v478_v57 = vrot.slane %v476_v51, 5  ;;  %v486_v58 = vshll.u32 %v4506_v39, 16  ;;  %v4593_v48 = vld [vmem:[%s4453_s30 + $0x14] sm:$0x1] }
  0x32   : > { %v268_v59 = vrot.slane %v267_v31, 4  ;;  %v473_v60 = vor.u32 %v472_v53, %v469_v50  ;;  %v482_v61 = vrot.slane %v480_v54, 4  ;;  %v443_v62 = vshrl.u32 %v215_v52, 16 }
  0x33   : > { %2145 = vrot.lane.b32.xlu1 %v3762_v55, %s4365_s6  ;;  %v263_v63 = vsel %vm4542_vm5, %v258_v56, %v262_v41  ;;  %v488_v0 = vrot.slane %v486_v58, 5  ;;  %v446_v2 = vshll.u32 %v215_v52, 16  ;;  %v454_v38 = vrot.slane %v452_v28, 5 }
  0x34   : > { %v273_v39 = vsel %vm4542_vm5, %v268_v59, %v272_v46  ;;  %v474_v5 = vrot.slane %v473_v60, 4  ;;  %v483_v6 = vor.u32 %v482_v61, %v478_v57  ;;  %v445_v8 = vrot.slane %v443_v62, 4 }
  0x35   : > { %v3761_v11 = vcombine.low %v263_v63, %v273_v39  ;;  %v448_v14 = vrot.slane %v446_v2, 5  ;;  %v456_v15 = vshrl.u32 %v4470_v12, 16  ;;  %v462_v16 = vshll.u32 %v4476_v17, 16  ;;  %v4577_v12 = vld [vmem:[%s4453_s30 + $0x1c] sm:$0xf] }
  0x36   : > { %v479_v28 = vsel %vm4542_vm5, %v474_v5, %v478_v57  ;;  %v484_v18 = vrot.slane %v483_v6, 4  ;;  %v1079_v20 = vshrl.u32 %v3603_v4, 16  ;;  %v1082_v22 = vshll.u32 %v3603_v4, 16  ;;  %v4609_v57 = vld [vmem:[%s4453_s30 + $0x80] sm:$0x1] }
  0x37   : > { %2143 = vrot.lane.b32.xlu0 %v3761_v11, %s4365_s6  ;;  %v449_v24 = vor.u32 %v448_v14, %v445_v8  ;;  %v458_v25 = vrot.slane %v456_v15, 4  ;;  %v464_v26 = vrot.slane %v462_v16, 5  ;;  %v1092_v29 = vshrl.u32 %v4565_v10, 16  ;;  %v3641_v8 = vld [vmem:[%s4453_s30 + $0x6c] sm:$0xe] }
  0x38   : > { %v489_v17 = vsel %vm4542_vm5, %v484_v18, %v488_v0  ;;  %v1081_v32 = vrot.slane %v1079_v20, 4  ;;  %v1084_v33 = vrot.slane %v1082_v22, 5  ;;  %v3802_v34 = vcombine.low %v3603_v4, %v4565_v10  ;;  %v4618_v0 = vld [vmem:[%s4453_s30 + $0x20] sm:$0x1] }
  0x39   : > { %v3770_v36 = vcombine.low %v479_v28, %v489_v17  ;;  %v450_v37 = vrot.slane %v449_v24, 4  ;;  %v459_v41 = vor.u32 %v458_v25, %v454_v38  ;;  %v887_v42 = vshrl.u32 %v4572_v23, 16  ;;  %v3633_v28 = vld [vmem:[%s4453_s30 + $0xc] sm:$0xe]  ;;  %v3642_v17 = vld [vmem:[%s4453_s30 + $0x78] sm:$0xe] }
  0x3a   : > { %v890_v43 = vshll.u32 %v4572_v23, 16  ;;  %v900_v44 = vshrl.u32 %v4577_v12, 16  ;;  %v3794_v46 = vcombine.low %v4572_v23, %v4577_v12  ;;  %v1066_v47 = vrot.slane %v1064_v3, 5 }
  0x3b   : > { %2161 = vrot.lane.b32.xlu1 %v3770_v36, %s4365_s6  ;;  %v455_v49 = vsel %vm4542_vm5, %v450_v37, %v454_v38  ;;  %v460_v50 = vrot.slane %v459_v41, 4  ;;  %v889_v51 = vrot.slane %v887_v42, 4  ;;  %v1074_v52 = vshll.u32 %v4583_v35, 16 }
  0x3c   : > { %v892_v27 = vrot.slane %v890_v43, 5  ;;  %v1067_v31 = vsel %vm4542_vm5, %v4508_v40, %v1066_v47  ;;  %v1071_v53 = vor.u32 %v4472_v13, %v1066_v47  ;;  %v874_v3 = vrot.slane %v872_v9, 5  ;;  %v3634_v47 = vld [vmem:[%s4453_s30 + $0x18] sm:$0xe] }
  0x3d   : > { %v465_v54 = vsel %vm4542_vm5, %v460_v50, %v464_v26  ;;  %v1076_v55 = vrot.slane %v1074_v52, 5  ;;  %v882_v56 = vshll.u32 %v4593_v48, 16  ;;  %v1085_v58 = vor.u32 %v1084_v33, %v1081_v32 }
  0x3e   : > { %v3769_v59 = vcombine.low %v455_v49, %v465_v54  ;;  %v1072_v60 = vrot.slane %v1071_v53, 4  ;;  %v875_v40 = vsel %vm4542_vm5, %v4514_v45, %v874_v3  ;;  %v879_v13 = vor.u32 %v4478_v19, %v874_v3  ;;  %v4660_v53 = vld [vmem:[%s4453_s30 + $0x7c] sm:$0xf] }
  0x3f   : > { %2337 = vrot.lane.b32.xlu1 %v3802_v34, %s4363_s4  ;;  %v884_v9 = vrot.slane %v882_v56, 5  ;;  %v1086_v61 = vrot.slane %v1085_v58, 4  ;;  %v1088_v62 = vshll.u32 %v4565_v10, 16  ;;  %v1094_v63 = vrot.slane %v1092_v29, 4  ;;  %v4667_v58 = vld [vmem:[%s4453_s30 + $0x18] sm:$0xf] }
  0x40   : > { %2159 = vrot.lane.b32.xlu0 %v3769_v59, %s4365_s6  ;;  %v1077_v2 = vsel %vm4542_vm5, %v1072_v60, %v1076_v55  ;;  %v880_v38 = vrot.slane %v879_v13, 4  ;;  %v1098_v45 = vshll.u32 %v4609_v57, 16  ;;  %v893_v19 = vor.u32 %v892_v27, %v889_v51  ;;  %v4653_v51 = vld [vmem:[%s4453_s30 + $0x78] sm:$0xf] }
  0x41   : > { %v3817_v4 = vcombine.low %v1067_v31, %v1077_v2  ;;  %v1090_v39 = vrot.slane %v1088_v62, 5  ;;  %v896_v5 = vshll.u32 %v4577_v12, 16  ;;  %v902_v6 = vrot.slane %v900_v44, 4 }
  0x42   : > { %v885_v11 = vsel %vm4542_vm5, %v880_v38, %v884_v9  ;;  %v1100_v14 = vrot.slane %v1098_v45, 5  ;;  %v894_v15 = vrot.slane %v893_v19, 4  ;;  %v906_v16 = vshll.u32 %v4618_v0, 16  ;;  %v4673_v9 = vld [vmem:[%s4453_s30 + $0x1c] sm:$0xf] }
  0x43   : > { %2415 = vrot.lane.b32.xlu1 %v3817_v4, %s4366_s7  ;;  %v3809_v18 = vcombine.low %v875_v40, %v885_v11  ;;  %v1091_v20 = vsel %vm4542_vm5, %v1086_v61, %v1090_v39  ;;  %v1095_v22 = vor.u32 %v1094_v63, %v1090_v39  ;;  %v898_v23 = vrot.slane %v896_v5, 5  ;;  %v4688_v19 = vld [vmem:[%s4453_s30 + $0x88] sm:$0xf] }
  0x44   : > { %2321 = vrot.lane.b32.xlu0 %v3794_v46, %s4363_s4  ;;  %v908_v24 = vrot.slane %v906_v16, 5  ;;  %v3657_v25 = vrot.slane %v3641_v8, 9  ;;  %v1368_v26 = vrot.slane %v4457_v1, 5  ;;  %v1371_v29 = vrot.slane %v4583_v35, 5  ;;  %v4695_v8 = vld [vmem:[%s4453_s30 + $0x24] sm:$0xf] }
  0x45   : > { %v1096_v32 = vrot.slane %v1095_v22, 4  ;;  %v899_v33 = vsel %vm4542_vm5, %v894_v15, %v898_v23  ;;  %v903_v34 = vor.u32 %v902_v6, %v898_v23  ;;  %v3649_v36 = vrot.slane %v3633_v28, 9  ;;  %v4704_v28 = vld [vmem:[%s4453_s30 + $0x28] sm:$0xf] }
  0x46   : > { %v1369_v37 = vsel %vm4484_vm2, %v3657_v25, %v1368_v26  ;;  %v1370_v41 = vrot.slane %v1368_v26, 4  ;;  %v1312_v42 = vrot.slane %v4464_v7, 5  ;;  %v1315_v43 = vrot.slane %v4593_v48, 5 }
  0x47   : > { %v1101_v1 = vsel %vm4542_vm5, %v1096_v32, %v1100_v14  ;;  %v904_v35 = vrot.slane %v903_v34, 4  ;;  %v3658_v44 = vrot.slane %v3642_v17, 9  ;;  %v1375_v46 = vrot.slane %v4565_v10, 5 }
  0x48   : > { %2399 = vrot.lane.b32.xlu0 %v3809_v18, %s4366_s7  ;;  %v3818_v49 = vcombine.low %v1091_v20, %v1101_v1  ;;  %v1372_v50 = vsel %vm4484_vm2, %v1370_v41, %v1371_v29  ;;  %v1313_v7 = vsel %vm4484_vm2, %v3649_v36, %v1312_v42  ;;  %v1314_v48 = vrot.slane %v1312_v42, 4 }
  0x49   : > { %v909_v52 = vsel %vm4542_vm5, %v904_v35, %v908_v24  ;;  %v3833_v27 = vcombine.low %v1369_v37, %v1372_v50  ;;  %v1376_v10 = vsel %vm4484_vm2, %v3658_v44, %v1375_v46  ;;  %v1377_v31 = vrot.slane %v1375_v46, 4  ;;  %v4709_v24 = vld [vmem:[%s4453_s30 + $0x80] sm:$0x1] }
  0x4a   : > { %2417 = vrot.lane.b32.xlu1 %v3818_v49, %s4366_s7  ;;  %v3810_v3 = vcombine.low %v899_v33, %v909_v52  ;;  %v1316_v54 = vsel %vm4484_vm2, %v1314_v48, %v1315_v43  ;;  %v1378_v55 = vrot.slane %v4609_v57, 5  ;;  %v3650_v56 = vrot.slane %v3634_v47, 9  ;;  %v4720_v37 = vld [vmem:[%s4453_s30 + $0x20] sm:$0x1] }
  0x4b   : > { %v3825_v59 = vcombine.low %v1313_v7, %v1316_v54  ;;  %v1319_v60 = vrot.slane %v4577_v12, 5  ;;  %v1322_v40 = vrot.slane %v4618_v0, 5  ;;  %v1664_v13 = vshrl.u32 %v4653_v51, 16  ;;  %v4683_v12 = vld [vmem:[%s4453_s30 + $0x84] sm:$0xf] }
  0x4c   : > { %2401 = vrot.lane.b32.xlu0 %v3810_v3, %s4366_s7  ;;  %v1379_v61 = vsel %vm4484_vm2, %v1377_v31, %v1378_v55  ;;  %v1667_v57 = vshll.u32 %v4653_v51, 16  ;;  %v1677_v62 = vshrl.u32 %v4660_v53, 16  ;;  %v3849_v63 = vcombine.low %v4653_v51, %v4660_v53 }
  0x4d   : > { %v3834_v0 = vcombine.low %v1376_v10, %v1379_v61  ;;  %v1320_v2 = vsel %vm4484_vm2, %v3650_v56, %v1319_v60  ;;  %v1321_v38 = vrot.slane %v1319_v60, 4  ;;  %v1666_v45 = vrot.slane %v1664_v13, 4 }
  0x4e   : > { %2495 = vrot.lane.b32.xlu1 %v3833_v27, %s4367_s8  ;;  %v1669_v4 = vrot.slane %v1667_v57, 5  ;;  %v1472_v39 = vshrl.u32 %v4667_v58, 16  ;;  %v1475_v5 = vshll.u32 %v4667_v58, 16  ;;  %v1485_v6 = vshrl.u32 %v4673_v9, 16  ;;  %v4729_v27 = vld [vmem:[%s4453_s30 + $0x8c] sm:$0x1] }
  0x4f   : > { %v1323_v11 = vsel %vm4484_vm2, %v1321_v38, %v1322_v40  ;;  %v3841_v14 = vcombine.low %v4667_v58, %v4673_v9  ;;  %v1688_v15 = vshrl.u32 %v4683_v12, 16  ;;  %v1691_v16 = vshll.u32 %v4683_v12, 16  ;;  %v4739_v57 = vld [vmem:[%s4453_s30 + $0x2c] sm:$0x1] }
  0x50   : > { %2479 = vrot.lane.b32.xlu0 %v3825_v59, %s4367_s8  ;;  %v3826_v18 = vcombine.low %v1320_v2, %v1323_v11  ;;  %v1474_v20 = vrot.slane %v1472_v39, 4  ;;  %v1477_v22 = vrot.slane %v1475_v5, 5  ;;  %v1701_v23 = vshrl.u32 %v4688_v19, 16 }
  0x51   : > { %v1690_v25 = vrot.slane %v1688_v15, 4  ;;  %v1693_v26 = vrot.slane %v1691_v16, 5  ;;  %v3850_v29 = vcombine.low %v4683_v12, %v4688_v19  ;;  %v1496_v17 = vshrl.u32 %v4695_v8, 16  ;;  %v3713_v16 = vld [vmem:[%s4453_s30 + $0x18] sm:$0xe] }
  0x52   : > { %2497 = vrot.lane.b32.xlu1 %v3834_v0, %s4367_s8  ;;  %v1499_v32 = vshll.u32 %v4695_v8, 16  ;;  %v1509_v33 = vshrl.u32 %v4704_v28, 16  ;;  %v3842_v34 = vcombine.low %v4695_v8, %v4704_v28  ;;  %v1670_v36 = vor.u32 %v1669_v4, %v1666_v45  ;;  %v3721_v45 = vld [vmem:[%s4453_s30 + $0x78] sm:$0xe] }
  0x53   : > { %v1498_v41 = vrot.slane %v1496_v17, 4  ;;  %v1673_v42 = vshll.u32 %v4660_v53, 16  ;;  %v1679_v43 = vrot.slane %v1677_v62, 4  ;;  %v1683_v1 = vshll.u32 %v4709_v24, 16 }
  0x54   : > { %2481 = vrot.lane.b32.xlu0 %v3826_v18, %s4367_s8  ;;  %v1501_v35 = vrot.slane %v1499_v32, 5  ;;  %v1671_v44 = vrot.slane %v1670_v36, 4  ;;  %v1478_v46 = vor.u32 %v1477_v22, %v1474_v20  ;;  %v1481_v47 = vshll.u32 %v4673_v9, 16 }
  0x55   : > { %v1675_v49 = vrot.slane %v1673_v42, 5  ;;  %v1685_v50 = vrot.slane %v1683_v1, 5  ;;  %v1487_v7 = vrot.slane %v1485_v6, 4  ;;  %v1491_v48 = vshll.u32 %v4720_v37, 16  ;;  %v4763_v42 = vld [vmem:[%s4453_s30 + $0x7c] sm:$0xf] }
  0x56   : > { %2591 = vrot.lane.b32.xlu1 %v3849_v63, %s4368_s9  ;;  %v1479_v51 = vrot.slane %v1478_v46, 4  ;;  %v1483_v52 = vrot.slane %v1481_v47, 5  ;;  %v1694_v10 = vor.u32 %v1693_v26, %v1690_v25  ;;  %v1697_v31 = vshll.u32 %v4688_v19, 16  ;;  %v219_v25 = vld [vmem:[%s4453_s30 + $0x78] sm:$0xf] }
  0x57   : > { %v1676_v3 = vsel %vm4542_vm5, %v1671_v44, %v1675_v49  ;;  %v1680_v54 = vor.u32 %v1679_v43, %v1675_v49  ;;  %v1493_v55 = vrot.slane %v1491_v48, 5  ;;  %v1703_v56 = vrot.slane %v1701_v23, 4  ;;  %v4774_v46 = vld [vmem:[%s4453_s30 + $0x80] sm:$0x1]  ;;  %v203_v49 = vld [vmem:[%s4453_s30 + $0x18] sm:$0xf] }
  0x58   : > { %2575 = vrot.lane.b32.xlu0 %v3841_v14, %s4368_s9  ;;  %v1484_v58 = vsel %vm4542_vm5, %v1479_v51, %v1483_v52  ;;  %v1488_v59 = vor.u32 %v1487_v7, %v1483_v52  ;;  %v1695_v60 = vrot.slane %v1694_v10, 4  ;;  %v1699_v40 = vrot.slane %v1697_v31, 5  ;;  %v4782_v51 = vld [vmem:[%s4453_s30 + $0x1c] sm:$0xf] }
  0x59   : > { %v1681_v13 = vrot.slane %v1680_v54, 4  ;;  %v1707_v61 = vshll.u32 %v4729_v27, 16  ;;  %v1502_v62 = vor.u32 %v1501_v35, %v1498_v41  ;;  %v1505_v63 = vshll.u32 %v4704_v28, 16  ;;  %v4788_v54 = vld [vmem:[%s4453_s30 + $0x20] sm:$0x1] }
  0x5a   : > { %2593 = vrot.lane.b32.xlu1 %v3850_v29, %s4368_s9  ;;  %v1489_v12 = vrot.slane %v1488_v59, 4  ;;  %v1700_v0 = vsel %vm4542_vm5, %v1695_v60, %v1699_v40  ;;  %v1704_v2 = vor.u32 %v1703_v56, %v1699_v40  ;;  %v1511_v38 = vrot.slane %v1509_v33, 4 }
  0x5b   : > { %v1686_v4 = vsel %vm4542_vm5, %v1681_v13, %v1685_v50  ;;  %v1709_v39 = vrot.slane %v1707_v61, 5  ;;  %v1503_v5 = vrot.slane %v1502_v62, 4  ;;  %v1507_v6 = vrot.slane %v1505_v63, 5  ;;  %v3722_v62 = vld [vmem:[%s4453_s30 + $0x84] sm:$0xe] }
  0x5c   : > { %2577 = vrot.lane.b32.xlu0 %v3842_v34, %s4368_s9  ;;  %v3865_v8 = vcombine.low %v1676_v3, %v1686_v4  ;;  %v1494_v11 = vsel %vm4542_vm5, %v1489_v12, %v1493_v55  ;;  %v1705_v14 = vrot.slane %v1704_v2, 4  ;;  %v1515_v15 = vshll.u32 %v4739_v57, 16 }
  0x5d   : > { %v3857_v18 = vcombine.low %v1484_v58, %v1494_v11  ;;  %v1508_v20 = vsel %vm4542_vm5, %v1503_v5, %v1507_v6  ;;  %v1512_v22 = vor.u32 %v1511_v38, %v1507_v6  ;;  %v3737_v23 = vrot.slane %v3721_v45, 9  ;;  %v3714_v5 = vld [vmem:[%s4453_s30 + $0x24] sm:$0xe] }
  0x5e   : > { %2671 = vrot.lane.b32.xlu1 %v3865_v8, %s4369_s10  ;;  %v1710_v26 = vsel %vm4542_vm5, %v1705_v14, %v1709_v39  ;;  %v1517_v29 = vrot.slane %v1515_v15, 5  ;;  %v1977_v17 = vrot.slane %v4660_v53, 5  ;;  %v1980_v32 = vrot.slane %v4709_v24, 5 }
  0x5f   : > { %v3866_v33 = vcombine.low %v1700_v0, %v1710_v26  ;;  %v1513_v34 = vrot.slane %v1512_v22, 4  ;;  %v3729_v36 = vrot.slane %v3713_v16, 9  ;;  %v1921_v41 = vrot.slane %v4673_v9, 5  ;;  %v221_v22 = vld [vmem:[%s4453_s30 + $0x84] sm:$0xf] }
  0x60   : > { %2655 = vrot.lane.b32.xlu0 %v3857_v18, %s4369_s10  ;;  %v1978_v43 = vsel %vm4484_vm2, %v3737_v23, %v1977_v17  ;;  %v1979_v1 = vrot.slane %v1977_v17, 4  ;;  %v1924_v35 = vrot.slane %v4720_v37, 5  ;;  %v491_v53 = vshrl.u32 %v219_v25, 16 }
  0x61   : > { %v1518_v24 = vsel %vm4542_vm5, %v1513_v34, %v1517_v29  ;;  %v1922_v44 = vsel %vm4484_vm2, %v3729_v36, %v1921_v41  ;;  %v1923_v9 = vrot.slane %v1921_v41, 4  ;;  %v494_v47 = vshll.u32 %v219_v25, 16  ;;  %v4811_v34 = vld [vmem:[%s4453_s30 + $0x88] sm:$0xf] }
  0x62   : > { %2673 = vrot.lane.b32.xlu1 %v3866_v33, %s4369_s10  ;;  %v3858_v50 = vcombine.low %v1508_v20, %v1518_v24  ;;  %v1981_v7 = vsel %vm4484_vm2, %v1979_v1, %v1980_v32  ;;  %v493_v37 = vrot.slane %v491_v53, 4  ;;  %v500_v48 = vshll.u32 %v4763_v42, 16  ;;  %v205_v24 = vld [vmem:[%s4453_s30 + $0x24] sm:$0xf] }
  0x63   : > { %v3881_v52 = vcombine.low %v1978_v43, %v1981_v7  ;;  %v1925_v10 = vsel %vm4484_vm2, %v1923_v9, %v1924_v35  ;;  %v496_v31 = vrot.slane %v494_v47, 5  ;;  %v504_v3 = vshrl.u32 %v4763_v42, 16  ;;  %v4816_v43 = vld [vmem:[%s4453_s30 + $0x8c] sm:$0x1] }
  0x64   : > { %2657 = vrot.lane.b32.xlu0 %v3858_v50, %s4369_s10  ;;  %v3873_v55 = vcombine.low %v1922_v44, %v1925_v10  ;;  %v502_v56 = vrot.slane %v500_v48, 5  ;;  %v510_v58 = vshll.u32 %v4774_v46, 16  ;;  %v299_v59 = vshrl.u32 %v203_v49, 16  ;;  %v4828_v50 = vld [vmem:[%s4453_s30 + $0x28] sm:$0xf] }
  0x65   : > { %v497_v60 = vor.u32 %v496_v31, %v493_v37  ;;  %v506_v40 = vrot.slane %v504_v3, 4  ;;  %v302_v13 = vshll.u32 %v203_v49, 16  ;;  %v308_v61 = vshll.u32 %v4782_v51, 16  ;;  %v4835_v10 = vld [vmem:[%s4453_s30 + $0x2c] sm:$0x1] }
  0x66   : > { %2751 = vrot.lane.b32.xlu1 %v3881_v52, %s4370_s11  ;;  %v512_v63 = vrot.slane %v510_v58, 5  ;;  %v301_v12 = vrot.slane %v299_v59, 4  ;;  %v312_v0 = vshrl.u32 %v4782_v51, 16  ;;  %v318_v2 = vshll.u32 %v4788_v54, 16  ;;  %v644_v58 = vld [vmem:[%s4453_s30 + $0x78] sm:$0xe] }
  0x67   : > { %v498_v38 = vrot.slane %v497_v60, 4  ;;  %v507_v45 = vor.u32 %v506_v40, %v502_v56  ;;  %v304_v4 = vrot.slane %v302_v13, 5  ;;  %v310_v39 = vrot.slane %v308_v61, 5  ;;  %v4228_v59 = vld [vmem:[%s6375_s1] sm:$0xff]  }
  0x68   : > { %2735 = vrot.lane.b32.xlu0 %v3873_v55, %s4370_s11  ;;  %v314_v6 = vrot.slane %v312_v0, 4  ;;  %v320_v8 = vrot.slane %v318_v2, 5  ;;  %v3738_v11 = vrot.slane %v3722_v62, 9  ;;  %v1984_v14 = vrot.slane %v4688_v19, 5  ;;  %v636_v2 = vld [vmem:[%s4453_s30 + $0x18] sm:$0xe]  ;;  %4093 = vmatprep.subr.bf16.mxu0 %v4228_v59 }
  0x69   : > { %v503_v15 = vsel %vm4542_vm5, %v498_v38, %v502_v56  ;;  %v508_v16 = vrot.slane %v507_v45, 4  ;;  %v305_v18 = vor.u32 %v304_v4, %v301_v12  ;;  %v1987_v20 = vrot.slane %v4729_v27, 5  ;;  %4131 = vmatprep.subr.bf16.mxu1 %v4228_v59  ;;  %4094 = vmatpush3.bf16.msra.mxu0 %v4228_v59 }
  0x6a   : > { %v315_v23 = vor.u32 %v314_v6, %v310_v39  ;;  %v1985_v25 = vsel %vm4484_vm2, %v3738_v11, %v1984_v14  ;;  %v1986_v26 = vrot.slane %v1984_v14, 4  ;;  %v3730_v29 = vrot.slane %v3714_v5, 9  ;;  %v4231_v5 = vld [vmem:[%s6375_s1 + $0x8] sm:$0xff]   ;;  %4134 = vmatpush3.bf16.msra.mxu1 %v4228_v59 }
  0x6b   : > { %v513_v17 = vsel %vm4542_vm5, %v508_v16, %v512_v63  ;;  %v306_v19 = vrot.slane %v305_v18, 4  ;;  %v1928_v32 = vrot.slane %v4704_v28, 5  ;;  %v1931_v33 = vrot.slane %v4739_v57, 5  ;;  %4095 = vmatprep.subr.bf16.mxu0 %v4231_v5  ;;  %4132 = vmatprep.subr.bf16.mxu1 %v4231_v5 }
  0x6c   : > { %v3771_v27 = vcombine.low %v503_v15, %v513_v17  ;;  %v316_v36 = vrot.slane %v315_v23, 4  ;;  %v1988_v41 = vsel %vm4484_vm2, %v1986_v26, %v1987_v20  ;;  %v515_v1 = vshrl.u32 %v221_v22, 16 }
  0x6d   : > { %v311_v35 = vsel %vm4542_vm5, %v306_v19, %v310_v39  ;;  %v3882_v53 = vcombine.low %v1985_v25, %v1988_v41  ;;  %v1929_v28 = vsel %vm4484_vm2, %v3730_v29, %v1928_v32  ;;  %v1930_v57 = vrot.slane %v1928_v32, 4  ;;  %v637_v32 = vld [vmem:[%s4453_s30 + $0x24] sm:$0xe]  ;;  %4096 = vmatpush3.bf16.msra.mxu0 %v4231_v5 }
  0x6e   : > { %2163 = vrot.lane.b32.xlu1 %v3771_v27, %s4365_s6  ;;  %v321_v44 = vsel %vm4542_vm5, %v316_v36, %v320_v8  ;;  %v517_v9 = vrot.slane %v515_v1, 4  ;;  %v518_v47 = vshll.u32 %v221_v22, 16  ;;  %v524_v49 = vshll.u32 %v4811_v34, 16  ;;  %v645_v22 = vld [vmem:[%s4453_s30 + $0x84] sm:$0xe]  ;;  %4135 = vmatpush3.bf16.msra.mxu1 %v4231_v5 }
  0x6f   : > { %v3763_v7 = vcombine.low %v311_v35, %v321_v44  ;;  %v1932_v37 = vsel %vm4484_vm2, %v1930_v57, %v1931_v33  ;;  %v528_v48 = vshrl.u32 %v4811_v34, 16  ;;  %v534_v52 = vshll.u32 %v4816_v43, 16 }
  0x70   : > { %v3874_v31 = vcombine.low %v1929_v28, %v1932_v37  ;;  %v520_v3 = vrot.slane %v518_v47, 5  ;;  %v526_v55 = vrot.slane %v524_v49, 5  ;;  %v323_v56 = vshrl.u32 %v205_v24, 16 }
  0x71   : > { %2147 = vrot.lane.b32.xlu0 %v3763_v7, %s4365_s6  ;;  %v530_v60 = vrot.slane %v528_v48, 4  ;;  %v536_v40 = vrot.slane %v534_v52, 5  ;;  %v326_v13 = vshll.u32 %v205_v24, 16  ;;  %v332_v61 = vshll.u32 %v4828_v50, 16  ;;  %v4885_v48 = vld [vmem:[%s4453_s30 + $0x24] sm:$0xf] }
  0x72   : > { %2753 = vrot.lane.b32.xlu1 %v3882_v53, %s4370_s11  ;;  %v521_v62 = vor.u32 %v520_v3, %v517_v9  ;;  %v325_v63 = vrot.slane %v323_v56, 4  ;;  %v336_v12 = vshrl.u32 %v4828_v50, 16  ;;  %v342_v0 = vshll.u32 %v4835_v10, 16  ;;  %v4878_v9 = vld [vmem:[%s4453_s30 + $0x88] sm:$0xf] }
  0x73   : > { %v531_v38 = vor.u32 %v530_v60, %v526_v55  ;;  %v328_v45 = vrot.slane %v326_v13, 5  ;;  %v334_v4 = vrot.slane %v332_v61, 5  ;;  %v3579_v39 = vrot.slane %v644_v58, 9  ;;  %v4896_v56 = vld [vmem:[%s4453_s30 + $0x28] sm:$0xf] }
  0x74   : > { %v522_v6 = vrot.slane %v521_v62, 4  ;;  %v338_v8 = vrot.slane %v336_v12, 4  ;;  %v344_v11 = vrot.slane %v342_v0, 5  ;;  %v773_v14 = vrot.slane %v4763_v42, 5  ;;  %v3607_v13 = vld [vmem:[%s4453_s30 + $0x90] sm:$0xf] }
  0x75   : > { %2737 = vrot.lane.b32.xlu0 %v3874_v31, %s4370_s11  ;;  %v532_v15 = vrot.slane %v531_v38, 4  ;;  %v329_v16 = vor.u32 %v328_v45, %v325_v63  ;;  %v776_v18 = vrot.slane %v4774_v46, 5  ;;  %v3571_v20 = vrot.slane %v636_v2, 9  ;;  %v4906_v61 = vld [vmem:[%s4453_s30 + $0x94] sm:$0xf] }
  0x76   : > { %v527_v23 = vsel %vm4542_vm5, %v522_v6, %v526_v55  ;;  %v339_v25 = vor.u32 %v338_v8, %v334_v4  ;;  %v774_v26 = vsel %vm4484_vm2, %v3579_v39, %v773_v14  ;;  %v775_v29 = vrot.slane %v773_v14, 4  ;;  %v4912_v2 = vld [vmem:[%s4453_s30 + $0x30] sm:$0xf]  ;;  %v4915_v38 = vld [vmem:[%s4453_s30 + $0x34] sm:$0xf] }
  0x77   : > { %v537_v42 = vsel %vm4542_vm5, %v532_v15, %v536_v40  ;;  %v330_v17 = vrot.slane %v329_v16, 4  ;;  %v717_v19 = vrot.slane %v4782_v51, 5  ;;  %v720_v46 = vrot.slane %v4788_v54, 5  ;;  %v4870_v54 = vld [vmem:[%s4453_s30 + $0x84] sm:$0xf] }
  0x78   : > { %v3772_v33 = vcombine.low %v527_v23, %v537_v42  ;;  %v340_v27 = vrot.slane %v339_v25, 4  ;;  %v777_v36 = vsel %vm4484_vm2, %v775_v29, %v776_v18  ;;  %v3580_v41 = vrot.slane %v645_v22, 9  ;;  %v4928_v22 = vld [vmem:[%s4453_s30 + $0x8c] sm:$0x1] }
  0x79   : > { %v335_v1 = vsel %vm4542_vm5, %v330_v17, %v334_v4  ;;  %v3787_v35 = vcombine.low %v774_v26, %v777_v36  ;;  %v718_v51 = vsel %vm4484_vm2, %v3571_v20, %v717_v19  ;;  %v719_v53 = vrot.slane %v717_v19, 4  ;;  %v4933_v42 = vld [vmem:[%s4453_s30 + $0x2c] sm:$0x1] }
  0x7a   : > { %2165 = vrot.lane.b32.xlu1 %v3772_v33, %s4365_s6  ;;  %v345_v28 = vsel %vm4542_vm5, %v340_v27, %v344_v11  ;;  %v780_v57 = vrot.slane %v4811_v34, 5  ;;  %v783_v24 = vrot.slane %v4816_v43, 5  ;;  %v3572_v44 = vrot.slane %v637_v32, 9 }
  0x7b   : > { %v3764_v47 = vcombine.low %v335_v1, %v345_v28  ;;  %v721_v49 = vsel %vm4484_vm2, %v719_v53, %v720_v46  ;;  %v724_v7 = vrot.slane %v4828_v50, 5  ;;  %v727_v37 = vrot.slane %v4835_v10, 5 }
  0x7c   : > { %v3779_v52 = vcombine.low %v718_v51, %v721_v49  ;;  %v781_v34 = vsel %vm4484_vm2, %v3580_v41, %v780_v57  ;;  %v782_v43 = vrot.slane %v780_v57, 4  ;;  %v1103_v31 = vshrl.u32 %v4870_v54, 16 }
  0x7d   : > { %2149 = vrot.lane.b32.xlu0 %v3764_v47, %s4365_s6  ;;  %v725_v3 = vsel %vm4484_vm2, %v3572_v44, %v724_v7  ;;  %v726_v50 = vrot.slane %v724_v7, 4  ;;  %v1106_v10 = vshll.u32 %v4870_v54, 16  ;;  %v1116_v55 = vshrl.u32 %v4878_v9, 16 }
  0x7e   : > { %2243 = vrot.lane.b32.xlu1 %v3787_v35, %s4364_s5  ;;  %v784_v58 = vsel %vm4484_vm2, %v782_v43, %v783_v24  ;;  %v1105_v59 = vrot.slane %v1103_v31, 4  ;;  %v3803_v60 = vcombine.low %v4870_v54, %v4878_v9  ;;  %v911_v40 = vshrl.u32 %v4885_v48, 16  ;;  %v4942_v24 = vld [vmem:[%s4453_s30 + $0x98] sm:$0x1] }
  0x7f   : > { %v3788_v62 = vcombine.low %v781_v34, %v784_v58  ;;  %v728_v63 = vsel %vm4484_vm2, %v726_v50, %v727_v37  ;;  %v1108_v12 = vrot.slane %v1106_v10, 5  ;;  %v914_v0 = vshll.u32 %v4885_v48, 16  ;;  %v4953_v50 = vld [vmem:[%s4453_s30 + $0x38] sm:$0x1] }
  0x80   : > { %v3780_v45 = vcombine.low %v725_v3, %v728_v63  ;;  %v913_v4 = vrot.slane %v911_v40, 4  ;;  %v924_v39 = vshrl.u32 %v4896_v56, 16  ;;  %v3795_v5 = vcombine.low %v4885_v48, %v4896_v56 }
  0x81   : > { %2227 = vrot.lane.b32.xlu0 %v3779_v52, %s4364_s5  ;;  %v916_v6 = vrot.slane %v914_v0, 5  ;;  %v1127_v8 = vshrl.u32 %v3607_v13, 16  ;;  %v1130_v11 = vshll.u32 %v3607_v13, 16  ;;  %v1140_v14 = vshrl.u32 %v4906_v61, 16 }
  0x82   : > { %2245 = vrot.lane.b32.xlu1 %v3788_v62, %s4364_s5  ;;  %v3804_v15 = vcombine.low %v3607_v13, %v4906_v61  ;;  %v935_v16 = vshrl.u32 %v4912_v2, 16  ;;  %v938_v18 = vshll.u32 %v4912_v2, 16  ;;  %v948_v20 = vshrl.u32 %v4915_v38, 16  ;;  %v3643_v13 = vld [vmem:[%s4453_s30 + $0x84] sm:$0xe] }
  0x83   : > { %v1129_v23 = vrot.slane %v1127_v8, 4  ;;  %v1132_v25 = vrot.slane %v1130_v11, 5  ;;  %v3796_v26 = vcombine.low %v4912_v2, %v4915_v38  ;;  %v1109_v29 = vor.u32 %v1108_v12, %v1105_v59 }
  0x84   : > { %v937_v17 = vrot.slane %v935_v16, 4  ;;  %v940_v19 = vrot.slane %v938_v18, 5  ;;  %v1112_v46 = vshll.u32 %v4878_v9, 16  ;;  %v1118_v32 = vrot.slane %v1116_v55, 4 }
  0x85   : > { %2229 = vrot.lane.b32.xlu0 %v3780_v45, %s4364_s5  ;;  %v1110_v33 = vrot.slane %v1109_v29, 4  ;;  %v1122_v27 = vshll.u32 %v4928_v22, 16  ;;  %v917_v36 = vor.u32 %v916_v6, %v913_v4  ;;  %v920_v41 = vshll.u32 %v4896_v56, 16 }
  0x86   : > { %2339 = vrot.lane.b32.xlu1 %v3803_v60, %s4363_s4  ;;  %v1114_v1 = vrot.slane %v1112_v46, 5  ;;  %v926_v35 = vrot.slane %v924_v39, 4  ;;  %v930_v51 = vshll.u32 %v4933_v42, 16  ;;  %v1133_v53 = vor.u32 %v1132_v25, %v1129_v23 }
  0x87   : > { %v1124_v54 = vrot.slane %v1122_v27, 5  ;;  %v918_v28 = vrot.slane %v917_v36, 4  ;;  %v922_v57 = vrot.slane %v920_v41, 5  ;;  %v1136_v44 = vshll.u32 %v4906_v61, 16  ;;  %v4986_v41 = vld [vmem:[%s4453_s30 + $0x90] sm:$0xf] }
  0x88   : > { %v1115_v47 = vsel %vm4542_vm5, %v1110_v33, %v1114_v1  ;;  %v1119_v49 = vor.u32 %v1118_v32, %v1114_v1  ;;  %v932_v7 = vrot.slane %v930_v51, 5  ;;  %v1134_v37 = vrot.slane %v1133_v53, 4  ;;  %v4993_v53 = vld [vmem:[%s4453_s30 + $0x94] sm:$0xf] }
  0x89   : > { %2323 = vrot.lane.b32.xlu0 %v3795_v5, %s4363_s4  ;;  %v923_v48 = vsel %vm4542_vm5, %v918_v28, %v922_v57  ;;  %v927_v52 = vor.u32 %v926_v35, %v922_v57  ;;  %v1138_v34 = vrot.slane %v1136_v44, 5  ;;  %v1142_v43 = vrot.slane %v1140_v14, 4  ;;  %v3635_v5 = vld [vmem:[%s4453_s30 + $0x24] sm:$0xe]  ;;  %v5000_v44 = vld [vmem:[%s4453_s30 + $0x30] sm:$0xf] }
  0x8a   : > { %2341 = vrot.lane.b32.xlu1 %v3804_v15, %s4363_s4  ;;  %v1120_v31 = vrot.slane %v1119_v49, 4  ;;  %v1146_v3 = vshll.u32 %v4942_v24, 16  ;;  %v941_v10 = vor.u32 %v940_v19, %v937_v17  ;;  %v944_v55 = vshll.u32 %v4915_v38, 16  ;;  %v3644_v15 = vld [vmem:[%s4453_s30 + $0x90] sm:$0xe] }
  0x8b   : > { %v928_v58 = vrot.slane %v927_v52, 4  ;;  %v1139_v59 = vsel %vm4542_vm5, %v1134_v37, %v1138_v34  ;;  %v1143_v60 = vor.u32 %v1142_v43, %v1138_v34  ;;  %v950_v40 = vrot.slane %v948_v20, 4  ;;  %v3636_v19 = vld [vmem:[%s4453_s30 + $0x30] sm:$0xe]  ;;  %v5007_v37 = vld [vmem:[%s4453_s30 + $0x34] sm:$0xf] }
  0x8c   : > { %v1125_v62 = vsel %vm4542_vm5, %v1120_v31, %v1124_v54  ;;  %v1148_v63 = vrot.slane %v1146_v3, 5  ;;  %v942_v12 = vrot.slane %v941_v10, 4  ;;  %v946_v0 = vrot.slane %v944_v55, 5 }
  0x8d   : > { %2325 = vrot.lane.b32.xlu0 %v3796_v26, %s4363_s4  ;;  %v3819_v2 = vcombine.low %v1115_v47, %v1125_v62  ;;  %v933_v45 = vsel %vm4542_vm5, %v928_v58, %v932_v7  ;;  %v1144_v4 = vrot.slane %v1143_v60, 4  ;;  %v954_v39 = vshll.u32 %v4953_v50, 16  ;;  %v5024_v58 = vld [vmem:[%s4453_s30 + $0xa0] sm:$0xf]  ;;  %v5030_v62 = vld [vmem:[%s4453_s30 + $0x3c] sm:$0xf] }
  0x8e   : > { %v3811_v6 = vcombine.low %v923_v48, %v933_v45  ;;  %v947_v8 = vsel %vm4542_vm5, %v942_v12, %v946_v0  ;;  %v951_v11 = vor.u32 %v950_v40, %v946_v0  ;;  %v3659_v14 = vrot.slane %v3643_v13, 9  ;;  %v5040_v45 = vld [vmem:[%s4453_s30 + $0x40] sm:$0xf] }
  0x8f   : > { %2419 = vrot.lane.b32.xlu1 %v3819_v2, %s4366_s7  ;;  %v1149_v16 = vsel %vm4542_vm5, %v1144_v4, %v1148_v63  ;;  %v956_v18 = vrot.slane %v954_v39, 5  ;;  %v1382_v20 = vrot.slane %v4878_v9, 5  ;;  %v1385_v23 = vrot.slane %v4928_v22, 5 }
  0x90   : > { %v3820_v25 = vcombine.low %v1139_v59, %v1149_v16  ;;  %v952_v26 = vrot.slane %v951_v11, 4  ;;  %v3651_v29 = vrot.slane %v3635_v5, 9  ;;  %v1326_v17 = vrot.slane %v4896_v56, 5  ;;  %v5009_v48 = vpop.permute.xlu1 %2335 }
  0x91   : > { %2403 = vrot.lane.b32.xlu0 %v3811_v6, %s4366_s7  ;;  %v1383_v46 = vsel %vm4484_vm2, %v3659_v14, %v1382_v20  ;;  %v1384_v32 = vrot.slane %v1382_v20, 4  ;;  %v1329_v33 = vrot.slane %v4933_v42, 5  ;;  %v3660_v27 = vrot.slane %v3644_v15, 9 }
  0x92   : > { %v957_v9 = vsel %vm4542_vm5, %v952_v26, %v956_v18  ;;  %v1327_v22 = vsel %vm4484_vm2, %v3651_v29, %v1326_v17  ;;  %v1328_v36 = vrot.slane %v1326_v17, 4  ;;  %v1389_v56 = vrot.slane %v4906_v61, 5  ;;  %v5046_v11 = vpop.permute.xlu0 %2319  ;;  %v5059_v17 = vld [vmem:[%s4453_s30 + $0x38] sm:$0x1] }
  0x93   : > { %2421 = vrot.lane.b32.xlu1 %v3820_v25, %s4366_s7  ;;  %v3812_v1 = vcombine.low %v947_v8, %v957_v9  ;;  %v1386_v42 = vsel %vm4484_vm2, %v1384_v32, %v1385_v23  ;;  %v1392_v35 = vrot.slane %v4942_v24, 5  ;;  %v3652_v51 = vrot.slane %v3636_v19, 9  ;;  %v5044_v8 = vld [vmem:[%s4453_s30 + $0x98] sm:$0x1] }
  0x94   : > { %v3835_v54 = vcombine.low %v1383_v46, %v1386_v42  ;;  %v1330_v28 = vsel %vm4484_vm2, %v1328_v36, %v1329_v33  ;;  %v1390_v61 = vsel %vm4484_vm2, %v3660_v27, %v1389_v56  ;;  %v1391_v57 = vrot.slane %v1389_v56, 4 }
  0x95   : > { %2405 = vrot.lane.b32.xlu0 %v3812_v1, %s4366_s7  ;;  %v3827_v47 = vcombine.low %v1327_v22, %v1330_v28  ;;  %v1333_v24 = vrot.slane %v4915_v38, 5  ;;  %v1336_v49 = vrot.slane %v4953_v50, 5  ;;  %v1712_v7 = vshrl.u32 %v4986_v41, 16  ;;  %v5018_v38 = vld [vmem:[%s4453_s30 + $0x9c] sm:$0xf] }
  0x96   : > { %v1393_v52 = vsel %vm4484_vm2, %v1391_v57, %v1392_v35  ;;  %v1715_v34 = vshll.u32 %v4986_v41, 16  ;;  %v1725_v43 = vshrl.u32 %v4993_v53, 16  ;;  %v3851_v31 = vcombine.low %v4986_v41, %v4993_v53 }
  0x97   : > { %2499 = vrot.lane.b32.xlu1 %v3835_v54, %s4367_s8  ;;  %v3836_v3 = vcombine.low %v1390_v61, %v1393_v52  ;;  %v1334_v50 = vsel %vm4484_vm2, %v3652_v51, %v1333_v24  ;;  %v1335_v10 = vrot.slane %v1333_v24, 4  ;;  %v1714_v55 = vrot.slane %v1712_v7, 4  ;;  %v5068_v54 = vld [vmem:[%s4453_s30 + $0xa4] sm:$0x1] }
  0x98   : > { %v1717_v59 = vrot.slane %v1715_v34, 5  ;;  %v1520_v60 = vshrl.u32 %v5000_v44, 16  ;;  %v1523_v40 = vshll.u32 %v5000_v44, 16  ;;  %v1533_v13 = vshrl.u32 %v5007_v37, 16  ;;  %v5052_v20 = vpop.permute.xlu1 %2239 }
  0x99   : > { %2483 = vrot.lane.b32.xlu0 %v3827_v47, %s4367_s8  ;;  %v1337_v63 = vsel %vm4484_vm2, %v1335_v10, %v1336_v49  ;;  %v3843_v12 = vcombine.low %v5000_v44, %v5007_v37  ;;  %v1736_v0 = vshrl.u32 %v5018_v38, 16  ;;  %v1739_v2 = vshll.u32 %v5018_v38, 16 }
  0x9a   : > { %v3828_v4 = vcombine.low %v1334_v50, %v1337_v63  ;;  %v1522_v39 = vrot.slane %v1520_v60, 4  ;;  %v1525_v5 = vrot.slane %v1523_v40, 5  ;;  %v1749_v6 = vshrl.u32 %v5024_v58, 16  ;;  %v5071_v57 = vpop.permute.xlu0 %2223  ;;  %v5083_v50 = vld [vmem:[%s4453_s30 + $0x44] sm:$0x1] }
  0x9b   : > { %2501 = vrot.lane.b32.xlu1 %v3836_v3, %s4367_s8  ;;  %v1738_v14 = vrot.slane %v1736_v0, 4  ;;  %v1741_v15 = vrot.slane %v1739_v2, 5  ;;  %v3852_v16 = vcombine.low %v5018_v38, %v5024_v58  ;;  %v1544_v18 = vshrl.u32 %v5030_v62, 16 }
  0x9c   : > { %v1547_v23 = vshll.u32 %v5030_v62, 16  ;;  %v1557_v25 = vshrl.u32 %v5040_v45, 16  ;;  %v3844_v26 = vcombine.low %v5030_v62, %v5040_v45  ;;  %v1718_v29 = vor.u32 %v1717_v59, %v1714_v55  ;;  %v5076_v7 = vpop.permute.xlu1 %2241  ;;  %v3723_v62 = vld [vmem:[%s4453_s30 + $0x90] sm:$0xe] }
  0x9d   : > { %2485 = vrot.lane.b32.xlu0 %v3828_v4, %s4367_s8  ;;  %v1546_v19 = vrot.slane %v1544_v18, 4  ;;  %v1721_v46 = vshll.u32 %v4993_v53, 16  ;;  %v1727_v32 = vrot.slane %v1725_v43, 4  ;;  %v1731_v33 = vshll.u32 %v5044_v8, 16 }
  0x9e   : > { %v1549_v27 = vrot.slane %v1547_v23, 5  ;;  %v1719_v9 = vrot.slane %v1718_v29, 4  ;;  %v1526_v22 = vor.u32 %v1525_v5, %v1522_v39  ;;  %v1529_v36 = vshll.u32 %v5007_v37, 16 }
  0x9f   : > { %2595 = vrot.lane.b32.xlu1 %v3851_v31, %s4368_s9  ;;  %v1723_v56 = vrot.slane %v1721_v46, 5  ;;  %v1733_v41 = vrot.slane %v1731_v33, 5  ;;  %v1535_v1 = vrot.slane %v1533_v13, 4  ;;  %v1539_v42 = vshll.u32 %v5059_v17, 16 }
  0xa0   : > { %v1527_v35 = vrot.slane %v1526_v22, 4  ;;  %v1531_v51 = vrot.slane %v1529_v36, 5  ;;  %v1742_v28 = vor.u32 %v1741_v15, %v1738_v14  ;;  %v1745_v61 = vshll.u32 %v5024_v58, 16  ;;  %v3715_v14 = vld [vmem:[%s4453_s30 + $0x30] sm:$0xe]  ;;  %v5096_v15 = vpop.permute.xlu0 %2225 }
  0xa1   : > { %2579 = vrot.lane.b32.xlu0 %v3843_v12, %s4368_s9  ;;  %v1724_v44 = vsel %vm4542_vm5, %v1719_v9, %v1723_v56  ;;  %v1728_v47 = vor.u32 %v1727_v32, %v1723_v56  ;;  %v1541_v24 = vrot.slane %v1539_v42, 5  ;;  %v1751_v49 = vrot.slane %v1749_v6, 4  ;;  %v5111_v56 = vld [vmem:[%s4453_s30 + $0x94] sm:$0xf] }
  0xa2   : > { %v1532_v52 = vsel %vm4542_vm5, %v1527_v35, %v1531_v51  ;;  %v1536_v34 = vor.u32 %v1535_v1, %v1531_v51  ;;  %v1743_v43 = vrot.slane %v1742_v28, 4  ;;  %v1747_v31 = vrot.slane %v1745_v61, 5  ;;  %v5121_v28 = vld [vmem:[%s4453_s30 + $0x98] sm:$0x1]  ;;  %v207_v61 = vld [vmem:[%s4453_s30 + $0x30] sm:$0xf] }
  0xa3   : > { %2597 = vrot.lane.b32.xlu1 %v3852_v16, %s4368_s9  ;;  %v1729_v38 = vrot.slane %v1728_v47, 4  ;;  %v1755_v3 = vshll.u32 %v5068_v54, 16  ;;  %v1550_v10 = vor.u32 %v1549_v27, %v1546_v19  ;;  %v1553_v55 = vshll.u32 %v5040_v45, 16 }
  0xa4   : > { %v1537_v59 = vrot.slane %v1536_v34, 4  ;;  %v1748_v60 = vsel %vm4542_vm5, %v1743_v43, %v1747_v31  ;;  %v1752_v40 = vor.u32 %v1751_v49, %v1747_v31  ;;  %v1559_v13 = vrot.slane %v1557_v25, 4  ;;  %v5129_v49 = vld [vmem:[%s4453_s30 + $0x34] sm:$0xf] }
  0xa5   : > { %2581 = vrot.lane.b32.xlu0 %v3844_v26, %s4368_s9  ;;  %v1734_v63 = vsel %vm4542_vm5, %v1729_v38, %v1733_v41  ;;  %v1757_v12 = vrot.slane %v1755_v3, 5  ;;  %v1551_v0 = vrot.slane %v1550_v10, 4  ;;  %v1555_v2 = vrot.slane %v1553_v55, 5  ;;  %v223_v26 = vld [vmem:[%s4453_s30 + $0x90] sm:$0xf]  ;;  %v5101_v29 = vpop.permute.xlu1 %2145 }
  0xa6   : > { %v3867_v4 = vcombine.low %v1724_v44, %v1734_v63  ;;  %v1542_v39 = vsel %vm4542_vm5, %v1537_v59, %v1541_v24  ;;  %v1753_v5 = vrot.slane %v1752_v40, 4  ;;  %v1563_v6 = vshll.u32 %v5083_v50, 16  ;;  %v5135_v3 = vld [vmem:[%s4453_s30 + $0x38] sm:$0x1] }
  0xa7   : > { %v3859_v16 = vcombine.low %v1532_v52, %v1542_v39  ;;  %v1556_v18 = vsel %vm4542_vm5, %v1551_v0, %v1555_v2  ;;  %v1560_v23 = vor.u32 %v1559_v13, %v1555_v2  ;;  %v3739_v25 = vrot.slane %v3723_v62, 9 }
  0xa8   : > { %2675 = vrot.lane.b32.xlu1 %v3867_v4, %s4369_s10  ;;  %v1758_v19 = vsel %vm4542_vm5, %v1753_v5, %v1757_v12  ;;  %v1565_v46 = vrot.slane %v1563_v6, 5  ;;  %v1991_v32 = vrot.slane %v4993_v53, 5  ;;  %v1994_v33 = vrot.slane %v5044_v8, 5 }
  0xa9   : > { %2659 = vrot.lane.b32.xlu0 %v3859_v16, %s4369_s10  ;;  %v3868_v27 = vcombine.low %v1748_v60, %v1758_v19  ;;  %v1561_v9 = vrot.slane %v1560_v23, 4  ;;  %v3731_v22 = vrot.slane %v3715_v14, 9  ;;  %v1935_v36 = vrot.slane %v5007_v37, 5  ;;  %v2144_v52 = vpop.permute.xlu0 %2143 }
  0xaa   : > { %v1992_v41 = vsel %vm4484_vm2, %v3739_v25, %v1991_v32  ;;  %v1993_v1 = vrot.slane %v1991_v32, 4  ;;  %v1938_v42 = vrot.slane %v5059_v17, 5  ;;  %v539_v53 = vshrl.u32 %v223_v26, 16 }
  0xab   : > { %v1566_v8 = vsel %vm4542_vm5, %v1561_v9, %v1565_v46  ;;  %v1936_v35 = vsel %vm4484_vm2, %v3731_v22, %v1935_v36  ;;  %v1937_v51 = vrot.slane %v1935_v36, 4  ;;  %v542_v37 = vshll.u32 %v223_v26, 16 }
  0xac   : > { %2677 = vrot.lane.b32.xlu1 %v3868_v27, %s4369_s10  ;;  %v3860_v44 = vcombine.low %v1556_v18, %v1566_v8  ;;  %v1995_v47 = vsel %vm4484_vm2, %v1993_v1, %v1994_v33  ;;  %v541_v17 = vrot.slane %v539_v53, 4  ;;  %v548_v24 = vshll.u32 %v5111_v56, 16  ;;  %v3724_v18 = vld [vmem:[%s4453_s30 + $0x9c] sm:$0xe]  ;;  %v4255_v33 = vld [vmem:[%s4453_s30 + $0x4] sm:$0xf] }
  0xad   : > { %v3883_v34 = vcombine.low %v1992_v41, %v1995_v47  ;;  %v1939_v43 = vsel %vm4484_vm2, %v1937_v51, %v1938_v42  ;;  %v544_v31 = vrot.slane %v542_v37, 5  ;;  %v552_v38 = vshrl.u32 %v5111_v56, 16  ;;  %v5137_v10 = vpop.permute.xlu1 %2161  ;;  %v4256_v27 = vld [vmem:[%s4453_s30] sm:$0xf]  ;;  %v4257_v41 = vld [vmem:[%s4453_s30 + $0x10] sm:$0xf] }
  0xae   : > { %2661 = vrot.lane.b32.xlu0 %v3860_v44, %s4369_s10  ;;  %v3875_v55 = vcombine.low %v1936_v35, %v1939_v43  ;;  %v550_v59 = vrot.slane %v548_v24, 5  ;;  %v558_v60 = vshll.u32 %v5121_v28, 16  ;;  %v347_v40 = vshrl.u32 %v207_v61, 16  ;;  %v4258_v1 = vld [vmem:[%s4453_s30 + $0xc] sm:$0xf] }
  0xaf   : > { %v545_v13 = vor.u32 %v544_v31, %v541_v17  ;;  %v554_v62 = vrot.slane %v552_v38, 4  ;;  %v350_v63 = vshll.u32 %v207_v61, 16  ;;  %v356_v12 = vshll.u32 %v5129_v49, 16  ;;  %v3716_v8 = vld [vmem:[%s4453_s30 + $0x3c] sm:$0xe] }
  0xb0   : > { %2755 = vrot.lane.b32.xlu1 %v3883_v34, %s4370_s11  ;;  %v560_v0 = vrot.slane %v558_v60, 5  ;;  %v349_v2 = vrot.slane %v347_v40, 4  ;;  %v360_v4 = vshrl.u32 %v5129_v49, 16  ;;  %v366_v39 = vshll.u32 %v5135_v3, 16  ;;  %v225_v24 = vld [vmem:[%s4453_s30 + $0x9c] sm:$0xf] }
  0xb1   : > { %v546_v5 = vrot.slane %v545_v13, 4  ;;  %v555_v6 = vor.u32 %v554_v62, %v550_v59  ;;  %v352_v14 = vrot.slane %v350_v63, 5  ;;  %v358_v16 = vrot.slane %v356_v12, 5  ;;  %v5146_v23 = vpop.permute.xlu1 %2337  ;;  %v4259_v60 = vld [vmem:[%s4453_s30 + $0x70] sm:$0xf] }
  0xb2   : > { %2739 = vrot.lane.b32.xlu0 %v3875_v55, %s4370_s11  ;;  %v362_v25 = vrot.slane %v360_v4, 4  ;;  %v5149_v26 = vpop.permute.xlu0 %2159  ;;  %v3745_v9 = vcombine.low %v4256_v27, %v4255_v33  ;;  %v368_v36 = vrot.slane %v366_v39, 5  ;;  %v3746_v42 = vcombine.low %v4258_v1, %v4257_v41  ;;  %v4260_v40 = vld [vmem:[%s4453_s30 + $0x6c] sm:$0xf]  ;;  %v5180_v62 = vld [vmem:[%s4453_s30 + $0xa0] sm:$0xf] }
  0xb3   : > { %v551_v19 = vsel %vm4542_vm5, %v546_v5, %v550_v59  ;;  %v556_v46 = vrot.slane %v555_v6, 4  ;;  %v353_v32 = vor.u32 %v352_v14, %v349_v2  ;;  %v3740_v53 = vrot.slane %v3724_v18, 9  ;;  %v5189_v2 = vld [vmem:[%s4453_s30 + $0xa4] sm:$0x1]  ;;  %v4262_v6 = vld [vmem:[%s4453_s30 + $0x60] sm:$0xf] }
  0xb4   : > { %v363_v22 = vor.u32 %v362_v25, %v358_v16  ;;  %v1998_v37 = vrot.slane %v5024_v58, 5  ;;  %v2770_v47 = vsel %vm2767_vm6, %v3745_v9, %v2144_v52  ;;  %v2001_v17 = vrot.slane %v5068_v54, 5  ;;  %v4261_v5 = vld [vmem:[%s4453_s30 + $0x64] sm:$0xf] }
  0xb5   : > { %v561_v35 = vsel %vm4542_vm5, %v556_v46, %v560_v0  ;;  %v354_v51 = vrot.slane %v353_v32, 4  ;;  %v5166_v43 = vpop.permute.xlu1 %2415  ;;  %v3732_v55 = vrot.slane %v3716_v8, 9  ;;  %v1942_v52 = vrot.slane %v5040_v45, 5  ;;  %v5205_v32 = vld [vmem:[%s4453_s30 + $0x40] sm:$0xf] }
  0xb6   : > { %v3773_v61 = vcombine.low %v551_v19, %v561_v35  ;;  %v364_v44 = vrot.slane %v363_v22, 4  ;;  %v5164_v34 = vpop.permute.xlu0 %2321  ;;  %v1999_v58 = vsel %vm4484_vm2, %v3740_v53, %v1998_v37  ;;  %v2000_v38 = vrot.slane %v1998_v37, 4 }
  0xb7   : > { %v359_v31 = vsel %vm4542_vm5, %v354_v51, %v358_v16  ;;  %v1945_v59 = vrot.slane %v5083_v50, 5  ;;  %v3754_v13 = vcombine.low %v4260_v40, %v4259_v60  ;;  %v5184_v12 = vsel %vm2767_vm6, %v3746_v42, %v5101_v29  ;;  %v209_v16 = vld [vmem:[%s4453_s30 + $0x3c] sm:$0xf] }
  0xb8   : > { %2167 = vrot.lane.b32.xlu1 %v3773_v61, %s4365_s6  ;;  %v369_v54 = vsel %vm4542_vm5, %v364_v44, %v368_v36  ;;  %v2002_v0 = vsel %vm4484_vm2, %v2000_v38, %v2001_v17  ;;  %v563_v45 = vshrl.u32 %v225_v24, 16  ;;  %v1943_v50 = vsel %vm4484_vm2, %v3732_v55, %v1942_v52 }
  0xb9   : > { %v3765_v63 = vcombine.low %v359_v31, %v369_v54  ;;  %v3884_v4 = vcombine.low %v1999_v58, %v2002_v0  ;;  %v1944_v39 = vrot.slane %v1942_v52, 4  ;;  %v3753_v14 = vcombine.low %v4262_v6, %v4261_v5  ;;  %v638_v0 = vld [vmem:[%s4453_s30 + $0x30] sm:$0xe] }
  0xba   : > { %v5196_v18 = vpop.permute.xlu0 %2399  ;;  %v5201_v29 = vsel %vm2816_vm7, %v2770_v47, %v5071_v57  ;;  %v565_v25 = vrot.slane %v563_v45, 4  ;;  %v566_v19 = vshll.u32 %v225_v24, 16  ;;  %v572_v46 = vshll.u32 %v5180_v62, 16  ;;  %v5215_v57 = vld [vmem:[%s4453_s30 + $0x44] sm:$0x1] }
  0xbb   : > { %2151 = vrot.lane.b32.xlu0 %v3765_v63, %s4365_s6  ;;  %v1946_v33 = vsel %vm4484_vm2, %v1944_v39, %v1945_v59  ;;  %v2797_v27 = vsel %vm2767_vm6, %v3754_v13, %v5137_v10  ;;  %v576_v9 = vshrl.u32 %v5180_v62, 16  ;;  %v582_v22 = vshll.u32 %v5189_v2, 16 }
  0xbc   : > { %2757 = vrot.lane.b32.xlu1 %v3884_v4, %s4370_s11  ;;  %v5217_v36 = vpop.permute.xlu1 %2417  ;;  %v3876_v41 = vcombine.low %v1943_v50, %v1946_v33  ;;  %v568_v1 = vrot.slane %v566_v19, 5  ;;  %v574_v42 = vrot.slane %v572_v46, 5  ;;  %v371_v53 = vshrl.u32 %v209_v16, 16 }
  0xbd   : > { %v2794_v8 = vsel %vm2767_vm6, %v3753_v14, %v5149_v26  ;;  %v578_v35 = vrot.slane %v576_v9, 4  ;;  %v374_v51 = vshll.u32 %v209_v16, 16  ;;  %v380_v10 = vshll.u32 %v5205_v32, 16  ;;  %v646_v26 = vld [vmem:[%s4453_s30 + $0x90] sm:$0xe] }
  0xbe   : > { %v5222_v37 = vpop.permute.xlu0 %2401  ;;  %v569_v61 = vor.u32 %v568_v1, %v565_v25  ;;  %v373_v44 = vrot.slane %v371_v53, 4  ;;  %v384_v47 = vshrl.u32 %v5205_v32, 16  ;;  %v390_v17 = vshll.u32 %v5215_v57, 16 }
  0xbf   : > { %2741 = vrot.lane.b32.xlu0 %v3876_v41, %s4370_s11  ;;  %v579_v24 = vor.u32 %v578_v35, %v574_v42  ;;  %v584_v31 = vrot.slane %v582_v22, 5  ;;  %v376_v58 = vrot.slane %v374_v51, 5  ;;  %v382_v38 = vrot.slane %v380_v10, 5  ;;  %v639_v35 = vld [vmem:[%s4453_s30 + $0x3c] sm:$0xe] }
  0xc0   : > { %v5228_v55 = vpop.permute.xlu1 %2495  ;;  %v2834_v54 = vsel %vm2816_vm7, %v2794_v8, %v5052_v20  ;;  %v570_v52 = vrot.slane %v569_v61, 4  ;;  %v386_v59 = vrot.slane %v384_v47, 4  ;;  %v2836_v60 = vsel %vm2816_vm7, %v2797_v27, %v5076_v7 }
  0xc1   : > { %v580_v40 = vrot.slane %v579_v24, 4  ;;  %v377_v13 = vor.u32 %v376_v58, %v373_v44  ;;  %v392_v63 = vrot.slane %v390_v17, 5  ;;  %v2869_v39 = vsel %vm2849_vm8, %v2836_v60, %v5146_v23 }
  0xc2   : > { %v5235_v45 = vpop.permute.xlu0 %2479  ;;  %v575_v4 = vsel %vm4542_vm5, %v570_v52, %v574_v42  ;;  %v387_v50 = vor.u32 %v386_v59, %v382_v38  ;;  %v3581_v20 = vrot.slane %v646_v26, 9  ;;  %v787_v7 = vrot.slane %v5111_v56, 5  ;;  %v647_v42 = vld [vmem:[%s4453_s30 + $0x9c] sm:$0xe] }
  0xc3   : > { %v585_v5 = vsel %vm4542_vm5, %v580_v40, %v584_v31  ;;  %v378_v6 = vrot.slane %v377_v13, 4  ;;  %v790_v14 = vrot.slane %v5121_v28, 5  ;;  %v3573_v46 = vrot.slane %v638_v0, 9  ;;  %v5285_v31 = vld [vmem:[%s4453_s30 + $0xa0] sm:$0xf] }
  0xc4   : > { %v5245_v16 = vpop.permute.xlu1 %2497  ;;  %v3774_v25 = vcombine.low %v575_v4, %v585_v5  ;;  %v388_v19 = vrot.slane %v387_v50, 4  ;;  %v731_v33 = vrot.slane %v5129_v49, 5  ;;  %v788_v27 = vsel %vm4484_vm2, %v3581_v20, %v787_v7  ;;  %v3593_v26 = vld [vmem:[%s4453_s30 + $0x3c] sm:$0xf]  ;;  %v3611_v4 = vld [vmem:[%s4453_s30 + $0xa8] sm:$0xf] }
  0xc5   : > { %v383_v23 = vsel %vm4542_vm5, %v378_v6, %v382_v38  ;;  %v789_v9 = vrot.slane %v787_v7, 4  ;;  %v734_v56 = vrot.slane %v5135_v3, 5  ;;  %v2820_v49 = vsel %vm2816_vm7, %v5184_v12, %v5096_v15 }
  0xc6   : > { %v5253_v22 = vpop.permute.xlu0 %2481  ;;  %2169 = vrot.lane.b32.xlu1 %v3774_v25, %s4365_s6  ;;  %v393_v28 = vsel %vm4542_vm5, %v388_v19, %v392_v63  ;;  %v732_v41 = vsel %vm4484_vm2, %v3573_v46, %v731_v33  ;;  %v733_v1 = vrot.slane %v731_v33, 4  ;;  %v2853_v3 = vsel %vm2849_vm8, %v2820_v49, %v5164_v34  ;;  %v5279_v34 = vld [vmem:[%s4453_s30 + $0x9c] sm:$0xf]  ;;  %v5314_v63 = vld [vmem:[%s4453_s30 + $0x40] sm:$0xf] }
  0xc7   : > { %v3766_v53 = vcombine.low %v383_v23, %v393_v28  ;;  %v791_v8 = vsel %vm4484_vm2, %v789_v9, %v790_v14  ;;  %v2867_v12 = vsel %vm2849_vm8, %v2834_v54, %v5009_v48  ;;  %v2851_v61 = vsel %vm2849_vm8, %v5201_v29, %v5046_v11  ;;  %v5324_v25 = vld [vmem:[%s4453_s30 + $0xac] sm:$0xf]  ;;  %v3595_v19 = vld [vmem:[%s4453_s30 + $0x48] sm:$0xf] }
  0xc8   : > { %v5269_v51 = vpop.permute.xlu1 %2591  ;;  %v3789_v10 = vcombine.low %v788_v27, %v791_v8  ;;  %v735_v15 = vsel %vm4484_vm2, %v733_v1, %v734_v56  ;;  %v3582_v47 = vrot.slane %v647_v42, 9  ;;  %v794_v17 = vrot.slane %v5180_v62, 5  ;;  %v5332_v9 = vld [vmem:[%s4453_s30 + $0x4c] sm:$0xf] }
  0xc9   : > { %2153 = vrot.lane.b32.xlu0 %v3766_v53, %s4365_s6  ;;  %v3781_v44 = vcombine.low %v732_v41, %v735_v15  ;;  %v797_v24 = vrot.slane %v5189_v2, 5  ;;  %v2900_v48 = vsel %vm2882_vm9, %v2867_v12, %v5166_v43  ;;  %v3574_v11 = vrot.slane %v639_v35, 9  ;;  %v5347_v35 = vld [vmem:[%s4453_s30 + $0xa4] sm:$0x1] }
  0xca   : > { %v5287_v58 = vpop.permute.xlu0 %2575  ;;  %2247 = vrot.lane.b32.xlu1 %v3789_v10, %s4364_s5  ;;  %v738_v29 = vrot.slane %v5205_v32, 5  ;;  %v741_v38 = vrot.slane %v5215_v57, 5  ;;  %v2884_v62 = vsel %vm2882_vm9, %v2851_v61, %v5196_v18  ;;  %v795_v2 = vsel %vm4484_vm2, %v3582_v47, %v794_v17  ;;  %v5352_v61 = vld [vmem:[%s4453_s30 + $0x44] sm:$0x1] }
  0xcb   : > { %v796_v54 = vrot.slane %v794_v17, 4  ;;  %v1151_v52 = vshrl.u32 %v5279_v34, 16  ;;  %v2902_v57 = vsel %vm2882_vm9, %v2869_v39, %v5217_v36  ;;  %v1154_v60 = vshll.u32 %v5279_v34, 16 }
  0xcc   : > { %v5300_v59 = vpop.permute.xlu1 %2593  ;;  %v739_v43 = vsel %vm4484_vm2, %v3574_v11, %v738_v29  ;;  %v740_v32 = vrot.slane %v738_v29, 4  ;;  %v2886_v40 = vsel %vm2882_vm9, %v2853_v3, %v5222_v37  ;;  %v1164_v13 = vshrl.u32 %v5285_v31, 16 }
  0xcd   : > { %2231 = vrot.lane.b32.xlu0 %v3781_v44, %s4364_s5  ;;  %v798_v18 = vsel %vm4484_vm2, %v796_v54, %v797_v24  ;;  %v959_v0 = vshrl.u32 %v3593_v26, 16  ;;  %v1153_v20 = vrot.slane %v1151_v52, 4  ;;  %v962_v5 = vshll.u32 %v3593_v26, 16 }
  0xce   : > { %v5317_v50 = vpop.permute.xlu0 %2577  ;;  %v3790_v36 = vcombine.low %v795_v2, %v798_v18  ;;  %v742_v39 = vsel %vm4484_vm2, %v740_v32, %v741_v38  ;;  %v1156_v7 = vrot.slane %v1154_v60, 5  ;;  %v3805_v37 = vcombine.low %v5279_v34, %v5285_v31  ;;  %v5373_v32 = vld [vmem:[%s4453_s30 + $0xb0] sm:$0x1] }
  0xcf   : > { %v3782_v6 = vcombine.low %v739_v43, %v742_v39  ;;  %v961_v14 = vrot.slane %v959_v0, 4  ;;  %v972_v33 = vshrl.u32 %v5314_v63, 16  ;;  %v1175_v23 = vshrl.u32 %v3611_v4, 16 }
  0xd0   : > { %v5327_v46 = vpop.permute.xlu1 %2671  ;;  %2249 = vrot.lane.b32.xlu1 %v3790_v36, %s4364_s5  ;;  %v1178_v27 = vshll.u32 %v3611_v4, 16  ;;  %v964_v56 = vrot.slane %v962_v5, 5  ;;  %v3797_v28 = vcombine.low %v3593_v26, %v5314_v63  ;;  %v2933_v49 = vsel %vm2915_vm10, %v2900_v48, %v5228_v55 }
  0xd1   : > { %2233 = vrot.lane.b32.xlu0 %v3782_v6, %s4364_s5  ;;  %v5340_v41 = vsel %vm2915_vm10, %v2884_v62, %v5235_v45  ;;  %v1177_v42 = vrot.slane %v1175_v23, 4  ;;  %v1188_v3 = vshrl.u32 %v5324_v25, 16  ;;  %v3806_v8 = vcombine.low %v3611_v4, %v5324_v25 }
  0xd2   : > { %v5342_v1 = vpop.permute.xlu0 %2655  ;;  %v1180_v53 = vrot.slane %v1178_v27, 5  ;;  %v983_v10 = vshrl.u32 %v3595_v19, 16  ;;  %v986_v15 = vshll.u32 %v3595_v19, 16  ;;  %v996_v12 = vshrl.u32 %v5332_v9, 16 }
  0xd3   : > { %v3798_v55 = vcombine.low %v3595_v19, %v5332_v9  ;;  %v5359_v34 = vsel %vm2915_vm10, %v2902_v57, %v5245_v16  ;;  %v5363_v44 = vsel %vm2915_vm10, %v2886_v40, %v5253_v22  ;;  %v1157_v47 = vor.u32 %v1156_v7, %v1153_v20 }
  0xd4   : > { %v5354_v45 = vpop.permute.xlu1 %2673  ;;  %2343 = vrot.lane.b32.xlu1 %v3805_v37, %s4363_s4  ;;  %v1160_v17 = vshll.u32 %v5285_v31, 16  ;;  %v1166_v24 = vrot.slane %v1164_v13, 4  ;;  %v1170_v48 = vshll.u32 %v5347_v35, 16  ;;  %v965_v11 = vor.u32 %v964_v56, %v961_v14  ;;  %v5386_v14 = vld [vmem:[%s4453_s30 + $0x50] sm:$0x1] }
  0xd5   : > { %2327 = vrot.lane.b32.xlu0 %v3797_v28, %s4363_s4  ;;  %v968_v29 = vshll.u32 %v5314_v63, 16  ;;  %v1158_v38 = vrot.slane %v1157_v47, 4  ;;  %v974_v16 = vrot.slane %v972_v33, 4  ;;  %v978_v62 = vshll.u32 %v5352_v61, 16 }
  0xd6   : > { %v1162_v26 = vrot.slane %v1160_v17, 5  ;;  %v5370_v2 = vpop.permute.xlu0 %2657  ;;  %v985_v22 = vrot.slane %v983_v10, 4  ;;  %v988_v54 = vrot.slane %v986_v15, 5  ;;  %v966_v52 = vrot.slane %v965_v11, 4  ;;  %v3645_v15 = vld [vmem:[%s4453_s30 + $0x9c] sm:$0xe] }
  0xd7   : > { %v970_v43 = vrot.slane %v968_v29, 5  ;;  %v1172_v18 = vrot.slane %v1170_v48, 5  ;;  %v980_v0 = vrot.slane %v978_v62, 5  ;;  %v1181_v4 = vor.u32 %v1180_v53, %v1177_v42  ;;  %v3637_v48 = vld [vmem:[%s4453_s30 + $0x3c] sm:$0xe] }
  0xd8   : > { %2345 = vrot.lane.b32.xlu1 %v3806_v8, %s4363_s4  ;;  %v1163_v57 = vsel %vm4542_vm5, %v1158_v38, %v1162_v26  ;;  %v1167_v60 = vor.u32 %v1166_v24, %v1162_v26  ;;  %v5381_v36 = vpop.permute.xlu1 %2751  ;;  %v1184_v20 = vshll.u32 %v5324_v25, 16  ;;  %v1190_v5 = vrot.slane %v1188_v3, 4 }
  0xd9   : > { %2329 = vrot.lane.b32.xlu0 %v3798_v55, %s4363_s4  ;;  %v971_v40 = vsel %vm4542_vm5, %v966_v52, %v970_v43  ;;  %v975_v13 = vor.u32 %v974_v16, %v970_v43  ;;  %v1194_v6 = vshll.u32 %v5373_v32, 16  ;;  %v1182_v37 = vrot.slane %v1181_v4, 4  ;;  %v3646_v52 = vld [vmem:[%s4453_s30 + $0xa8] sm:$0xe] }
  0xda   : > { %v1168_v39 = vrot.slane %v1167_v60, 4  ;;  %v989_v19 = vor.u32 %v988_v54, %v985_v22  ;;  %v992_v33 = vshll.u32 %v5332_v9, 16  ;;  %v2966_v27 = vsel %vm2948_vm11, %v2933_v49, %v5269_v51  ;;  %v5393_v42 = vpop.permute.xlu0 %2735 }
  0xdb   : > { %v976_v7 = vrot.slane %v975_v13, 4  ;;  %v1186_v56 = vrot.slane %v1184_v20, 5  ;;  %v998_v28 = vrot.slane %v996_v12, 4  ;;  %v1196_v17 = vrot.slane %v1194_v6, 5 }
  0xdc   : > { %v1173_v23 = vsel %vm4542_vm5, %v1168_v39, %v1172_v18  ;;  %v990_v8 = vrot.slane %v989_v19, 4  ;;  %v994_v10 = vrot.slane %v992_v33, 5  ;;  %v1002_v24 = vshll.u32 %v5386_v14, 16 }
  0xdd   : > { %v3821_v53 = vcombine.low %v1163_v57, %v1173_v23  ;;  %v981_v3 = vsel %vm4542_vm5, %v976_v7, %v980_v0  ;;  %v1191_v47 = vor.u32 %v1190_v5, %v1186_v56  ;;  %v2950_v51 = vsel %vm2948_vm11, %v5340_v41, %v5287_v58  ;;  %v3638_v0 = vld [vmem:[%s4453_s30 + $0x48] sm:$0xe] }
  0xde   : > { %v3813_v55 = vcombine.low %v971_v40, %v981_v3  ;;  %v1187_v49 = vsel %vm4542_vm5, %v1182_v37, %v1186_v56  ;;  %v995_v12 = vsel %vm4542_vm5, %v990_v8, %v994_v10  ;;  %v999_v11 = vor.u32 %v998_v28, %v994_v10  ;;  %v5439_v37 = vld [vmem:[%s4453_s30 + $0xa8] sm:$0xf] }
  0xdf   : > { %2423 = vrot.lane.b32.xlu1 %v3821_v53, %s4366_s7  ;;  %v1192_v38 = vrot.slane %v1191_v47, 4  ;;  %v1004_v26 = vrot.slane %v1002_v24, 5  ;;  %v3661_v16 = vrot.slane %v3645_v15, 9  ;;  %v1396_v62 = vrot.slane %v5285_v31, 5  ;;  %v5453_v53 = vld [vmem:[%s4453_s30 + $0xac] sm:$0xf] }
  0xe0   : > { %v5408_v29 = vpop.permute.xlu1 %2163  ;;  %2407 = vrot.lane.b32.xlu0 %v3813_v55, %s4366_s7  ;;  %v1000_v22 = vrot.slane %v999_v11, 4  ;;  %v1399_v58 = vrot.slane %v5347_v35, 5  ;;  %v3653_v41 = vrot.slane %v3637_v48, 9  ;;  %v1340_v54 = vrot.slane %v5314_v63, 5  ;;  %v3673_v3 = vld [vmem:[%s4453_s30 + $0x48] sm:$0xf] }
  0xe1   : > { %v1197_v43 = vsel %vm4542_vm5, %v1192_v38, %v1196_v17  ;;  %v1397_v57 = vsel %vm4484_vm2, %v3661_v16, %v1396_v62  ;;  %v1398_v60 = vrot.slane %v1396_v62, 4  ;;  %v1343_v18 = vrot.slane %v5352_v61, 5  ;;  %v5474_v15 = vld [vmem:[%s4453_s30 + $0x4c] sm:$0xf]  ;;  %v5477_v55 = vld [vmem:[%s4453_s30 + $0xb4] sm:$0xf] }
  0xe2   : > { %v3822_v31 = vcombine.low %v1187_v49, %v1197_v43  ;;  %v1005_v35 = vsel %vm4542_vm5, %v1000_v22, %v1004_v26  ;;  %v1341_v63 = vsel %vm4484_vm2, %v3653_v41, %v1340_v54  ;;  %v1342_v13 = vrot.slane %v1340_v54, 4  ;;  %v5491_v11 = vld [vmem:[%s4453_s30 + $0x54] sm:$0xf] }
  0xe3   : > { %v5420_v40 = vpop.permute.xlu0 %2147  ;;  %v3814_v4 = vcombine.low %v995_v12, %v1005_v35  ;;  %v1400_v39 = vsel %vm4484_vm2, %v1398_v60, %v1399_v58  ;;  %v3662_v20 = vrot.slane %v3646_v52, 9  ;;  %v2968_v61 = vsel %vm2948_vm11, %v5359_v34, %v5300_v59  ;;  %v5488_v12 = vld [vmem:[%s4453_s30 + $0xb8] sm:$0xf]  ;;  %v4236_v35 = vld [vmem:[%s6375_s1 + $0x10] ss:$0 sps:$4 sm:$0x33]  }
  0xe4   : > { %2425 = vrot.lane.b32.xlu1 %v3822_v31, %s4366_s7  ;;  %v2952_v5 = vsel %vm2948_vm11, %v5363_v44, %v5317_v50  ;;  %v3837_v6 = vcombine.low %v1397_v57, %v1400_v39  ;;  %v1344_v7 = vsel %vm4484_vm2, %v1342_v13, %v1343_v18  ;;  %v5441_v19 = vpop.permute.xlu1 %2753  ;;  %v1403_v23 = vrot.slane %v5324_v25, 5  ;;  %v5498_v58 = vld [vmem:[%s4453_s30 + $0x58] sm:$0xf]  ;;  %4137 = vmatprep.subr.msk.bf16.mxu0 %vm3107_vm15, %v4236_v35 }
  0xe5   : > { %2409 = vrot.lane.b32.xlu0 %v3814_v4, %s4366_s7  ;;  %v3829_v33 = vcombine.low %v1341_v63, %v1344_v7  ;;  %v1406_v59 = vrot.slane %v5373_v32, 5  ;;  %v3654_v34 = vrot.slane %v3638_v0, 9  ;;  %v2999_v56 = vsel %vm2981_vm12, %v2966_v27, %v5327_v46  ;;  %v5518_v4 = vld [vmem:[%s4453_s30 + $0xb0] sm:$0x1]  ;;  %4138 = vmatprep.subr.msk.bf16.mxu1 %vm3107_vm15, %v4236_v35 }
  0xe6   : > { %v2983_v50 = vsel %vm2981_vm12, %v2950_v51, %v5342_v1  ;;  %v1347_v44 = vrot.slane %v5332_v9, 5  ;;  %v1350_v28 = vrot.slane %v5386_v14, 5  ;;  %v1404_v25 = vsel %vm4484_vm2, %v3662_v20, %v1403_v23 }
  0xe7   : > { %v1405_v32 = vrot.slane %v1403_v23, 4  ;;  %v1760_v8 = vshrl.u32 %v5439_v37, 16  ;;  %v1763_v46 = vshll.u32 %v5439_v37, 16  ;;  %v5460_v27 = vpop.permute.xlu0 %2737  ;;  %v5467_v14 = vsel %vm2981_vm12, %v2968_v61, %v5354_v45 }
  0xe8   : > { %2503 = vrot.lane.b32.xlu1 %v3837_v6, %s4367_s8  ;;  %v1348_v9 = vsel %vm4484_vm2, %v3654_v34, %v1347_v44  ;;  %v1349_v1 = vrot.slane %v1347_v44, 4  ;;  %v5471_v10 = vsel %vm2981_vm12, %v2952_v5, %v5370_v2  ;;  %v1773_v17 = vshrl.u32 %v5453_v53, 16  ;;  %v5547_v44 = vld [vmem:[%s4453_s30 + $0x7c] sm:$0xf] }
  0xe9   : > { %2487 = vrot.lane.b32.xlu0 %v3829_v33, %s4367_s8  ;;  %v1407_v47 = vsel %vm4484_vm2, %v1405_v32, %v1406_v59  ;;  %v3853_v45 = vcombine.low %v5439_v37, %v5453_v53  ;;  %v1568_v24 = vshrl.u32 %v3673_v3, 16  ;;  %v1762_v51 = vrot.slane %v1760_v8, 4  ;;  %v5539_v59 = vld [vmem:[%s4453_s30 + $0x50] sm:$0x1] }
  0xea   : > { %v3838_v48 = vcombine.low %v1404_v25, %v1407_v47  ;;  %v1351_v2 = vsel %vm4484_vm2, %v1349_v1, %v1350_v28  ;;  %v1571_v49 = vshll.u32 %v3673_v3, 16  ;;  %v1765_v16 = vrot.slane %v1763_v46, 5  ;;  %v5555_v25 = vld [vmem:[%s4453_s30 + $0x1c] sm:$0xf] }
  0xeb   : > { %v3830_v26 = vcombine.low %v1348_v9, %v1351_v2  ;;  %v1581_v62 = vshrl.u32 %v5474_v15, 16  ;;  %v1784_v22 = vshrl.u32 %v5477_v55, 16  ;;  %v1570_v41 = vrot.slane %v1568_v24, 4 }
  0xec   : > { %v5493_v38 = vpop.permute.xlu1 %2165  ;;  %2505 = vrot.lane.b32.xlu1 %v3838_v48, %s4367_s8  ;;  %v1573_v54 = vrot.slane %v1571_v49, 5  ;;  %v3845_v52 = vcombine.low %v3673_v3, %v5474_v15  ;;  %v1787_v43 = vshll.u32 %v5477_v55, 16  ;;  %v1797_v57 = vshrl.u32 %v5488_v12, 16  ;;  %v5552_v3 = vld [vmem:[%s4453_s30 + $0x18] sm:$0xf] }
  0xed   : > { %2489 = vrot.lane.b32.xlu0 %v3830_v26, %s4367_s8  ;;  %v3854_v60 = vcombine.low %v5477_v55, %v5488_v12  ;;  %v1592_v18 = vshrl.u32 %v5491_v11, 16  ;;  %v1595_v31 = vshll.u32 %v5491_v11, 16  ;;  %v5514_v13 = vrot.slane %v1784_v22, 4 }
  0xee   : > { %v1605_v0 = vshrl.u32 %v5498_v58, 16  ;;  %v1789_v20 = vrot.slane %v1787_v43, 5  ;;  %v3846_v61 = vcombine.low %v5491_v11, %v5498_v58  ;;  %v3016_v5 = vsel %vm3014_vm13, %v2983_v50, %v5393_v42  ;;  %v5544_v50 = vld [vmem:[%s4453_s30 + $0x78] sm:$0xf] }
  0xef   : > { %v5512_v63 = vpop.permute.xlu0 %2149  ;;  %v3032_v6 = vsel %vm3014_vm13, %v2999_v56, %v5381_v36  ;;  %v5529_v7 = vrot.slane %v1592_v18, 4  ;;  %v5531_v37 = vrot.slane %v1595_v31, 5  ;;  %4099 = vmatprep.mubr.msk.bf16.mxu0 %vm3074_vm14, %v3016_v5  ;;  %v1766_v33 = vor.u32 %v1765_v16, %v1762_v51  ;;  %v5571_v51 = vld [vmem:[%s4453_s30 + $0xbc] sm:$0x1] }
  0xf0   : > { %v5520_v39 = vpop.permute.xlu1 %2243  ;;  %2599 = vrot.lane.b32.xlu1 %v3853_v45, %s4368_s9  ;;  %4115 = vmatprep.mubr.msk.bf16.mxu1 %vm3074_vm14, %v3032_v6  ;;  %v1769_v42 = vshll.u32 %v5453_v53, 16  ;;  %v1775_v36 = vrot.slane %v1773_v17, 4  ;;  %v1779_v23 = vshll.u32 %v5518_v4, 16  ;;  %v1574_v34 = vor.u32 %v1573_v54, %v1570_v41  ;;  %v5591_v31 = vld [vmem:[%s4453_s30 + $0x5c] sm:$0x1] }
  0xf1   : > { %2583 = vrot.lane.b32.xlu0 %v3845_v52, %s4368_s9  ;;  %v3755_v28 = vcombine.low %v5544_v50, %v5547_v44  ;;  %v3747_v32 = vcombine.low %v5552_v3, %v5555_v25  ;;  %v1767_v8 = vrot.slane %v1766_v33, 4  ;;  %v1577_v46 = vshll.u32 %v5474_v15, 16  ;;  %v3725_v6 = vld [vmem:[%s4453_s30 + $0xa8] sm:$0xe] }
  0xf2   : > { %v1771_v1 = vrot.slane %v1769_v42, 5  ;;  %v1781_v55 = vrot.slane %v1779_v23, 5  ;;  %v1575_v47 = vrot.slane %v1574_v34, 4  ;;  %v1583_v17 = vrot.slane %v1581_v62, 4  ;;  %v4268_v25 = vld [vmem:[%s4453_s30 + $0x88] sm:$0xf] }
  0xf3   : > { %v5541_v56 = vpop.permute.xlu0 %2227  ;;  %v1579_v45 = vrot.slane %v1577_v46, 5  ;;  %v1587_v24 = vshll.u32 %v5539_v59, 16  ;;  %v3109_v48 = vsel %vm3107_vm15, %v4236_v35, 0  ;;  %v3034_v2 = vsel %vm3014_vm13, %v5467_v14, %v5441_v19 }
  0xf4   : > { %v5562_v9 = vpop.permute.xlu1 %2245  ;;  %2601 = vrot.lane.b32.xlu1 %v3854_v60, %s4368_s9  ;;  %v1772_v49 = vsel %vm4542_vm5, %v1767_v8, %v1771_v1  ;;  %v1776_v11 = vor.u32 %v1775_v36, %v1771_v1  ;;  %4098 = vmatpush3.bf16.msra.mxu0 %v3109_v48  ;;  %v3018_v26 = vsel %vm3014_vm13, %v5471_v10, %v5460_v27  ;;  %v1793_v16 = vshll.u32 %v5488_v12, 16 }
  0xf5   : > { %2585 = vrot.lane.b32.xlu0 %v3846_v61, %s4368_s9  ;;  %v1580_v19 = vsel %vm4542_vm5, %v1575_v47, %v1579_v45  ;;  %v1584_v14 = vor.u32 %v1583_v17, %v1579_v45  ;;  %v1589_v22 = vrot.slane %v1587_v24, 5  ;;  %4136 = vmatpush3.bf16.msra.mxu1 %v3109_v48  ;;  %v1790_v41 = vor.u32 %v1789_v20, %v5514_v13  ;;  %v3717_v47 = vld [vmem:[%s4453_s30 + $0x48] sm:$0xe] }
  0xf6   : > { %v1777_v52 = vrot.slane %v1776_v11, 4  ;;  %v1795_v43 = vrot.slane %v1793_v16, 5  ;;  %v1799_v27 = vrot.slane %v1797_v57, 4  ;;  %v1803_v10 = vshll.u32 %v5571_v51, 16 }
  0xf7   : > { %v5580_v62 = vpop.permute.xlu0 %2229  ;;  %v1585_v60 = vrot.slane %v1584_v14, 4  ;;  %v1791_v18 = vrot.slane %v1790_v41, 4  ;;  %v1598_v35 = vor.u32 %v5531_v37, %v5529_v7  ;;  %v1601_v61 = vshll.u32 %v5498_v58, 16  ;;  %4100 = vmatmul.mubr.msk.bf16.vlgmr.msra.gmra.mrb[0].mxu0 %vm3074_vm14, %v3018_v26  ;;  %v4270_v14 = vld [vmem:[%s4453_s30 + $0x28] sm:$0xf] }
  0xf8   : > { %v5585_v54 = vpop.permute.xlu1 %2339  ;;  %v1782_v13 = vsel %vm4542_vm5, %v1777_v52, %v1781_v55  ;;  %v1800_v20 = vor.u32 %v1799_v27, %v1795_v43  ;;  %v1805_v5 = vrot.slane %v1803_v10, 5  ;;  %v1607_v57 = vrot.slane %v1605_v0, 4  ;;  %4116 = vmatmul.mubr.msk.bf16.vlgmr.msra.gmra.mrb[0].mxu1 %vm3074_vm14, %v3034_v2  ;;  %v5657_v10 = vld [vmem:[%s4453_s30 + $0xb0] sm:$0x1] }
  0xf9   : > { %v3869_v42 = vcombine.low %v1772_v49, %v1782_v13  ;;  %v1590_v7 = vsel %vm4542_vm5, %v1585_v60, %v1589_v22  ;;  %v1796_v37 = vsel %vm4542_vm5, %v1791_v18, %v1795_v43  ;;  %v1599_v36 = vrot.slane %v1598_v35, 4  ;;  %v5650_v43 = vld [vmem:[%s4453_s30 + $0xac] sm:$0xf]  ;;  %v211_v35 = vld [vmem:[%s4453_s30 + $0x48] sm:$0xf] }
  0xfa   : > { %v3861_v34 = vcombine.low %v1580_v19, %v1590_v7  ;;  %v1801_v8 = vrot.slane %v1800_v20, 4  ;;  %v1603_v46 = vrot.slane %v1601_v61, 5  ;;  %v1611_v0 = vshll.u32 %v5591_v31, 16  ;;  %v4269_v19 = vld [vmem:[%s4453_s30 + $0x24] sm:$0xf] }
  0xfb   : > { %v5603_v33 = vpop.permute.xlu0 %2323  ;;  %2679 = vrot.lane.b32.xlu1 %v3869_v42, %s4369_s10  ;;  %v3741_v1 = vrot.slane %v3725_v6, 9  ;;  %v2005_v55 = vrot.slane %v5453_v53, 5  ;;  %v5620_v17 = vsel %vm2767_vm6, %v3755_v28, %v5408_v29  ;;  %v5632_v29 = vsel %vm2767_vm6, %v3747_v32, %v5420_v40  ;;  %v227_v28 = vld [vmem:[%s4453_s30 + $0xa8] sm:$0xf]  ;;  %v4267_v40 = vld [vmem:[%s4453_s30 + $0x84] sm:$0xf] }
  0xfc   : > { %v5609_v23 = vpop.permute.xlu1 %2341  ;;  %2663 = vrot.lane.b32.xlu0 %v3861_v34, %s4369_s10  ;;  %v1806_v45 = vsel %vm4542_vm5, %v1801_v8, %v1805_v5  ;;  %v1608_v24 = vor.u32 %v1607_v57, %v1603_v46  ;;  %v1613_v48 = vrot.slane %v1611_v0, 5  ;;  %v1604_v50 = vsel %vm4542_vm5, %v1599_v36, %v1603_v46  ;;  %v5667_v7 = vld [vmem:[%s4453_s30 + $0x4c] sm:$0xf]  ;;  %v5681_v46 = vld [vmem:[%s4453_s30 + $0x50] sm:$0x1] }
  0xfd   : > { %v3870_v53 = vcombine.low %v1796_v37, %v1806_v45  ;;  %v2006_v44 = vsel %vm4484_vm2, %v3741_v1, %v2005_v55  ;;  %v2007_v11 = vrot.slane %v2005_v55, 4  ;;  %v2008_v26 = vrot.slane %v5518_v4, 5 }
  0xfe   : > { %v1609_v49 = vrot.slane %v1608_v24, 4  ;;  %v3733_v16 = vrot.slane %v3717_v47, 9  ;;  %v3756_v32 = vcombine.low %v4267_v40, %v4268_v25  ;;  %v3748_v22 = vcombine.low %v4269_v19, %v4270_v14  ;;  %v3718_v14 = vld [vmem:[%s4453_s30 + $0x54] sm:$0xe] }
  0xff   : > { %v5625_v2 = vpop.permute.xlu0 %2325  ;;  %2681 = vrot.lane.b32.xlu1 %v3870_v53, %s4369_s10  ;;  %v1949_v41 = vrot.slane %v5474_v15, 5  ;;  %v1952_v52 = vrot.slane %v5539_v59, 5  ;;  %v2009_v27 = vsel %vm4484_vm2, %v2007_v11, %v2008_v26  ;;  %v587_v60 = vshrl.u32 %v227_v28, 16  ;;  %v3726_v26 = vld [vmem:[%s4453_s30 + $0xb4] sm:$0xe] }
 0x100   : > { %v1614_v4 = vsel %vm4542_vm5, %v1609_v49, %v1613_v48  ;;  %v590_v18 = vshll.u32 %v227_v28, 16  ;;  %v3885_v13 = vcombine.low %v2006_v44, %v2009_v27  ;;  %v596_v6 = vshll.u32 %v5650_v43, 16 }
 0x101   : > { %v5640_v3 = vpop.permute.xlu1 %2419  ;;  %v3862_v15 = vcombine.low %v1604_v50, %v1614_v4  ;;  %v1950_v59 = vsel %vm4484_vm2, %v3733_v16, %v1949_v41  ;;  %v1951_v20 = vrot.slane %v1949_v41, 4  ;;  %v589_v5 = vrot.slane %v587_v60, 4 }
 0x102   : > { %v592_v57 = vrot.slane %v590_v18, 5  ;;  %v600_v42 = vshrl.u32 %v5650_v43, 16  ;;  %v5674_v36 = vsel %vm2767_vm6, %v3756_v32, %v5493_v38  ;;  %v606_v8 = vshll.u32 %v5657_v10, 16 }
 0x103   : > { %v5660_v61 = vpop.permute.xlu0 %2403  ;;  %2665 = vrot.lane.b32.xlu0 %v3862_v15, %s4369_s10  ;;  %2759 = vrot.lane.b32.xlu1 %v3885_v13, %s4370_s11  ;;  %v1953_v34 = vsel %vm4484_vm2, %v1951_v20, %v1952_v52  ;;  %v395_v0 = vshrl.u32 %v211_v35, 16  ;;  %v598_v47 = vrot.slane %v596_v6, 5  ;;  %v398_v53 = vshll.u32 %v211_v35, 16  ;;  %v5716_v15 = vld [vmem:[%s4453_s30 + $0xb4] sm:$0xf] }
 0x104   : > { %v3877_v1 = vcombine.low %v1950_v59, %v1953_v34  ;;  %v593_v55 = vor.u32 %v592_v57, %v589_v5  ;;  %v602_v45 = vrot.slane %v600_v42, 4  ;;  %v608_v38 = vrot.slane %v606_v8, 5  ;;  %v5726_v34 = vld [vmem:[%s4453_s30 + $0xb8] sm:$0xf] }
 0x105   : > { %v5669_v37 = vpop.permute.xlu1 %2421  ;;  %v397_v48 = vrot.slane %v395_v0, 4  ;;  %v404_v50 = vshll.u32 %v5667_v7, 16  ;;  %v408_v49 = vshrl.u32 %v5667_v7, 16  ;;  %v414_v11 = vshll.u32 %v5681_v46, 16 }
 0x106   : > { %v594_v44 = vrot.slane %v593_v55, 4  ;;  %v603_v28 = vor.u32 %v602_v45, %v598_v47  ;;  %v5693_v40 = vsel %vm2767_vm6, %v3748_v22, %v5512_v63  ;;  %v5699_v25 = vsel %vm2816_vm7, %v5620_v17, %v5520_v39 }
 0x107   : > { %v5683_v24 = vpop.permute.xlu0 %2405  ;;  %2743 = vrot.lane.b32.xlu0 %v3877_v1, %s4370_s11  ;;  %v400_v32 = vrot.slane %v398_v53, 5  ;;  %v406_v19 = vrot.slane %v404_v50, 5  ;;  %v5705_v41 = vsel %vm2816_vm7, %v5632_v29, %v5541_v56  ;;  %v410_v52 = vrot.slane %v408_v49, 4 }
 0x108   : > { %v599_v63 = vsel %vm4542_vm5, %v594_v44, %v598_v47  ;;  %v604_v22 = vrot.slane %v603_v28, 4  ;;  %v416_v60 = vrot.slane %v414_v11, 5  ;;  %v3742_v39 = vrot.slane %v3726_v26, 9  ;;  %v5737_v47 = vld [vmem:[%s4453_s30 + $0xbc] sm:$0x1] }
 0x109   : > { %v5689_v16 = vpop.permute.xlu1 %2499  ;;  %v401_v27 = vor.u32 %v400_v32, %v397_v48  ;;  %v2012_v17 = vrot.slane %v5488_v12, 5  ;;  %v411_v35 = vor.u32 %v410_v52, %v406_v19  ;;  %v2015_v56 = vrot.slane %v5571_v51, 5  ;;  %v5752_v26 = vld [vmem:[%s4453_s30 + $0x58] sm:$0xf] }
 0x10a   : > { %v609_v18 = vsel %vm4542_vm5, %v604_v22, %v608_v38  ;;  %v3734_v29 = vrot.slane %v3718_v14, 9  ;;  %v804_v12 = vrot.slane %v5657_v10, 5  ;;  %v1956_v42 = vrot.slane %v5498_v58, 5 }
 0x10b   : > { %v5709_v4 = vpop.permute.xlu0 %2483  ;;  %v3775_v59 = vcombine.low %v599_v63, %v609_v18  ;;  %v402_v20 = vrot.slane %v401_v27, 4  ;;  %v2013_v5 = vsel %vm4484_vm2, %v3742_v39, %v2012_v17  ;;  %v2014_v57 = vrot.slane %v2012_v17, 4  ;;  %v5759_v63 = vld [vmem:[%s4453_s30 + $0x5c] sm:$0x1] }
 0x10c   : > { %v412_v6 = vrot.slane %v411_v35, 4  ;;  %v1959_v51 = vrot.slane %v5591_v31, 5  ;;  %v748_v1 = vrot.slane %v5681_v46, 5  ;;  %v611_v58 = vshrl.u32 %v5716_v15, 16  ;;  %v5741_v31 = vld [vmem:[%s4453_s30 + $0x54] sm:$0xf] }
 0x10d   : > { %v5718_v13 = vpop.permute.xlu1 %2501  ;;  %2171 = vrot.lane.b32.xlu1 %v3775_v59, %s4365_s6  ;;  %v407_v0 = vsel %vm4542_vm5, %v402_v20, %v406_v19  ;;  %v2016_v55 = vsel %vm4484_vm2, %v2014_v57, %v2015_v56  ;;  %v1957_v48 = vsel %vm4484_vm2, %v3734_v29, %v1956_v42  ;;  %v1958_v53 = vrot.slane %v1956_v42, 4  ;;  %v648_v59 = vld [vmem:[%s4453_s30 + $0xa8] sm:$0xe] }
 0x10e   : > { %v417_v45 = vsel %vm4542_vm5, %v412_v6, %v416_v60  ;;  %v3886_v38 = vcombine.low %v2013_v5, %v2016_v55  ;;  %v613_v28 = vrot.slane %v611_v58, 4  ;;  %v614_v49 = vshll.u32 %v5716_v15, 16 }
 0x10f   : > { %v5728_v8 = vpop.permute.xlu0 %2485  ;;  %v3767_v44 = vcombine.low %v407_v0, %v417_v45  ;;  %v620_v11 = vshll.u32 %v5726_v34, 16  ;;  %v1960_v32 = vsel %vm4484_vm2, %v1958_v53, %v1959_v51  ;;  %v624_v19 = vshrl.u32 %v5726_v34, 16  ;;  %v640_v51 = vld [vmem:[%s4453_s30 + $0x48] sm:$0xe] }
 0x110   : > { %v630_v14 = vshll.u32 %v5737_v47, 16  ;;  %v419_v22 = vshrl.u32 %v5741_v31, 16  ;;  %v3878_v27 = vcombine.low %v1957_v48, %v1960_v32  ;;  %v616_v60 = vrot.slane %v614_v49, 5 }
 0x111   : > { %v5747_v50 = vpop.permute.xlu1 %2595  ;;  %2155 = vrot.lane.b32.xlu0 %v3767_v44, %s4365_s6  ;;  %2761 = vrot.lane.b32.xlu1 %v3886_v38, %s4370_s11  ;;  %v622_v39 = vrot.slane %v620_v11, 5  ;;  %v422_v17 = vshll.u32 %v5741_v31, 16  ;;  %v2840_v18 = vsel %vm2816_vm7, %v5674_v36, %v5562_v9  ;;  %v626_v35 = vrot.slane %v624_v19, 4 }
 0x112   : > { %v421_v56 = vrot.slane %v419_v22, 4  ;;  %v428_v29 = vshll.u32 %v5752_v26, 16  ;;  %v617_v5 = vor.u32 %v616_v60, %v613_v28  ;;  %v432_v6 = vshrl.u32 %v5752_v26, 16 }
 0x113   : > { %v5762_v52 = vpop.permute.xlu0 %2579  ;;  %v424_v57 = vrot.slane %v422_v17, 5  ;;  %v438_v42 = vshll.u32 %v5759_v63, 16  ;;  %v2824_v0 = vsel %vm2816_vm7, %v5693_v40, %v5580_v62  ;;  %v627_v55 = vor.u32 %v626_v35, %v622_v39 }
 0x114   : > { %v632_v9 = vrot.slane %v630_v14, 5  ;;  %v430_v36 = vrot.slane %v428_v29, 5  ;;  %v618_v58 = vrot.slane %v617_v5, 4  ;;  %v434_v38 = vrot.slane %v432_v6, 4  ;;  %v649_v14 = vld [vmem:[%s4453_s30 + $0xb4] sm:$0xe] }
 0x115   : > { %v5772_v20 = vpop.permute.xlu1 %2597  ;;  %2745 = vrot.lane.b32.xlu0 %v3878_v27, %s4370_s11  ;;  %v425_v45 = vor.u32 %v424_v57, %v421_v56  ;;  %v440_v48 = vrot.slane %v438_v42, 5  ;;  %v628_v44 = vrot.slane %v627_v55, 4  ;;  %v3583_v28 = vrot.slane %v648_v59, 9 }
 0x116   : > { %v801_v49 = vrot.slane %v5650_v43, 5  ;;  %v3575_v11 = vrot.slane %v640_v51, 9  ;;  %v623_v62 = vsel %vm4542_vm5, %v618_v58, %v622_v39  ;;  %v435_v32 = vor.u32 %v434_v38, %v430_v36  ;;  %v5828_v38 = vld [vmem:[%s4453_s30 + $0x54] sm:$0xf] }
 0x117   : > { %v5781_v53 = vpop.permute.xlu0 %2581  ;;  %v426_v40 = vrot.slane %v425_v45, 4  ;;  %v745_v19 = vrot.slane %v5667_v7, 5  ;;  %v2871_v22 = vsel %vm2849_vm8, %v5699_v25, %v5585_v54  ;;  %v633_v27 = vsel %vm4542_vm5, %v628_v44, %v632_v9  ;;  %v641_v54 = vld [vmem:[%s4453_s30 + $0x54] sm:$0xe] }
 0x118   : > { %v802_v43 = vsel %vm4484_vm2, %v3583_v28, %v801_v49  ;;  %v803_v60 = vrot.slane %v801_v49, 4  ;;  %v2855_v39 = vsel %vm2849_vm8, %v5705_v41, %v5603_v33  ;;  %v3776_v35 = vcombine.low %v623_v62, %v633_v27  ;;  %v3613_v9 = vld [vmem:[%s4453_s30 + $0xb4] sm:$0xf]  ;;  %v5850_v62 = vld [vmem:[%s4453_s30 + $0x58] sm:$0xf] }
 0x119   : > { %v431_v7 = vsel %vm4542_vm5, %v426_v40, %v430_v36  ;;  %v436_v56 = vrot.slane %v435_v32, 4  ;;  %v746_v29 = vsel %vm4484_vm2, %v3575_v11, %v745_v19  ;;  %v747_v59 = vrot.slane %v745_v19, 4  ;;  %v3615_v32 = vld [vmem:[%s4453_s30 + $0xc0] sm:$0xf] }
 0x11a   : > { %v5795_v17 = vpop.permute.xlu1 %2675  ;;  %v805_v25 = vsel %vm4484_vm2, %v803_v60, %v804_v12  ;;  %v3584_v5 = vrot.slane %v649_v14, 9  ;;  %2173 = vrot.lane.b32.xlu1 %v3776_v35, %s4365_s6  ;;  %v808_v57 = vrot.slane %v5726_v34, 5  ;;  %v811_v6 = vrot.slane %v5737_v47, 5 }
 0x11b   : > { %v441_v33 = vsel %vm4542_vm5, %v436_v56, %v440_v48  ;;  %v3791_v41 = vcombine.low %v802_v43, %v805_v25  ;;  %v5814_v10 = vpop.permute.xlu0 %2659  ;;  %v749_v42 = vsel %vm4484_vm2, %v747_v59, %v748_v1  ;;  %v3576_v51 = vrot.slane %v641_v54, 9 }
 0x11c   : > { %v3768_v12 = vcombine.low %v431_v7, %v441_v33  ;;  %v752_v55 = vrot.slane %v5752_v26, 5  ;;  %v2873_v36 = vsel %vm2849_vm8, %v2840_v18, %v5609_v23  ;;  %v809_v58 = vsel %vm4484_vm2, %v3584_v5, %v808_v57  ;;  %v5836_v18 = vld [vmem:[%s4453_s30 + $0xb8] sm:$0xf]  ;;  %v3599_v7 = vld [vmem:[%s4453_s30 + $0x60] sm:$0xf] }
 0x11d   : > { %v810_v47 = vrot.slane %v808_v57, 4  ;;  %v755_v45 = vrot.slane %v5759_v63, 5  ;;  %v2857_v46 = vsel %vm2849_vm8, %v2824_v0, %v5625_v2  ;;  %v3783_v1 = vcombine.low %v746_v29, %v749_v42  ;;  %v5873_v29 = vld [vmem:[%s4453_s30 + $0x64] sm:$0xf]  ;;  %v5886_v57 = vld [vmem:[%s4453_s30 + $0xbc] sm:$0x1] }
 0x11e   : > { %2157 = vrot.lane.b32.xlu0 %v3768_v12, %s4365_s6  ;;  %v2904_v48 = vsel %vm2882_vm9, %v2871_v22, %v5640_v3  ;;  %v754_v23 = vrot.slane %v752_v55, 4  ;;  %v5838_v44 = vpop.permute.xlu1 %2677  ;;  %2251 = vrot.lane.b32.xlu1 %v3791_v41, %s4364_s5  ;;  %v753_v28 = vsel %vm4484_vm2, %v3576_v51, %v752_v55  ;;  %v1199_v49 = vshrl.u32 %v3613_v9, 16 }
 0x11f   : > { %v812_v63 = vsel %vm4484_vm2, %v810_v47, %v811_v6  ;;  %v1202_v2 = vshll.u32 %v3613_v9, 16  ;;  %v2888_v0 = vsel %vm2882_vm9, %v2855_v39, %v5660_v61  ;;  %v1007_v40 = vshrl.u32 %v5828_v38, 16 }
 0x120   : > { %v3792_v3 = vcombine.low %v809_v58, %v812_v63  ;;  %v756_v11 = vsel %vm4484_vm2, %v754_v23, %v755_v45  ;;  %v2906_v19 = vsel %vm2882_vm9, %v2873_v36, %v5669_v37  ;;  %v5858_v14 = vsel %vm2882_vm9, %v2857_v46, %v5683_v24  ;;  %v5862_v27 = vpop.permute.xlu0 %2661  ;;  %v5867_v37 = vld [vmem:[%s4453_s30 + $0xc4] sm:$0xf] }
 0x121   : > { %v1212_v61 = vshrl.u32 %v5836_v18, 16  ;;  %v1010_v22 = vshll.u32 %v5828_v38, 16  ;;  %v3784_v43 = vcombine.low %v753_v28, %v756_v11  ;;  %v1201_v60 = vrot.slane %v1199_v49, 4  ;;  %v5906_v11 = vld [vmem:[%s4453_s30 + $0xc8] sm:$0x1] }
 0x122   : > { %2235 = vrot.lane.b32.xlu0 %v3783_v1, %s4364_s5  ;;  %v1204_v39 = vrot.slane %v1202_v2, 5  ;;  %v3807_v35 = vcombine.low %v3613_v9, %v5836_v18  ;;  %2253 = vrot.lane.b32.xlu1 %v3792_v3, %s4364_s5  ;;  %v1009_v24 = vrot.slane %v1007_v40, 4  ;;  %v1020_v56 = vshrl.u32 %v5850_v62, 16  ;;  %v5888_v6 = vpop.permute.xlu1 %2755  ;;  %v5893_v9 = vld [vmem:[%s4453_s30 + $0x5c] sm:$0x1] }
 0x123   : > { %v1223_v54 = vshrl.u32 %v3615_v32, 16  ;;  %v1226_v25 = vshll.u32 %v3615_v32, 16  ;;  %v1012_v59 = vrot.slane %v1010_v22, 5  ;;  %v3799_v5 = vcombine.low %v5828_v38, %v5850_v62 }
 0x124   : > { %v5879_v33 = vsel %vm2915_vm10, %v2904_v48, %v5689_v16  ;;  %v5883_v41 = vsel %vm2915_vm10, %v2888_v0, %v5709_v4  ;;  %v1236_v12 = vshrl.u32 %v5867_v37, 16  ;;  %v3808_v42 = vcombine.low %v3615_v32, %v5867_v37  ;;  %v5901_v1 = vpop.permute.xlu0 %2739 }
 0x125   : > { %v1031_v51 = vshrl.u32 %v3599_v7, 16  ;;  %v1034_v55 = vshll.u32 %v3599_v7, 16  ;;  %v1225_v16 = vrot.slane %v1223_v54, 4  ;;  %v1228_v36 = vrot.slane %v1226_v25, 5 }
 0x126   : > { %2237 = vrot.lane.b32.xlu0 %v3784_v43, %s4364_s5  ;;  %v1044_v58 = vshrl.u32 %v5873_v29, 16  ;;  %v3800_v4 = vcombine.low %v3599_v7, %v5873_v29  ;;  %2347 = vrot.lane.b32.xlu1 %v3807_v35, %s4363_s4  ;;  %v1205_v47 = vor.u32 %v1204_v39, %v1201_v60  ;;  %v1208_v45 = vshll.u32 %v5836_v18, 16 }
 0x127   : > { %v1214_v38 = vrot.slane %v1212_v61, 4  ;;  %v1218_v46 = vshll.u32 %v5886_v57, 16  ;;  %v1013_v48 = vor.u32 %v1012_v59, %v1009_v24  ;;  %v1016_v23 = vshll.u32 %v5850_v62, 16 }
 0x128   : > { %v1022_v63 = vrot.slane %v1020_v56, 4  ;;  %v1026_v28 = vshll.u32 %v5893_v9, 16  ;;  %v1033_v49 = vrot.slane %v1031_v51, 4  ;;  %v1036_v2 = vrot.slane %v1034_v55, 5 }
 0x129   : > { %v1206_v0 = vrot.slane %v1205_v47, 4  ;;  %v1210_v3 = vrot.slane %v1208_v45, 5  ;;  %v5911_v40 = vsel %vm2915_vm10, %v2906_v19, %v5718_v13  ;;  %v1220_v32 = vrot.slane %v1218_v46, 5 }
 0x12a   : > { %2331 = vrot.lane.b32.xlu0 %v3799_v5, %s4363_s4  ;;  %v1014_v61 = vrot.slane %v1013_v48, 4  ;;  %v1018_v22 = vrot.slane %v1016_v23, 5  ;;  %v5913_v43 = vpop.permute.xlu1 %2167  ;;  %2349 = vrot.lane.b32.xlu1 %v3808_v42, %s4363_s4  ;;  %v1028_v39 = vrot.slane %v1026_v28, 5  ;;  %v1229_v35 = vor.u32 %v1228_v36, %v1225_v16  ;;  %v5921_v5 = vld [vmem:[%s4453_s30 + $0x68] sm:$0x1] }
 0x12b   : > { %v1215_v60 = vor.u32 %v1214_v38, %v1210_v3  ;;  %v1232_v7 = vshll.u32 %v5867_v37, 16  ;;  %v1211_v24 = vsel %vm4542_vm5, %v1206_v0, %v1210_v3  ;;  %v1238_v54 = vrot.slane %v1236_v12, 4  ;;  %v3647_v48 = vld [vmem:[%s4453_s30 + $0xb4] sm:$0xe] }
 0x12c   : > { %v1023_v56 = vor.u32 %v1022_v63, %v1018_v22  ;;  %v1242_v13 = vshll.u32 %v5906_v11, 16  ;;  %v1230_v25 = vrot.slane %v1229_v35, 4  ;;  %v1037_v51 = vor.u32 %v1036_v2, %v1033_v49  ;;  %v3639_v49 = vld [vmem:[%s4453_s30 + $0x54] sm:$0xe] }
 0x12d   : > { %v1216_v19 = vrot.slane %v1215_v60, 4  ;;  %v1234_v59 = vrot.slane %v1232_v7, 5  ;;  %v5923_v42 = vpop.permute.xlu0 %2151  ;;  %v1019_v55 = vsel %vm4542_vm5, %v1014_v61, %v1018_v22  ;;  %v1040_v12 = vshll.u32 %v5873_v29, 16 }
 0x12e   : > { %2333 = vrot.lane.b32.xlu0 %v3800_v4, %s4363_s4  ;;  %v1024_v16 = vrot.slane %v1023_v56, 4  ;;  %v1046_v36 = vrot.slane %v1044_v58, 4  ;;  %v1244_v38 = vrot.slane %v1242_v13, 5  ;;  %v1038_v46 = vrot.slane %v1037_v51, 4  ;;  %v5936_v2 = vpop.permute.xlu1 %2757 }
 0x12f   : > { %v1221_v47 = vsel %vm4542_vm5, %v1216_v19, %v1220_v32  ;;  %v1239_v45 = vor.u32 %v1238_v54, %v1234_v59  ;;  %v1042_v28 = vrot.slane %v1040_v12, 5  ;;  %v1050_v4 = vshll.u32 %v5921_v5, 16 }
 0x130   : > { %v3823_v23 = vcombine.low %v1211_v24, %v1221_v47  ;;  %v1029_v63 = vsel %vm4542_vm5, %v1024_v16, %v1028_v39  ;;  %v2923_v58 = vsel %vm2915_vm10, %v5858_v14, %v5728_v8  ;;  %v1235_v3 = vsel %vm4542_vm5, %v1230_v25, %v1234_v59  ;;  %v3648_v24 = vld [vmem:[%s4453_s30 + $0xc0] sm:$0xe] }
 0x131   : > { %v3815_v0 = vcombine.low %v1019_v55, %v1029_v63  ;;  %v1240_v32 = vrot.slane %v1239_v45, 4  ;;  %v1043_v61 = vsel %vm4542_vm5, %v1038_v46, %v1042_v28  ;;  %v1047_v22 = vor.u32 %v1046_v36, %v1042_v28  ;;  %v5952_v56 = vpop.permute.xlu0 %2741  ;;  %v3640_v55 = vld [vmem:[%s4453_s30 + $0x60] sm:$0xe] }
 0x132   : > { %2427 = vrot.lane.b32.xlu1 %v3823_v23, %s4366_s7  ;;  %v1052_v60 = vrot.slane %v1050_v4, 5  ;;  %v3663_v39 = vrot.slane %v3647_v48, 9  ;;  %v1410_v8 = vrot.slane %v5836_v18, 5  ;;  %v1413_v14 = vrot.slane %v5886_v57, 5  ;;  %v3693_v48 = vld [vmem:[%s4453_s30 + $0xc0] sm:$0xf] }
 0x133   : > { %2411 = vrot.lane.b32.xlu0 %v3815_v0, %s4366_s7  ;;  %v1245_v35 = vsel %vm4542_vm5, %v1240_v32, %v1244_v38  ;;  %v3655_v7 = vrot.slane %v3639_v49, 9  ;;  %v1048_v13 = vrot.slane %v1047_v22, 4  ;;  %v1354_v19 = vrot.slane %v5850_v62, 5  ;;  %v5985_v4 = vld [vmem:[%s4453_s30 + $0x60] sm:$0xf] }
 0x134   : > { %v3824_v54 = vcombine.low %v1235_v3, %v1245_v35  ;;  %v1357_v25 = vrot.slane %v5893_v9, 5  ;;  %v2970_v59 = vsel %vm2948_vm11, %v5879_v33, %v5747_v50  ;;  %v2954_v18 = vsel %vm2948_vm11, %v5883_v41, %v5762_v52  ;;  %v6004_v22 = vld [vmem:[%s4453_s30 + $0xc4] sm:$0xf]  ;;  %v3695_v35 = vld [vmem:[%s4453_s30 + $0xcc] sm:$0xf] }
 0x135   : > { %v1411_v57 = vsel %vm4484_vm2, %v3663_v39, %v1410_v8  ;;  %v1412_v51 = vrot.slane %v1410_v8, 4  ;;  %v1053_v62 = vsel %vm4542_vm5, %v1048_v13, %v1052_v60  ;;  %v1355_v9 = vsel %vm4484_vm2, %v3655_v7, %v1354_v19  ;;  %v6019_v7 = vld [vmem:[%s4453_s30 + $0x6c] sm:$0xf] }
 0x136   : > { %2429 = vrot.lane.b32.xlu1 %v3824_v54, %s4366_s7  ;;  %v1356_v16 = vrot.slane %v1354_v19, 4  ;;  %v3664_v50 = vrot.slane %v3648_v24, 9  ;;  %v3816_v52 = vcombine.low %v1043_v61, %v1053_v62  ;;  %v1417_v12 = vrot.slane %v5867_v37, 5 }
 0x137   : > { %v1414_v41 = vsel %vm4484_vm2, %v1412_v51, %v1413_v14  ;;  %v1420_v36 = vrot.slane %v5906_v11, 5  ;;  %v3656_v38 = vrot.slane %v3640_v55, 9  ;;  %v1361_v46 = vrot.slane %v5873_v29, 5  ;;  %v6038_v55 = vld [vmem:[%s4453_s30 + $0x70] sm:$0xf] }
 0x138   : > { %v5970_v33 = vpop.permute.xlu1 %2169  ;;  %v3839_v47 = vcombine.low %v1411_v57, %v1414_v41  ;;  %v1358_v45 = vsel %vm4484_vm2, %v1356_v16, %v1357_v25  ;;  %2413 = vrot.lane.b32.xlu0 %v3816_v52, %s4366_s7  ;;  %v1418_v63 = vsel %vm4484_vm2, %v3664_v50, %v1417_v12  ;;  %v1419_v28 = vrot.slane %v1417_v12, 4  ;;  %v6027_v25 = vld [vmem:[%s4453_s30 + $0x64] sm:$0xf]  ;;  %s3978_s7 = sshll.u32 %s4353_s15, 11 }
 0x139   : > { %v3831_v23 = vcombine.low %v1355_v9, %v1358_v45  ;;  %v1364_v37 = vrot.slane %v5921_v5, 5  ;;  %v2972_v29 = vsel %vm2948_vm11, %v5911_v40, %v5772_v20  ;;  %v2956_v49 = vsel %vm2948_vm11, %v2923_v58, %v5781_v53 }
 0x13a   : > { %2507 = vrot.lane.b32.xlu1 %v3839_v47, %s4367_s8  ;;  %v1362_v0 = vsel %vm4484_vm2, %v3656_v38, %v1361_v46  ;;  %v1363_v3 = vrot.slane %v1361_v46, 4  ;;  %v3003_v5 = vsel %vm2981_vm12, %v2970_v59, %v5795_v17  ;;  %v1421_v61 = vsel %vm4484_vm2, %v1419_v28, %v1420_v36 }
 0x13b   : > { %v5987_v11 = vpop.permute.xlu0 %2153  ;;  %v1808_v20 = vshrl.u32 %v3693_v48, 16  ;;  %v1811_v40 = vshll.u32 %v3693_v48, 16  ;;  %v2987_v53 = vsel %vm2981_vm12, %v2954_v18, %v5814_v10  ;;  %v3840_v58 = vcombine.low %v1418_v63, %v1421_v61 }
 0x13c   : > { %v5997_v32 = vpop.permute.xlu1 %2247  ;;  %v1365_v60 = vsel %vm4484_vm2, %v1363_v3, %v1364_v37  ;;  %v1616_v39 = vshrl.u32 %v5985_v4, 16  ;;  %2491 = vrot.lane.b32.xlu0 %v3831_v23, %s4367_s8  ;;  %v3005_v8 = vsel %vm2981_vm12, %v2972_v29, %v5838_v44  ;;  %v2989_v14 = vsel %vm2981_vm12, %v2956_v49, %v5862_v27  ;;  %v6032_v27 = vld [vmem:[%s4453_s30 + $0xd0] sm:$0xf] }
 0x13d   : > { %v3832_v17 = vcombine.low %v1362_v0, %v1365_v60  ;;  %v1619_v10 = vshll.u32 %v5985_v4, 16  ;;  %v1810_v54 = vrot.slane %v1808_v20, 4  ;;  %v1821_v13 = vshrl.u32 %v6004_v22, 16 }
 0x13e   : > { %2509 = vrot.lane.b32.xlu1 %v3840_v58, %s4367_s8  ;;  %v3855_v19 = vcombine.low %v3693_v48, %v6004_v22  ;;  %v3036_v44 = vsel %vm3014_vm13, %v3003_v5, %v5888_v6  ;;  %v1813_v59 = vrot.slane %v1811_v40, 5  ;;  %v3020_v18 = vsel %vm3014_vm13, %v2987_v53, %v5901_v1  ;;  %v6044_v6 = vld [vmem:[%s4453_s30 + $0xc8] sm:$0x1] }
 0x13f   : > { %v6021_v24 = vpop.permute.xlu0 %2231  ;;  %v1832_v57 = vshrl.u32 %v3695_v35, 16  ;;  %v1835_v51 = vshll.u32 %v3695_v35, 16  ;;  %4119 = vmatprep.mubr.msk.bf16.mxu1 %vm3074_vm14, %v3036_v44  ;;  %v1618_v62 = vrot.slane %v1616_v39, 4  ;;  %v1621_v9 = vrot.slane %v1619_v10, 5  ;;  %4103 = vmatprep.mubr.msk.bf16.mxu0 %vm3074_vm14, %v3020_v18  ;;  %v6076_v10 = vld [vmem:[%s4453_s30 + $0xd4] sm:$0x1] }
 0x140   : > { %v1640_v16 = vshrl.u32 %v6019_v7, 16  ;;  %v1643_v50 = vshll.u32 %v6019_v7, 16  ;;  %2493 = vrot.lane.b32.xlu0 %v3832_v17, %s4367_s8  ;;  %v1629_v1 = vshrl.u32 %v6027_v25, 16  ;;  %v3847_v41 = vcombine.low %v5985_v4, %v6027_v25  ;;  %v6063_v4 = vld [vmem:[%s4453_s30 + $0x68] sm:$0x1] }
 0x141   : > { %v1845_v12 = vshrl.u32 %v6032_v27, 16  ;;  %v3856_v36 = vcombine.low %v3695_v35, %v6032_v27  ;;  %v1834_v45 = vrot.slane %v1832_v57, 4  ;;  %v1837_v38 = vrot.slane %v1835_v51, 5 }
 0x142   : > { %v6046_v52 = vpop.permute.xlu1 %2249  ;;  %2603 = vrot.lane.b32.xlu1 %v3855_v19, %s4368_s9  ;;  %v1653_v46 = vshrl.u32 %v6038_v55, 16  ;;  %v3848_v48 = vcombine.low %v6019_v7, %v6038_v55  ;;  %v1814_v23 = vor.u32 %v1813_v59, %v1810_v54  ;;  %v1817_v63 = vshll.u32 %v6004_v22, 16 }
 0x143   : > { %v6054_v47 = vpop.permute.xlu0 %2233  ;;  %v1823_v28 = vrot.slane %v1821_v13, 4  ;;  %v1827_v37 = vshll.u32 %v6044_v6, 16  ;;  %v1642_v29 = vrot.slane %v1640_v16, 4  ;;  %v1645_v49 = vrot.slane %v1643_v50, 5 }
 0x144   : > { %v1622_v0 = vor.u32 %v1621_v9, %v1618_v62  ;;  %v1625_v3 = vshll.u32 %v6027_v25, 16  ;;  %2587 = vrot.lane.b32.xlu0 %v3847_v41, %s4368_s9  ;;  %v1815_v61 = vrot.slane %v1814_v23, 4  ;;  %v1819_v20 = vrot.slane %v1817_v63, 5 }
 0x145   : > { %v1829_v40 = vrot.slane %v1827_v37, 5  ;;  %v1631_v53 = vrot.slane %v1629_v1, 4  ;;  %v1635_v35 = vshll.u32 %v6063_v4, 16  ;;  %v3038_v17 = vsel %vm3014_vm13, %v3005_v8, %v5936_v2  ;;  %v6087_v2 = vld [vmem:[%s4453_s30 + $0x74] sm:$0x1] }
 0x146   : > { %v6066_v5 = vpop.permute.xlu1 %2343  ;;  %2605 = vrot.lane.b32.xlu1 %v3856_v36, %s4368_s9  ;;  %v1623_v60 = vrot.slane %v1622_v0, 4  ;;  %v1627_v39 = vrot.slane %v1625_v3, 5  ;;  %v1820_v7 = vsel %vm4542_vm5, %v1815_v61, %v1819_v20  ;;  %v1824_v54 = vor.u32 %v1823_v28, %v1819_v20  ;;  %4120 = vmatmul.mubr.msk.bf16.gmra.mrb[4].mxu1 %vm3074_vm14, %v3038_v17 }
 0x147   : > { %v6069_v58 = vpop.permute.xlu0 %2327  ;;  %v3022_v13 = vsel %vm3014_vm13, %v2989_v14, %v5952_v56  ;;  %v1838_v19 = vor.u32 %v1837_v38, %v1834_v45  ;;  %v1637_v18 = vrot.slane %v1635_v35, 5  ;;  %v1841_v57 = vshll.u32 %v6032_v27, 16 }
 0x148   : > { %v1628_v44 = vsel %vm4542_vm5, %v1623_v60, %v1627_v39  ;;  %v1632_v59 = vor.u32 %v1631_v53, %v1627_v39  ;;  %4104 = vmatmul.mubr.msk.bf16.gmra.mrb[4].mxu0 %vm3074_vm14, %v3022_v13  ;;  %2589 = vrot.lane.b32.xlu0 %v3848_v48, %s4368_s9  ;;  %v1825_v8 = vrot.slane %v1824_v54, 4  ;;  %v1847_v56 = vrot.slane %v1845_v12, 4  ;;  %v3727_v48 = vld [vmem:[%s4453_s30 + $0xc0] sm:$0xe]  ;;  %v3728_v54 = vld [vmem:[%s4453_s30 + $0xcc] sm:$0xe] }
 0x149   : > { %v1839_v51 = vrot.slane %v1838_v19, 4  ;;  %v1851_v14 = vshll.u32 %v6076_v10, 16  ;;  %v1843_v16 = vrot.slane %v1841_v57, 5  ;;  %v1646_v50 = vor.u32 %v1645_v49, %v1642_v29  ;;  %v3719_v49 = vld [vmem:[%s4453_s30 + $0x60] sm:$0xe] }
 0x14a   : > { %v6092_v62 = vpop.permute.xlu1 %2345  ;;  %v1633_v9 = vrot.slane %v1632_v59, 4  ;;  %v1649_v1 = vshll.u32 %v6038_v55, 16  ;;  %v1830_v36 = vsel %vm4542_vm5, %v1825_v8, %v1829_v40  ;;  %v1655_v45 = vrot.slane %v1653_v46, 4  ;;  %v3720_v57 = vld [vmem:[%s4453_s30 + $0x6c] sm:$0xe] }
 0x14b   : > { %v6095_v41 = vpop.permute.xlu0 %2329  ;;  %v1659_v38 = vshll.u32 %v6087_v2, 16  ;;  %v3871_v12 = vcombine.low %v1820_v7, %v1830_v36  ;;  %v1848_v63 = vor.u32 %v1847_v56, %v1843_v16  ;;  %v1853_v28 = vrot.slane %v1851_v14, 5 }
 0x14c   : > { %v1638_v23 = vsel %vm4542_vm5, %v1633_v9, %v1637_v18  ;;  %v1647_v0 = vrot.slane %v1646_v50, 4  ;;  %v1651_v29 = vrot.slane %v1649_v1, 5  ;;  %v1844_v3 = vsel %vm4542_vm5, %v1839_v51, %v1843_v16 }
 0x14d   : > { %v3863_v37 = vcombine.low %v1628_v44, %v1638_v23  ;;  %2683 = vrot.lane.b32.xlu1 %v3871_v12, %s4369_s10  ;;  %v1849_v46 = vrot.slane %v1848_v63, 4  ;;  %v3743_v61 = vrot.slane %v3727_v48, 9  ;;  %v1661_v40 = vrot.slane %v1659_v38, 5 }
 0x14e   : > { %v1656_v20 = vor.u32 %v1655_v45, %v1651_v29  ;;  %v2019_v53 = vrot.slane %v6004_v22, 5  ;;  %v2022_v60 = vrot.slane %v6044_v6, 5  ;;  %v1652_v17 = vsel %vm4542_vm5, %v1647_v0, %v1651_v29 }
 0x14f   : > { %2667 = vrot.lane.b32.xlu0 %v3863_v37, %s4369_s10  ;;  %v1854_v35 = vsel %vm4542_vm5, %v1849_v46, %v1853_v28  ;;  %v3735_v7 = vrot.slane %v3719_v49, 9  ;;  %v1963_v6 = vrot.slane %v6027_v25, 5  ;;  %v1966_v18 = vrot.slane %v6063_v4, 5 }
 0x150   : > { %v3872_v19 = vcombine.low %v1844_v3, %v1854_v35  ;;  %v1657_v44 = vrot.slane %v1656_v20, 4  ;;  %v2020_v59 = vsel %vm4484_vm2, %v3743_v61, %v2019_v53  ;;  %v2021_v22 = vrot.slane %v2019_v53, 4  ;;  %v4271_v53 = vld [vmem:[%s4453_s30 + $0x90] sm:$0xf] }
 0x151   : > { %v6110_v39 = vpop.permute.xlu1 %2423  ;;  %v3744_v56 = vrot.slane %v3728_v54, 9  ;;  %v2026_v14 = vrot.slane %v6032_v27, 5  ;;  %v1964_v50 = vsel %vm4484_vm2, %v3735_v7, %v1963_v6  ;;  %v1965_v25 = vrot.slane %v1963_v6, 4  ;;  %v4273_v7 = vld [vmem:[%s4453_s30 + $0x30] sm:$0xf] }
 0x152   : > { %v6117_v13 = vpop.permute.xlu0 %2407  ;;  %2685 = vrot.lane.b32.xlu1 %v3872_v19, %s4369_s10  ;;  %v1662_v8 = vsel %vm4542_vm5, %v1657_v44, %v1661_v40  ;;  %v2023_v51 = vsel %vm4484_vm2, %v2021_v22, %v2022_v60  ;;  %v2029_v36 = vrot.slane %v6076_v10, 5  ;;  %v3736_v30 = vrot.slane %v3720_v57, 9  ;;  %v4272_v60 = vld [vmem:[%s4453_s30 + $0x94] sm:$0xf] }
 0x153   : > { %v3864_v9 = vcombine.low %v1652_v17, %v1662_v8  ;;  %v3887_v16 = vcombine.low %v2020_v59, %v2023_v51  ;;  %v2027_v4 = vsel %vm4484_vm2, %v3744_v56, %v2026_v14  ;;  %v2028_v1 = vrot.slane %v2026_v14, 4  ;;  %v4274_v54 = vld [vmem:[%s4453_s30 + $0x34] sm:$0xf] }
 0x154   : > { %v1967_v27 = vsel %vm4484_vm2, %v1965_v25, %v1966_v18  ;;  %v1970_v38 = vrot.slane %v6038_v55, 5  ;;  %v1973_v48 = vrot.slane %v6087_v2, 5  ;;  %v3757_v35 = vcombine.low %v4271_v53, %v4272_v60 }
 0x155   : > { %2669 = vrot.lane.b32.xlu0 %v3864_v9, %s4369_s10  ;;  %v3879_v23 = vcombine.low %v1964_v50, %v1967_v27  ;;  %v2030_v10 = vsel %vm4484_vm2, %v2028_v1, %v2029_v36  ;;  %v3749_v19 = vcombine.low %v4273_v7, %v4274_v54  ;;  %v4276_v50 = vld [vmem:[%s4453_s30 + $0xa0] sm:$0xf]  ;;  %v4277_v36 = vld [vmem:[%s4453_s30 + $0x3c] sm:$0xf] }
 0x156   : > { %v6135_v45 = vpop.permute.xlu1 %2425  ;;  %2763 = vrot.lane.b32.xlu1 %v3887_v16, %s4370_s11  ;;  %v3888_v63 = vcombine.low %v2027_v4, %v2030_v10  ;;  %v1971_v28 = vsel %vm4484_vm2, %v3736_v30, %v1970_v38  ;;  %v1972_v37 = vrot.slane %v1970_v38, 4  ;;  %v2806_v21 = vsel %vm2767_vm6, %v3757_v35, %v5913_v43  ;;  %v4275_v16 = vld [vmem:[%s4453_s30 + $0x9c] sm:$0xf]  ;;  %v4278_v30 = vld [vmem:[%s4453_s30 + $0x40] sm:$0xf] }
 0x157   : > { %v6142_v12 = vpop.permute.xlu0 %2409  ;;  %v2842_v59 = vsel %vm2816_vm7, %v2806_v21, %v5997_v32  ;;  %v2782_v57 = vsel %vm2767_vm6, %v3749_v19, %v5923_v42  ;;  %v3750_v27 = vcombine.low %v4277_v36, %v4278_v30 }
 0x158   : > { %v1974_v55 = vsel %vm4484_vm2, %v1972_v37, %v1973_v48  ;;  %v2875_v22 = vsel %vm2849_vm8, %v2842_v59, %v6066_v5  ;;  %v2826_v8 = vsel %vm2816_vm7, %v2782_v57, %v6021_v24 }
 0x159   : > { %2747 = vrot.lane.b32.xlu0 %v3879_v23, %s4370_s11  ;;  %v3880_v29 = vcombine.low %v1971_v28, %v1974_v55  ;;  %v2908_v18 = vsel %vm2882_vm9, %v2875_v22, %v6110_v39  ;;  %v2859_v32 = vsel %vm2849_vm8, %v2826_v8, %v6069_v58  ;;  %v3758_v58 = vcombine.low %v4275_v16, %v4276_v50 }
 0x15a   : > { %v2504_v0 = vpop.permute.xlu1 %2503  ;;  %2765 = vrot.lane.b32.xlu1 %v3888_v63, %s4370_s11  ;;  %v2892_v39 = vsel %vm2882_vm9, %v2859_v32, %v6117_v13  ;;  %v2785_v63 = vsel %vm2767_vm6, %v3750_v27, %v5987_v11  ;;  %v4280_v32 = vld [vmem:[%s4453_s30 + $0xac] sm:$0xf]  ;;  %v3760_v16 = vcombine.low %v5716_v15, %v5726_v34  ;;  %v3752_v50 = vcombine.low %v5741_v31, %v5752_v26 }
 0x15b   : > { %v2488_v2 = vpop.permute.xlu0 %2487  ;;  %v2941_v43 = vsel %vm2915_vm10, %v2908_v18, %v2504_v0  ;;  %v2809_v13 = vsel %vm2767_vm6, %v3758_v58, %v5970_v33  ;;  %v2828_v33 = vsel %vm2816_vm7, %v2785_v63, %v6054_v47 }
 0x15c   : > { %v2925_v9 = vsel %vm2915_vm10, %v2892_v39, %v2488_v2  ;;  %v2844_v38 = vsel %vm2816_vm7, %v2809_v13, %v6046_v52  ;;  %v2861_v52 = vsel %vm2849_vm8, %v2828_v33, %v6095_v41  ;;  %v4282_v39 = vld [vmem:[%s4453_s30 + $0x4c] sm:$0xf]  ;;  %v6241_v33 = vld [vmem:[%s6376_s2] ss:$0 sm:$0xff] }
 0x15d   : > { %2749 = vrot.lane.b32.xlu0 %v3880_v29, %s4370_s11  ;;  %v2877_v48 = vsel %vm2849_vm8, %v2844_v38, %v6092_v62  ;;  %s6319_s11 = scalar_lea.hbm %s6377_s3, %s3978_s7 }
 0x15e   : > { %v2506_v49 = vpop.permute.xlu1 %2505  ;;  %v2910_v10 = vsel %vm2882_vm9, %v2877_v48, %v6135_v45  ;;  %v2894_v45 = vsel %vm2882_vm9, %v2861_v52, %v6142_v12 }
 0x15f   : > { %v2490_v3 = vpop.permute.xlu0 %2489  ;;  %v2943_v28 = vsel %vm2915_vm10, %v2910_v10, %v2506_v49 }
 0x160   : > { %v2927_v11 = vsel %vm2915_vm10, %v2894_v45, %v2490_v3 }
 0x162   : > { %v2600_v46 = vpop.permute.xlu1 %2599 }
 0x163   : > { %v2584_v61 = vpop.permute.xlu0 %2583  ;;  %v2974_v51 = vsel %vm2948_vm11, %v2941_v43, %v2600_v46 }
 0x164   : > { %v2958_v24 = vsel %vm2948_vm11, %v2925_v9, %v2584_v61 }
 0x166   : > { %v2602_v20 = vpop.permute.xlu1 %2601 }
 0x167   : > { %v2586_v40 = vpop.permute.xlu0 %2585  ;;  %v2976_v37 = vsel %vm2948_vm11, %v2943_v28, %v2602_v20 }
 0x168   : > { %v2960_v47 = vsel %vm2948_vm11, %v2927_v11, %v2586_v40 }
 0x16d   : > { %v2680_v17 = vpop.permute.xlu1 %2679 }
 0x16e   : > { %v2664_v44 = vpop.permute.xlu0 %2663  ;;  %v3007_v5 = vsel %vm2981_vm12, %v2974_v51, %v2680_v17  ;;  %v4279_v51 = vld [vmem:[%s4453_s30 + $0xa8] sm:$0xf] }
 0x16f   : > { %v2991_v25 = vsel %vm2981_vm12, %v2958_v24, %v2664_v44 }
 0x171   : > { %v2682_v6 = vpop.permute.xlu1 %2681 }
 0x172   : > { %v3009_v0 = vsel %vm2981_vm12, %v2976_v37, %v2682_v6 }
 0x175   : > { %v2666_v56 = vpop.permute.xlu0 %2665  ;;  %v2760_v14 = vpop.permute.xlu1 %2759 }
 0x176   : > { %v3040_v42 = vsel %vm3014_vm13, %v3007_v5, %v2760_v14  ;;  %v2993_v29 = vsel %vm2981_vm12, %v2960_v47, %v2666_v56  ;;  %v3759_v5 = vcombine.low %v4279_v51, %v4280_v32  ;;  %v4281_v14 = vld [vmem:[%s4453_s30 + $0x48] sm:$0xf]  ;;  %s185_s30 = sand.u32 1, %s4345_s13  }
 0x177   : > { %4123 = vmatprep.mubr.msk.bf16.mxu1 %vm3074_vm14, %v3040_v42  ;;  %v3751_v42 = vcombine.low %v4281_v14, %v4282_v39  ;;  %s3567_s4 = sshll.u32 %s185_s30, 7  ;;  %s6327_s15 = scalar_lea.sflag [#allocation3], %s185_s30 }
 0x178   : > { %s6274_s5 = scalar_lea.vmem [#allocation2], %s3567_s4 }
 0x179   : > { %v2744_v4 = vpop.permute.xlu0 %2743  ;;  %s3480_s8 = sshll.u32 %s6274_s5, 4  ;;  %s6321_s8 = int_to_ptr.vmem [resolvable:$true] %s3480_s8 }
 0x17a   : > { %v3024_v1 = vsel %vm3014_vm13, %v2991_v25, %v2744_v4  ;;  %s4283_s18 = scalar_lea.vmem %s6321_s8, 2048  ;;  %p4290_p1 = scmp.lt.s32.totalorder %s6321_s8, %s4288_s21 }
 0x17b   : > { %4107 = vmatprep.mubr.msk.bf16.mxu0 %vm3074_vm14, %v3024_v1  ;;  %p4284_p12 = scmp.ne.s32.totalorder %s6321_s8, %s4283_s18  ;;  %p4291_p2 = scmp.lt.s32.totalorder %s4289_s23, %s4283_s18 }
 0x17d   : > { %p4285_p13 = pnand %p4284_p12, %p4433_p4  ;;  %p4292_p3 = por %p4291_p2, %p4290_p1 }
 0x17f   : > { %v2172_v23 = vpop.permute.xlu1 %2171  ;;  %p4286_p0 = pneg %p4285_p13 }
 0x180   : > { %v2812_v24 = vsel %vm2767_vm6, %v3759_v5, %v2172_v23 }
 0x181   : > { %p4293_p5 = pnand %p4292_p3, %p4286_p0 }
 0x183   : > { %v2156_v62 = vpop.permute.xlu0 %2155  ;;  %v2762_v55 = vpop.permute.xlu1 %2761 }
 0x184   : > { %v3042_v2 = vsel %vm3014_vm13, %v3009_v0, %v2762_v55  ;;  %v2788_v1 = vsel %vm2767_vm6, %v3751_v42, %v2156_v62 }
 0x185   : > { %4124 = vmatmul.mubr.msk.bf16.gmra.mrb[8].mxu1 %vm3074_vm14, %v3042_v2 }
 0x187   : > { %v2746_v49 = vpop.permute.xlu0 %2745 }
 0x188   : > { %v3026_v41 = vsel %vm3014_vm13, %v2993_v29, %v2746_v49 }
 0x189   : > { %4108 = vmatmul.mubr.msk.bf16.gmra.mrb[8].mxu0 %vm3074_vm14, %v3026_v41 }
 0x18c   : > { %v2174_v46 = vpop.permute.xlu1 %2173 }
 0x18d   : > { %v2815_v36 = vsel %vm2767_vm6, %v3760_v16, %v2174_v46 }
 0x190   : > { %v2158_v61 = vpop.permute.xlu0 %2157  ;;  %v2252_v20 = vpop.permute.xlu1 %2251 }
 0x191   : > { %v2846_v58 = vsel %vm2816_vm7, %v2812_v24, %v2252_v20  ;;  %v2791_v15 = vsel %vm2767_vm6, %v3752_v50, %v2158_v61 }
 0x194   : > { %v2236_v53 = vpop.permute.xlu0 %2235  ;;  %v2254_v12 = vpop.permute.xlu1 %2253 }
 0x195   : > { %v2830_v30 = vsel %vm2816_vm7, %v2788_v1, %v2236_v53  ;;  %v2848_v34 = vsel %vm2816_vm7, %v2815_v36, %v2254_v12 }
 0x198   : > { %v2238_v60 = vpop.permute.xlu0 %2237  ;;  %v2348_v35 = vpop.permute.xlu1 %2347 }
 0x199   : > { %v2879_v25 = vsel %vm2849_vm8, %v2846_v58, %v2348_v35  ;;  %v2832_v48 = vsel %vm2816_vm7, %v2791_v15, %v2238_v60 }
 0x19c   : > { %v2332_v3 = vpop.permute.xlu0 %2331  ;;  %v2350_v17 = vpop.permute.xlu1 %2349 }
 0x19d   : > { %v2863_v31 = vsel %vm2849_vm8, %v2830_v30, %v2332_v3  ;;  %v2881_v23 = vsel %vm2849_vm8, %v2848_v34, %v2350_v17 }
 0x1a0   : > { %v2334_v21 = vpop.permute.xlu0 %2333 }
 0x1a1   : > { %v2865_v37 = vsel %vm2849_vm8, %v2832_v48, %v2334_v21 }
 0x1a4   : > { %v2428_v40 = vpop.permute.xlu1 %2427 }
 0x1a5   : > { %v2412_v7 = vpop.permute.xlu0 %2411  ;;  %v2912_v13 = vsel %vm2882_vm9, %v2879_v25, %v2428_v40 }
 0x1a6   : > { %v2896_v10 = vsel %vm2882_vm9, %v2863_v31, %v2412_v7 }
 0x1a8   : > { %v2430_v54 = vpop.permute.xlu1 %2429 }
 0x1a9   : > { %v2914_v52 = vsel %vm2882_vm9, %v2881_v23, %v2430_v54 }
 0x1aa   : > { %v2414_v19 = vpop.permute.xlu0 %2413 }
 0x1ab   : > { %v2898_v45 = vsel %vm2882_vm9, %v2865_v37, %v2414_v19 }
 0x1ac   : > { %v2508_v44 = vpop.permute.xlu1 %2507 }
 0x1ad   : > { %v2945_v27 = vsel %vm2915_vm10, %v2912_v13, %v2508_v44 }
 0x1ae   : > { %v2492_v59 = vpop.permute.xlu0 %2491 }
 0x1af   : > { %v2929_v0 = vsel %vm2915_vm10, %v2896_v10, %v2492_v59 }
 0x1b0   : > { %v2510_v22 = vpop.permute.xlu1 %2509 }
 0x1b1   : > { %v2947_v2 = vsel %vm2915_vm10, %v2914_v52, %v2510_v22 }
 0x1b2   : > { %v2494_v6 = vpop.permute.xlu0 %2493 }
 0x1b3   : > { %v2931_v12 = vsel %vm2915_vm10, %v2898_v45, %v2494_v6 }
 0x1b4   : > { %v2604_v18 = vpop.permute.xlu1 %2603 }
 0x1b5   : > { %v2978_v26 = vsel %vm2948_vm11, %v2945_v27, %v2604_v18 }
 0x1b6   : > { %v2588_v57 = vpop.permute.xlu0 %2587 }
 0x1b7   : > { %v2962_v11 = vsel %vm2948_vm11, %v2929_v0, %v2588_v57 }
 0x1b8   : > { %v2606_v43 = vpop.permute.xlu1 %2605 }
 0x1b9   : > { %v2980_v49 = vsel %vm2948_vm11, %v2947_v2, %v2606_v43 }
 0x1ba   : > { %v2590_v8 = vpop.permute.xlu0 %2589 }
 0x1bb   : > { %v2964_v40 = vsel %vm2948_vm11, %v2931_v12, %v2590_v8 }
 0x1bf   : > { %v2684_v56 = vpop.permute.xlu1 %2683 }
 0x1c0   : > { %v3011_v63 = vsel %vm2981_vm12, %v2978_v26, %v2684_v56 }
 0x1c1   : > { %v2668_v9 = vpop.permute.xlu0 %2667 }
 0x1c2   : > { %v2995_v41 = vsel %vm2981_vm12, %v2962_v11, %v2668_v9 }
 0x1c4   : > { %v2686_v4 = vpop.permute.xlu1 %2685 }
 0x1c5   : > { %v3013_v60 = vsel %vm2981_vm12, %v2980_v49, %v2686_v4 }
 0x1c7   : > { %v2670_v38 = vpop.permute.xlu0 %2669 }
 0x1c8   : > { %v2764_v28 = vpop.permute.xlu1 %2763  ;;  %v2997_v22 = vsel %vm2981_vm12, %v2964_v40, %v2670_v38 }
 0x1c9   : > { %v3044_v62 = vsel %vm3014_vm13, %v3011_v63, %v2764_v28 }
 0x1ca   : > { %v4101_v55 = vpop.f32.mrb[0].mxu0  ;;  %4127 = vmatprep.mubr.msk.bf16.mxu1 %vm3074_vm14, %v3044_v62 }
 0x1cb   : > { %v4117_v47 = vpop.f32.mrb[0].mxu1  ;;  %v3145_v29 = vpop.f32.mrb[1].mxu0  ;;  %v3154_v61 = vadd.f32 %v4101_v55, %v6241_v33 }
 0x1cc   : > { %v2748_v46 = vpop.permute.xlu0 %2747  ;;  %v3218_v20 = vadd.f32 %v4117_v47, %v6241_v33  ;;  %v3209_v53 = vpop.f32.mrb[1].mxu1  ;;  %v3146_v17 = vadd.f32 %v6241_v33, %v3145_v29 }
 0x1cd   : > { %v3028_v35 = vsel %vm3014_vm13, %v2995_v41, %v2748_v46  ;;  %v2766_v3 = vpop.permute.xlu1 %2765  ;;  %v4102_v21 = vpop.f32.mrb[2].mxu0  ;;  %v3210_v54 = vadd.f32 %v6241_v33, %v3209_v53  ;;  %v3274_v8 = vmax.f32 %v3154_v61, 0.0 }
 0x1ce   : > { %4111 = vmatprep.mubr.msk.bf16.mxu0 %vm3074_vm14, %v3028_v35  ;;  %v3046_v7 = vsel %vm3014_vm13, %v3013_v60, %v2766_v3  ;;  %v3157_v19 = vadd.f32 %v4102_v21, %v6241_v33  ;;  %v4118_v44 = vpop.f32.mrb[2].mxu1  ;;  %v3148_v59 = vpop.f32.mrb[3].mxu0  ;;  %v3290_v51 = vmax.f32 %v3218_v20, 0.0  ;;  %v3272_v14 = vmax.f32 %v3146_v17, 0.0 }
 0x1cf   : > { %4128 = vmatmul.mubr.msk.bf16.gmra.mrb[12].mxu1 %vm3074_vm14, %v3046_v7  ;;  %v3221_v6 = vadd.f32 %v4118_v44, %v6241_v33  ;;  %v3149_v18 = vadd.f32 %v6241_v33, %v3148_v59  ;;  %v3212_v57 = vpop.f32.mrb[3].mxu1  ;;  %v3288_v9 = vmax.f32 %v3210_v54, 0.0 }
 0x1d0   : > { %v2750_v43 = vpop.permute.xlu0 %2749  ;;  %v3275_v32 = vmax.f32 %v3157_v19, 0.0  ;;  %v3213_v5 = vadd.f32 %v6241_v33, %v3212_v57 }
 0x1d1   : > { %v3030_v56 = vsel %vm3014_vm13, %v2997_v22, %v2750_v43  ;;  %v3291_v39 = vmax.f32 %v3221_v6, 0.0  ;;  %v3273_v42 = vmax.f32 %v3149_v18, 0.0 }
 0x1d2   : > { %4112 = vmatmul.mubr.msk.bf16.gmra.mrb[12].mxu0 %vm3074_vm14, %v3030_v56  ;;  %v3987_v24 = vpack.c.bf16 %v3275_v32, %v3274_v8  ;;  %v3289_v16 = vmax.f32 %v3213_v5, 0.0 }
 0x1d3   : > { %v4027_v50 = vpack.c.bf16 %v3291_v39, %v3290_v51  ;;  %v3982_v58 = vpack.c.bf16 %v3273_v42, %v3272_v14 }
 0x1d4   : > { %4059 = vst [vmem:[%s6274_s5 + $0x8] sm:$0xff] %v3987_v24   ;;  %v4022_v25 = vpack.c.bf16 %v3289_v16, %v3288_v9 }
 0x1d5   : > { %4067 = vst [vmem:[%s6274_s5 + $0x48] sm:$0xff] %v4027_v50   ;;  %3983 = vst [vmem:[%s6274_s5] sm:$0xff] %v3982_v58  }
 0x1d6   : > { %4066 = vst [vmem:[%s6274_s5 + $0x40] sm:$0xff] %v4022_v25  }
 0x219   : > { %v4121_v4 = vpop.f32.mrb[4].mxu1 }
 0x21a   : > { %v3234_v13 = vadd.f32 %v4121_v4, %v6241_v33  ;;  %v3225_v36 = vpop.f32.mrb[5].mxu1 }
 0x21b   : > { %v4105_v1 = vpop.f32.mrb[4].mxu0  ;;  %v3226_v15 = vadd.f32 %v6241_v33, %v3225_v36  ;;  %v4122_v34 = vpop.f32.mrb[6].mxu1 }
 0x21c   : > { %v3170_v30 = vadd.f32 %v4105_v1, %v6241_v33  ;;  %v3161_v27 = vpop.f32.mrb[5].mxu0  ;;  %v3237_v38 = vadd.f32 %v4122_v34, %v6241_v33  ;;  %v3228_v48 = vpop.f32.mrb[7].mxu1  ;;  %v3294_v28 = vmax.f32 %v3234_v13, 0.0 }
 0x21d   : > { %v3162_v31 = vadd.f32 %v6241_v33, %v3161_v27  ;;  %v4106_v26 = vpop.f32.mrb[6].mxu0  ;;  %v3229_v63 = vadd.f32 %v6241_v33, %v3228_v48  ;;  %v3292_v62 = vmax.f32 %v3226_v15, 0.0 }
 0x21e   : > { %v3173_v23 = vadd.f32 %v4106_v26, %v6241_v33  ;;  %v3164_v10 = vpop.f32.mrb[7].mxu0  ;;  %v3295_v37 = vmax.f32 %v3237_v38, 0.0  ;;  %v3278_v0 = vmax.f32 %v3170_v30, 0.0 }
 0x21f   : > { %v3165_v52 = vadd.f32 %v6241_v33, %v3164_v10  ;;  %v3293_v45 = vmax.f32 %v3229_v63, 0.0  ;;  %v3276_v2 = vmax.f32 %v3162_v31, 0.0 }
 0x220   : > { %v3279_v55 = vmax.f32 %v3173_v23, 0.0  ;;  %v4037_v11 = vpack.c.bf16 %v3295_v37, %v3294_v28 }
 0x221   : > { %v3277_v47 = vmax.f32 %v3165_v52, 0.0  ;;  %v4032_v49 = vpack.c.bf16 %v3293_v45, %v3292_v62 }
 0x222   : > { %v3997_v29 = vpack.c.bf16 %v3279_v55, %v3278_v0  ;;  %4069 = vst [vmem:[%s6274_s5 + $0x58] sm:$0xff] %v4037_v11  }
 0x223   : > { %v3992_v41 = vpack.c.bf16 %v3277_v47, %v3276_v2  ;;  %4068 = vst [vmem:[%s6274_s5 + $0x50] sm:$0xff] %v4032_v49  }
 0x224   : > { %4061 = vst [vmem:[%s6274_s5 + $0x18] sm:$0xff] %v3997_v29  }
 0x225   : > { %4060 = vst [vmem:[%s6274_s5 + $0x10] sm:$0xff] %v3992_v41  }
 0x258   : > { %v4125_v46 = vpop.f32.mrb[8].mxu1 }
 0x259   : > { %v3250_v61 = vadd.f32 %v4125_v46, %v6241_v33  ;;  %v3241_v20 = vpop.f32.mrb[9].mxu1 }
 0x25a   : > { %v3242_v53 = vadd.f32 %v6241_v33, %v3241_v20  ;;  %v4126_v12 = vpop.f32.mrb[10].mxu1 }
 0x25b   : > { %v3253_v60 = vadd.f32 %v4126_v12, %v6241_v33  ;;  %v3244_v35 = vpop.f32.mrb[11].mxu1  ;;  %v3298_v40 = vmax.f32 %v3250_v61, 0.0 }
 0x25c   : > { %v4109_v3 = vpop.f32.mrb[8].mxu0  ;;  %v3245_v17 = vadd.f32 %v6241_v33, %v3244_v35  ;;  %v3296_v44 = vmax.f32 %v3242_v53, 0.0 }
 0x25d   : > { %v3186_v21 = vadd.f32 %v4109_v3, %v6241_v33  ;;  %v3177_v7 = vpop.f32.mrb[9].mxu0  ;;  %v3299_v54 = vmax.f32 %v3253_v60, 0.0 }
 0x25e   : > { %v3178_v19 = vadd.f32 %v6241_v33, %v3177_v7  ;;  %v4110_v59 = vpop.f32.mrb[10].mxu0  ;;  %v3297_v22 = vmax.f32 %v3245_v17, 0.0 }
 0x25f   : > { %v3189_v6 = vadd.f32 %v4110_v59, %v6241_v33  ;;  %v4047_v18 = vpack.c.bf16 %v3299_v54, %v3298_v40  ;;  %v3180_v57 = vpop.f32.mrb[11].mxu0  ;;  %v3282_v51 = vmax.f32 %v3186_v21, 0.0 }
 0x260   : > { %v3181_v43 = vadd.f32 %v6241_v33, %v3180_v57  ;;  %v4042_v8 = vpack.c.bf16 %v3297_v22, %v3296_v44  ;;  %v3280_v5 = vmax.f32 %v3178_v19, 0.0 }
 0x261   : > { %v3283_v32 = vmax.f32 %v3189_v6, 0.0  ;;  %4071 = vst [vmem:[%s6274_s5 + $0x68] sm:$0xff] %v4047_v18  }
 0x262   : > { %v3281_v56 = vmax.f32 %v3181_v43, 0.0  ;;  %4070 = vst [vmem:[%s6274_s5 + $0x60] sm:$0xff] %v4042_v8  }
 0x263   : > { %v4007_v14 = vpack.c.bf16 %v3283_v32, %v3282_v51 }
 0x264   : > { %v4002_v39 = vpack.c.bf16 %v3281_v56, %v3280_v5 }
 0x265   : > { %4063 = vst [vmem:[%s6274_s5 + $0x28] sm:$0xff] %v4007_v14  }
 0x266   : > { %4062 = vst [vmem:[%s6274_s5 + $0x20] sm:$0xff] %v4002_v39  }
 0x2a2   : > { %v4129_v42 = vpop.f32.mrb[12].mxu1 }
 0x2a3   : > { %v3266_v9 = vadd.f32 %v4129_v42, %v6241_v33  ;;  %v3257_v24 = vpop.f32.mrb[13].mxu1 }
 0x2a4   : > { %v3258_v16 = vadd.f32 %v6241_v33, %v3257_v24  ;;  %v4130_v50 = vpop.f32.mrb[14].mxu1 }
 0x2a5   : > { %v4113_v58 = vpop.f32.mrb[12].mxu0  ;;  %v3269_v25 = vadd.f32 %v4130_v50, %v6241_v33  ;;  %v3260_v4 = vpop.f32.mrb[15].mxu1  ;;  %v3302_v30 = vmax.f32 %v3266_v9, 0.0 }
 0x2a6   : > { %v3202_v1 = vadd.f32 %v4113_v58, %v6241_v33  ;;  %v3193_v13 = vpop.f32.mrb[13].mxu0  ;;  %v3261_v36 = vadd.f32 %v6241_v33, %v3260_v4  ;;  %v3300_v31 = vmax.f32 %v3258_v16, 0.0 }
 0x2a7   : > { %v3194_v27 = vadd.f32 %v6241_v33, %v3193_v13  ;;  %v4114_v15 = vpop.f32.mrb[14].mxu0  ;;  %v3303_v34 = vmax.f32 %v3269_v25, 0.0 }
 0x2a8   : > { %v3205_v26 = vadd.f32 %v4114_v15, %v6241_v33  ;;  %v3196_v38 = vpop.f32.mrb[15].mxu0  ;;  %v3301_v48 = vmax.f32 %v3261_v36, 0.0  ;;  %v3286_v63 = vmax.f32 %v3202_v1, 0.0 }
 0x2a9   : > { %v4057_v23 = vpack.c.bf16 %v3303_v34, %v3302_v30  ;;  %v3197_v10 = vadd.f32 %v6241_v33, %v3196_v38  ;;  %v3284_v52 = vmax.f32 %v3194_v27, 0.0 }
 0x2aa   : > { %v3287_v28 = vmax.f32 %v3205_v26, 0.0  ;;  %v4052_v37 = vpack.c.bf16 %v3301_v48, %v3300_v31 }
 0x2ab   : > { %4073 = vst [vmem:[%s6274_s5 + $0x78] sm:$0xff] %v4057_v23   ;;  %v3285_v0 = vmax.f32 %v3197_v10, 0.0 }
 0x2ac   : > { %v4017_v62 = vpack.c.bf16 %v3287_v28, %v3286_v63  ;;  %4072 = vst [vmem:[%s6274_s5 + $0x70] sm:$0xff] %v4052_v37  }
 0x2ad   : > { %v4012_v55 = vpack.c.bf16 %v3285_v0, %v3284_v52 }
 0x2ae   : > { %4065 = vst [vmem:[%s6274_s5 + $0x38] sm:$0xff] %v4017_v62  }
 0x2af   : > { %4064 = vst [vmem:[%s6274_s5 + $0x30] sm:$0xff] %v4012_v55  }
 0x2b0   : > { %4296 = shalt.err (!%p4293_p5)
}
 0x2b1   : > { %s4297_s26 = scalar_lea.hbm %s6319_s11, 2048  ;;  %s4301_s29 = scalar_lea.hbm %s6377_s3, 4096 }
 0x2b2   : > { %p4298_p6 = scmp.ne.s32.totalorder %s6319_s11, %s4297_s26  ;;  %p4302_p10 = scmp.lt.u32.totalorder %s6319_s11, %s6377_s3 }
 0x2b3   : > { %p4303_p11 = scmp.lt.u32.totalorder %s4301_s29, %s4297_s26  ;;  %p4305_p13 = scmp.lt.u32.totalorder %s4297_s26, %s6319_s11 }
 0x2b4   : > { %p4299_p7 = pnand %p4298_p6, %p4433_p4 }
 0x2b5   : > { %p4304_p12 = por %p4303_p11, %p4302_p10 }
 0x2b6   : > { %p4300_p9 = pneg %p4299_p7 }
 0x2b7   : > { %p4306_p0 = por %p4305_p13, %p4304_p12 }
 0x2b9   : > { %p4307_p1 = pnand %p4306_p0, %p4300_p9 }
 0x2bb   : > { %4310 = shalt.err (!%p4307_p1)
}
 0x2bc   : > { %s4372_s5 = smov 64  }
 0x2bd   : > { %4140 = dma.vmem_to_hbm [thread:$0]  (%p4433_p4), %s6321_s8, 2048, %s6319_s11, %s6327_s15, %s4372_s5, %s4372_s5, %s4365_s6  }
 0x2be PF: > { %p4146_p2 = scmp.ge.s32.totalorder %s4361_s17, 2  ;;  %s3495_s7 = sand.u32 1, %s4341_s12  }
 0x2bf   : > { %s3496_s9 = scalar_lea.sflag [#allocation3], %s3495_s7 }
 0x2c0   : > { %p4143_p3 = pnand %p4146_p2, %p4440_p8 }
 0x2c2   : > { %4336 = dma.done.wait (!%p4143_p3), %s3496_s9, 2048  }
 0x2c3   : > { %4338 = vsyncadd (!%p4143_p3), %s3496_s9, 4294965248  ;;  %s16_s17 = sadd.s32 1, %s4361_s17   ;;  %s6384_s12 = smov %s4345_s13 }
 0x2c4   : > { %p13_p5 = scmp.ge.s32.totalorder %s16_s17, 4   ;;  %s6385_s13 = smov %s4349_s14 }
 0x2c5   : > { %s6386_s14 = smov %s4446_s25  ;;  %s6387_s15 = smov %s4357_s16 }
 0x2c6   : > { %s6388_s16 = smov %s6390_s20  ;;  %15 = sbr.rel (!%p13_p5) target bundleno = 4 (0x4), region = 69 }
 0x2cd   :  { %3501 = vsyncpa [#allocation3], 1 }
 0x2ce   :  { %3503 = vsyncpa [#allocation3 + $0x1], 1 }

</bundles_post_ra>
